<compile_context>
chip_gen: v7x
topology: tpu7x:2x2x1
jax: 0.10.0
libtpu: 0.0.40
codegen_flags: <defaults>
</compile_context>

<pallas_src>
import functools

import numpy as np
import jax
import jax.numpy as jnp
from jax import lax
from jax.experimental import pallas as pl
from jax.experimental.pallas import tpu as pltpu


# ---------------------------------------------------------------------------
# Fused forward kernel: TB images per grid step, everything stays in VMEM
# ---------------------------------------------------------------------------
def _badnet_kernel(x_ref, m1_ref, b1_ref, r1_ref, p1_ref,
                   m2_ref, b2_ref, r2_ref, p2_ref,
                   wf1_ref, bf1_ref, wf2_ref, bf2_ref,
                   o_ref, *, tb, k, oh1, l1, oh2, l2, ph2):
    f32, bf16 = jnp.float32, jnp.bfloat16

    # ---- conv1: one bf16 matmul over the lane (w, ic) axis; the K row-taps land
    #      in disjoint l1-wide column groups and are combined by K contiguous,
    #      tile-aligned shifted row-block adds (rows = h*TB + b). ----
    z1 = jnp.dot(x_ref[...].astype(bf16), m1_ref[...],
                 preferred_element_type=f32)                 # (H*TB, K*OW1*OC1)
    acc1 = z1[0:oh1 * tb, 0:l1]
    for kh in range(1, k):
        acc1 = acc1 + z1[kh * tb:(oh1 + kh) * tb, kh * l1:(kh + 1) * l1]
    y1 = jnp.maximum(acc1 + b1_ref[...], 0.0)                # (OH1*TB, OW1*OC1) f32

    # ---- AvgPool2d(2,2): row pairs via R1 (left matmul), lane pairs via P1 ----
    pr1 = jnp.dot(r1_ref[...], y1.astype(bf16), preferred_element_type=f32)
    pooled1 = jnp.dot(pr1.astype(bf16), p1_ref[...],
                      preferred_element_type=f32)            # (PH1*TB, PW1*16)

    # ---- conv2: same one-matmul-over-lanes + shifted row-block adds ----
    z2 = jnp.dot(pooled1.astype(bf16), m2_ref[...],
                 preferred_element_type=f32)                 # (PH1*TB, K*OW2*OC2)
    acc2 = z2[0:oh2 * tb, 0:l2]
    for kh in range(1, k):
        acc2 = acc2 + z2[kh * tb:(oh2 + kh) * tb, kh * l2:(kh + 1) * l2]
    y2 = jnp.maximum(acc2 + b2_ref[...], 0.0)                # (OH2*TB, OW2*32) f32

    # ---- AvgPool2d(2,2) ----
    pr2 = jnp.dot(r2_ref[...], y2.astype(bf16), preferred_element_type=f32)
    pooled2 = jnp.dot(pr2.astype(bf16), p2_ref[...],
                      preferred_element_type=f32)            # (PH2*TB, PW2*32)

    # ---- flatten folded into wf1's row blocks + fc1 + ReLU (M = TB) ----
    h1 = jnp.dot(pooled2[0:tb, :].astype(bf16), wf1_ref[0],
                 preferred_element_type=f32)
    for ph in range(1, ph2):
        h1 = h1 + jnp.dot(pooled2[ph * tb:(ph + 1) * tb, :].astype(bf16),
                          wf1_ref[ph], preferred_element_type=f32)
    h1 = jnp.maximum(h1 + bf1_ref[...], 0.0)                 # (TB, 512)

    # ---- fc2 (lane-dense, padded to 128 outputs) + Softmax(dim=-1) in f32 ----
    logits = (jnp.dot(h1.astype(bf16), wf2_ref[...], preferred_element_type=f32)
              + bf2_ref[...])                                # padded cols -> -1e30
    m = jnp.max(logits, axis=-1, keepdims=True)
    e = jnp.exp(logits - m)
    s = jnp.sum(e, axis=-1, keepdims=True)
    o_ref[...] = (e * pl.reciprocal(s, approx=False)).astype(o_ref.dtype)


# ---------------------------------------------------------------------------
# Wrapper: single fused pallas_call, TB images per "parallel" grid step
# ---------------------------------------------------------------------------
@functools.partial(jax.jit, static_argnames=("tb", "nout"))
def badnet_forward(x_nchw, ops, *, tb, nout):
    N, IC, H, W = x_nchw.shape
    K, OC1, OC2 = 5, 16, 32
    OH1, OW1 = H - K + 1, W - K + 1
    PH1, PW1 = OH1 // 2, OW1 // 2
    OH2, OW2 = PH1 - K + 1, PW1 - K + 1
    PH2, PW2 = OH2 // 2, OW2 // 2
    L1, L2 = OW1 * OC1, OW2 * OC2
    npad = ops["wf2"].shape[1]

    # pad batch to a multiple of TB
    nblk = (N + tb - 1) // tb
    n_pad = nblk * tb
    x = x_nchw
    if n_pad != N:
        x = jnp.pad(x, ((0, n_pad - N), (0, 0), (0, 0), (0, 0)))

    # Layout plumbing (outside the kernel): rows ordered (block, h, b) so every
    # in-kernel conv row shift is a contiguous, tile-aligned 2-D slice and the
    # channel-1 lane dim disappears (lanes = w*IC + ic).
    x2 = jnp.transpose(x, (0, 2, 3, 1))                      # (Np, H, W, IC)
    x2 = x2.reshape(nblk, tb, H, W * IC)
    x2 = jnp.transpose(x2, (0, 2, 1, 3)).reshape(nblk * H * tb, W * IC)

    kernel = functools.partial(_badnet_kernel, tb=tb, k=K,
                               oh1=OH1, l1=L1, oh2=OH2, l2=L2, ph2=PH2)
    const2 = lambda i: (0, 0)                                # weights stay resident

    out = pl.pallas_call(
        kernel,
        out_shape=jax.ShapeDtypeStruct((n_pad, npad), jnp.float32),
        grid=(nblk,),
        in_specs=[
            pl.BlockSpec((H * tb, W * IC), lambda i: (i, 0)),
            pl.BlockSpec(ops["m1"].shape, const2),
            pl.BlockSpec(ops["b1"].shape, const2),
            pl.BlockSpec(ops["r1"].shape, const2),
            pl.BlockSpec(ops["p1"].shape, const2),
            pl.BlockSpec(ops["m2"].shape, const2),
            pl.BlockSpec(ops["b2"].shape, const2),
            pl.BlockSpec(ops["r2"].shape, const2),
            pl.BlockSpec(ops["p2"].shape, const2),
            pl.BlockSpec(ops["wf1"].shape, lambda i: (0, 0, 0)),
            pl.BlockSpec(ops["bf1"].shape, const2),
            pl.BlockSpec(ops["wf2"].shape, const2),
            pl.BlockSpec(ops["bf2"].shape, const2),
        ],
        out_specs=pl.BlockSpec((tb, npad), lambda i: (i, 0)),
        compiler_params=pltpu.CompilerParams(
            dimension_semantics=("parallel",)),              # batch blocks across TCs
    )(x2, ops["m1"], ops["b1"], ops["r1"], ops["p1"], ops["m2"], ops["b2"],
      ops["r2"], ops["p2"], ops["wf1"], ops["bf1"], ops["wf2"], ops["bf2"])
    return out[:N, :nout]


# ---------------------------------------------------------------------------
# Host-side (one-time) operand preparation from torch-layout parameters
# ---------------------------------------------------------------------------
def _conv_lane_matrix(w, in_w):
    """w: torch (OC, IC, KH, KW). Returns M of shape (in_w*IC, KH*out_w*OC) with
    (X @ M)[row, kh*out_w*OC + ow*OC + oc] = sum_{kw,ic} X[row,(ow+kw)*IC+ic]*w[oc,ic,kh,kw]."""
    OC, IC, KH, KW = w.shape
    out_w = in_w - KW + 1
    m = np.zeros((in_w * IC, KH * out_w * OC), np.float32)
    for kh in range(KH):
        for kw in range(KW):
            tap = np.asarray(w[:, :, kh, kw]).T              # (IC, OC)
            for ow in range(out_w):
                r0 = (ow + kw) * IC
                c0 = (kh * out_w + ow) * OC
                m[r0:r0 + IC, c0:c0 + OC] = tap
    return m


def _lane_pool_matrix(out_w, c):
    """(2*out_w*c, out_w*c): averages lane pairs (w) per channel, factor 0.5."""
    m = np.zeros((2 * out_w * c, out_w * c), np.float32)
    eye = 0.5 * np.eye(c, dtype=np.float32)
    for pw in range(out_w):
        for d in range(2):
            m[(2 * pw + d) * c:(2 * pw + d + 1) * c, pw * c:(pw + 1) * c] = eye
    return m


def _row_pool_matrix(out_h, tb):
    """(out_h*tb, 2*out_h*tb): averages row pairs (h) per image, factor 0.5."""
    m = np.zeros((out_h * tb, 2 * out_h * tb), np.float32)
    eye = 0.5 * np.eye(tb, dtype=np.float32)
    for ph in range(out_h):
        for d in range(2):
            m[ph * tb:(ph + 1) * tb,
              (2 * ph + d) * tb:(2 * ph + d + 1) * tb] = eye
    return m


def prepare_kernel_operands(tp, input_channels, input_hw, tb):
    """Torch-layout params -> fused-kernel operands (bf16 MXU weights, f32 biases)."""
    H, W = input_hw
    IC = input_channels
    K, OC1, OC2 = 5, 16, 32
    OH1, OW1 = H - K + 1, W - K + 1
    PH1, PW1 = OH1 // 2, OW1 // 2
    OH2, OW2 = PH1 - K + 1, PW1 - K + 1
    PH2, PW2 = OH2 // 2, OW2 // 2
    fc1_w = np.asarray(tp["fc1_w"], np.float32)
    fc2_w = np.asarray(tp["fc2_w"], np.float32)
    hid, nout = fc1_w.shape[0], fc2_w.shape[0]
    npad = ((nout + 127) // 128) * 128
    assert fc1_w.shape[1] == OC2 * PH2 * PW2, (fc1_w.shape, OC2 * PH2 * PW2)
    assert tb % 8 == 0, "tb must be a multiple of 8 (f32 sublane tile)"

    # fold PyTorch's NCHW flatten into fc1: kernel row blocks indexed by ph2,
    # row within block = pw2*OC2 + oc, torch input index = oc*PH2*PW2 + ph2*PW2 + pw2
    wf1 = fc1_w.reshape(hid, OC2, PH2, PW2)
    wf1 = np.transpose(wf1, (2, 3, 1, 0)).reshape(PH2, PW2 * OC2, hid)

    # fc2 padded to a lane-dense 128 outputs; padded logits driven to -1e30
    wf2 = np.zeros((hid, npad), np.float32)
    wf2[:, :nout] = fc2_w.T
    bf2 = np.full((1, npad), -1e30, np.float32)
    bf2[0, :nout] = np.asarray(tp["fc2_b"], np.float32)

    bf16 = jnp.bfloat16
    return {
        "m1": jnp.asarray(_conv_lane_matrix(np.asarray(tp["conv1_w"], np.float32), W), bf16),
        "b1": jnp.asarray(np.tile(np.asarray(tp["conv1_b"], np.float32), OW1).reshape(1, -1)),
        "r1": jnp.asarray(_row_pool_matrix(PH1, tb), bf16),
        "p1": jnp.asarray(_lane_pool_matrix(PW1, OC1), bf16),
        "m2": jnp.asarray(_conv_lane_matrix(np.asarray(tp["conv2_w"], np.float32), PW1), bf16),
        "b2": jnp.asarray(np.tile(np.asarray(tp["conv2_b"], np.float32), OW2).reshape(1, -1)),
        "r2": jnp.asarray(_row_pool_matrix(PH2, tb), bf16),
        "p2": jnp.asarray(_lane_pool_matrix(PW2, OC2), bf16),
        "wf1": jnp.asarray(wf1, bf16),
        "bf1": jnp.asarray(np.asarray(tp["fc1_b"], np.float32).reshape(1, -1)),
        "wf2": jnp.asarray(wf2, bf16),
        "bf2": jnp.asarray(bf2),
    }


def init_torch_params(key, input_channels, output_num, fc1_in):
    ks = jax.random.split(key, 8)
    K = 5

    def u(k, shape, fan_in):
        b = 1.0 / np.sqrt(fan_in)
        return jax.random.uniform(k, shape, jnp.float32, -b, b)

    return {
        "conv1_w": u(ks[0], (16, input_channels, K, K), input_channels * K * K),
        "conv1_b": u(ks[1], (16,), input_channels * K * K),
        "conv2_w": u(ks[2], (32, 16, K, K), 16 * K * K),
        "conv2_b": u(ks[3], (32,), 16 * K * K),
        "fc1_w": u(ks[4], (512, fc1_in), fc1_in),
        "fc1_b": u(ks[5], (512,), fc1_in),
        "fc2_w": u(ks[6], (output_num, 512), 512),
        "fc2_b": u(ks[7], (output_num,), 512),
    }


# ---------------------------------------------------------------------------
# Pure-JAX f32 reference (mirrors the PyTorch module) for correctness checking
# ---------------------------------------------------------------------------
def badnet_reference(x_nchw, tp):
    hp = lax.Precision.HIGHEST

    def conv_relu(x, w, b):
        y = lax.conv_general_dilated(
            x, w, window_strides=(1, 1), padding="VALID",
            dimension_numbers=("NCHW", "OIHW", "NCHW"), precision=hp)
        return jnp.maximum(y + b.reshape(1, -1, 1, 1), 0.0)

    def pool(x):
        n, c, h, w = x.shape
        return x.reshape(n, c, h // 2, 2, w // 2, 2).mean(axis=(3, 5))

    y = pool(conv_relu(x_nchw, tp["conv1_w"], tp["conv1_b"]))
    y = pool(conv_relu(y, tp["conv2_w"], tp["conv2_b"]))
    y = y.reshape(y.shape[0], -1)                            # NCHW flatten order
    y = jnp.maximum(jnp.dot(y, tp["fc1_w"].T, precision=hp) + tp["fc1_b"], 0.0)
    logits = jnp.dot(y, tp["fc2_w"].T, precision=hp) + tp["fc2_b"]
    return jax.nn.softmax(logits, axis=-1)


if __name__ == "__main__":
    input_channels = 1            # MNIST-style: 28x28 -> fc1_input_features = 512
    output_num = 10
    H = W = 28
    batch = 16
    tb = 8                        # images per grid step (multiple of 8; raise to 32-128 for throughput)
    fc1_in = 800 if input_channels == 3 else 512

    key = jax.random.PRNGKey(0)
    kx, kp = jax.random.split(key)
    x = jax.random.normal(kx, (batch, input_channels, H, W), jnp.float32)
    torch_params = init_torch_params(kp, input_channels, output_num, fc1_in)
    ops = prepare_kernel_operands(torch_params, input_channels, (H, W), tb)

    out = badnet_forward(x, ops, tb=tb, nout=output_num)
    out = jax.block_until_ready(out)

    assert out.shape == (batch, output_num), out.shape
    assert bool(jnp.all(jnp.isfinite(out)))
    # softmax rows must sum to 1 (padded lanes contribute exactly 0)
    assert jnp.allclose(jnp.sum(out, axis=-1), 1.0, atol=1e-3)
    # match the plain-JAX f32 (torch-semantics) reference; kernel uses bf16 MXU
    # operands with f32 accumulation, so allow a small mixed-precision delta
    ref = badnet_reference(x, torch_params)
    max_err = float(jnp.max(jnp.abs(out - ref)))
    assert max_err < 2e-2, max_err
    print("KERNEL_OK")
</pallas_src>

<mosaic_0001>
module attributes {stable_mosaic.version = 11 : i64} {
  func.func @_badnet_kernel(%arg0: i32, %arg1: memref<224x28xf32, #tpu.memory_space<vmem>>, %arg2: memref<28x1920xbf16, #tpu.memory_space<vmem>>, %arg3: memref<1x384xf32, #tpu.memory_space<vmem>>, %arg4: memref<96x192xbf16, #tpu.memory_space<vmem>>, %arg5: memref<384x192xbf16, #tpu.memory_space<vmem>>, %arg6: memref<192x1280xbf16, #tpu.memory_space<vmem>>, %arg7: memref<1x256xf32, #tpu.memory_space<vmem>>, %arg8: memref<32x64xbf16, #tpu.memory_space<vmem>>, %arg9: memref<256x128xbf16, #tpu.memory_space<vmem>>, %arg10: memref<4x128x512xbf16, #tpu.memory_space<vmem>>, %arg11: memref<1x512xf32, #tpu.memory_space<vmem>>, %arg12: memref<512x128xbf16, #tpu.memory_space<vmem>>, %arg13: memref<1x128xf32, #tpu.memory_space<vmem>>, %arg14: memref<8x128xf32, #tpu.memory_space<vmem>>) attributes {dimension_semantics = [#tpu.dimension_semantics<parallel>], iteration_bounds = array<i64: 2>, scalar_prefetch = 0 : i64, scratch_operands = 0 : i64, tpu.core_type = #tpu.core_type<tc>, window_params = [{transform_indices = @transform_0, window_bounds = array<i64: 224, 28>}, {pipeline_mode = #tpu.pipeline_mode<synchronous>, transform_indices = @transform_1, window_bounds = array<i64: 28, 1920>}, {pipeline_mode = #tpu.pipeline_mode<synchronous>, transform_indices = @transform_2, window_bounds = array<i64: 1, 384>}, {pipeline_mode = #tpu.pipeline_mode<synchronous>, transform_indices = @transform_3, window_bounds = array<i64: 96, 192>}, {pipeline_mode = #tpu.pipeline_mode<synchronous>, transform_indices = @transform_4, window_bounds = array<i64: 384, 192>}, {pipeline_mode = #tpu.pipeline_mode<synchronous>, transform_indices = @transform_5, window_bounds = array<i64: 192, 1280>}, {pipeline_mode = #tpu.pipeline_mode<synchronous>, transform_indices = @transform_6, window_bounds = array<i64: 1, 256>}, {pipeline_mode = #tpu.pipeline_mode<synchronous>, transform_indices = @transform_7, window_bounds = array<i64: 32, 64>}, {pipeline_mode = #tpu.pipeline_mode<synchronous>, transform_indices = @transform_8, window_bounds = array<i64: 256, 128>}, {pipeline_mode = #tpu.pipeline_mode<synchronous>, transform_indices = @transform_9, window_bounds = array<i64: 4, 128, 512>}, {pipeline_mode = #tpu.pipeline_mode<synchronous>, transform_indices = @transform_10, window_bounds = array<i64: 1, 512>}, {pipeline_mode = #tpu.pipeline_mode<synchronous>, transform_indices = @transform_11, window_bounds = array<i64: 512, 128>}, {pipeline_mode = #tpu.pipeline_mode<synchronous>, transform_indices = @transform_12, window_bounds = array<i64: 1, 128>}, {transform_indices = @transform_13, window_bounds = array<i64: 8, 128>}]} {
    %c0 = arith.constant 0 : index
    %c0_0 = arith.constant 0 : index
    %0 = vector.load %arg1[%c0, %c0_0] : memref<224x28xf32, #tpu.memory_space<vmem>>, vector<224x28xf32>
    %1 = arith.truncf %0 : vector<224x28xf32> to vector<224x28xbf16>
    %c0_1 = arith.constant 0 : index
    %c0_2 = arith.constant 0 : index
    %2 = vector.load %arg2[%c0_1, %c0_2] : memref<28x1920xbf16, #tpu.memory_space<vmem>>, vector<28x1920xbf16>
    %cst = arith.constant dense<0.000000e+00> : vector<224x1920xf32>
    %3 = tpu.matmul %1, %2, %cst {dimension_numbers = #tpu.dot_dimension_numbers<[1], [0], [0], [1], [0, 0, 1, 1], [], []>} : vector<224x28xbf16>, vector<28x1920xbf16>, vector<224x1920xf32> -> vector<224x1920xf32>
    %4 = vector.extract_strided_slice %3 {offsets = [0, 0], sizes = [192, 384], strides = [1, 1]} : vector<224x1920xf32> to vector<192x384xf32>
    %5 = vector.extract_strided_slice %3 {offsets = [8, 384], sizes = [192, 384], strides = [1, 1]} : vector<224x1920xf32> to vector<192x384xf32>
    %6 = arith.addf %4, %5 : vector<192x384xf32>
    %7 = vector.extract_strided_slice %3 {offsets = [16, 768], sizes = [192, 384], strides = [1, 1]} : vector<224x1920xf32> to vector<192x384xf32>
    %8 = arith.addf %6, %7 : vector<192x384xf32>
    %9 = vector.extract_strided_slice %3 {offsets = [24, 1152], sizes = [192, 384], strides = [1, 1]} : vector<224x1920xf32> to vector<192x384xf32>
    %10 = arith.addf %8, %9 : vector<192x384xf32>
    %11 = vector.extract_strided_slice %3 {offsets = [32, 1536], sizes = [192, 384], strides = [1, 1]} : vector<224x1920xf32> to vector<192x384xf32>
    %12 = arith.addf %10, %11 : vector<192x384xf32>
    %c0_3 = arith.constant 0 : index
    %c0_4 = arith.constant 0 : index
    %13 = vector.load %arg3[%c0_3, %c0_4] : memref<1x384xf32, #tpu.memory_space<vmem>>, vector<1x384xf32>
    %14 = vector.broadcast %13 : vector<1x384xf32> to vector<192x384xf32>
    %15 = arith.addf %12, %14 : vector<192x384xf32>
    %cst_5 = arith.constant 0.000000e+00 : f32
    %16 = vector.broadcast %cst_5 : f32 to vector<192x384xf32>
    %17 = arith.maximumf %15, %16 : vector<192x384xf32>
    %c0_6 = arith.constant 0 : index
    %c0_7 = arith.constant 0 : index
    %18 = vector.load %arg4[%c0_6, %c0_7] : memref<96x192xbf16, #tpu.memory_space<vmem>>, vector<96x192xbf16>
    %19 = arith.truncf %17 : vector<192x384xf32> to vector<192x384xbf16>
    %cst_8 = arith.constant dense<0.000000e+00> : vector<96x384xf32>
    %20 = tpu.matmul %18, %19, %cst_8 {dimension_numbers = #tpu.dot_dimension_numbers<[1], [0], [0], [1], [0, 0, 1, 1], [], []>} : vector<96x192xbf16>, vector<192x384xbf16>, vector<96x384xf32> -> vector<96x384xf32>
    %21 = arith.truncf %20 : vector<96x384xf32> to vector<96x384xbf16>
    %c0_9 = arith.constant 0 : index
    %c0_10 = arith.constant 0 : index
    %22 = vector.load %arg5[%c0_9, %c0_10] : memref<384x192xbf16, #tpu.memory_space<vmem>>, vector<384x192xbf16>
    %cst_11 = arith.constant dense<0.000000e+00> : vector<96x192xf32>
    %23 = tpu.matmul %21, %22, %cst_11 {dimension_numbers = #tpu.dot_dimension_numbers<[1], [0], [0], [1], [0, 0, 1, 1], [], []>} : vector<96x384xbf16>, vector<384x192xbf16>, vector<96x192xf32> -> vector<96x192xf32>
    %24 = arith.truncf %23 : vector<96x192xf32> to vector<96x192xbf16>
    %c0_12 = arith.constant 0 : index
    %c0_13 = arith.constant 0 : index
    %25 = vector.load %arg6[%c0_12, %c0_13] : memref<192x1280xbf16, #tpu.memory_space<vmem>>, vector<192x1280xbf16>
    %cst_14 = arith.constant dense<0.000000e+00> : vector<96x1280xf32>
    %26 = tpu.matmul %24, %25, %cst_14 {dimension_numbers = #tpu.dot_dimension_numbers<[1], [0], [0], [1], [0, 0, 1, 1], [], []>} : vector<96x192xbf16>, vector<192x1280xbf16>, vector<96x1280xf32> -> vector<96x1280xf32>
    %27 = vector.extract_strided_slice %26 {offsets = [0, 0], sizes = [64, 256], strides = [1, 1]} : vector<96x1280xf32> to vector<64x256xf32>
    %28 = vector.extract_strided_slice %26 {offsets = [8, 256], sizes = [64, 256], strides = [1, 1]} : vector<96x1280xf32> to vector<64x256xf32>
    %29 = arith.addf %27, %28 : vector<64x256xf32>
    %30 = vector.extract_strided_slice %26 {offsets = [16, 512], sizes = [64, 256], strides = [1, 1]} : vector<96x1280xf32> to vector<64x256xf32>
    %31 = arith.addf %29, %30 : vector<64x256xf32>
    %32 = vector.extract_strided_slice %26 {offsets = [24, 768], sizes = [64, 256], strides = [1, 1]} : vector<96x1280xf32> to vector<64x256xf32>
    %33 = arith.addf %31, %32 : vector<64x256xf32>
    %34 = vector.extract_strided_slice %26 {offsets = [32, 1024], sizes = [64, 256], strides = [1, 1]} : vector<96x1280xf32> to vector<64x256xf32>
    %35 = arith.addf %33, %34 : vector<64x256xf32>
    %c0_15 = arith.constant 0 : index
    %c0_16 = arith.constant 0 : index
    %36 = vector.load %arg7[%c0_15, %c0_16] : memref<1x256xf32, #tpu.memory_space<vmem>>, vector<1x256xf32>
    %37 = vector.broadcast %36 : vector<1x256xf32> to vector<64x256xf32>
    %38 = arith.addf %35, %37 : vector<64x256xf32>
    %cst_17 = arith.constant 0.000000e+00 : f32
    %39 = vector.broadcast %cst_17 : f32 to vector<64x256xf32>
    %40 = arith.maximumf %38, %39 : vector<64x256xf32>
    %c0_18 = arith.constant 0 : index
    %c0_19 = arith.constant 0 : index
    %41 = vector.load %arg8[%c0_18, %c0_19] : memref<32x64xbf16, #tpu.memory_space<vmem>>, vector<32x64xbf16>
    %42 = arith.truncf %40 : vector<64x256xf32> to vector<64x256xbf16>
    %cst_20 = arith.constant dense<0.000000e+00> : vector<32x256xf32>
    %43 = tpu.matmul %41, %42, %cst_20 {dimension_numbers = #tpu.dot_dimension_numbers<[1], [0], [0], [1], [0, 0, 1, 1], [], []>} : vector<32x64xbf16>, vector<64x256xbf16>, vector<32x256xf32> -> vector<32x256xf32>
    %44 = arith.truncf %43 : vector<32x256xf32> to vector<32x256xbf16>
    %c0_21 = arith.constant 0 : index
    %c0_22 = arith.constant 0 : index
    %45 = vector.load %arg9[%c0_21, %c0_22] : memref<256x128xbf16, #tpu.memory_space<vmem>>, vector<256x128xbf16>
    %cst_23 = arith.constant dense<0.000000e+00> : vector<32x128xf32>
    %46 = tpu.matmul %44, %45, %cst_23 {dimension_numbers = #tpu.dot_dimension_numbers<[1], [0], [0], [1], [0, 0, 1, 1], [], []>} : vector<32x256xbf16>, vector<256x128xbf16>, vector<32x128xf32> -> vector<32x128xf32>
    %47 = vector.extract_strided_slice %46 {offsets = [0, 0], sizes = [8, 128], strides = [1, 1]} : vector<32x128xf32> to vector<8x128xf32>
    %48 = arith.truncf %47 : vector<8x128xf32> to vector<8x128xbf16>
    %c0_24 = arith.constant 0 : index
    %c0_25 = arith.constant 0 : index
    %c0_26 = arith.constant 0 : index
    %49 = vector.load %arg10[%c0_24, %c0_25, %c0_26] : memref<4x128x512xbf16, #tpu.memory_space<vmem>>, vector<1x128x512xbf16>
    %50 = vector.shape_cast %49 : vector<1x128x512xbf16> to vector<128x512xbf16>
    %cst_27 = arith.constant dense<0.000000e+00> : vector<8x512xf32>
    %51 = tpu.matmul %48, %50, %cst_27 {dimension_numbers = #tpu.dot_dimension_numbers<[1], [0], [0], [1], [0, 0, 1, 1], [], []>} : vector<8x128xbf16>, vector<128x512xbf16>, vector<8x512xf32> -> vector<8x512xf32>
    %52 = vector.extract_strided_slice %46 {offsets = [8, 0], sizes = [8, 128], strides = [1, 1]} : vector<32x128xf32> to vector<8x128xf32>
    %53 = arith.truncf %52 : vector<8x128xf32> to vector<8x128xbf16>
    %c1 = arith.constant 1 : index
    %c0_28 = arith.constant 0 : index
    %c0_29 = arith.constant 0 : index
    %54 = vector.load %arg10[%c1, %c0_28, %c0_29] : memref<4x128x512xbf16, #tpu.memory_space<vmem>>, vector<1x128x512xbf16>
    %55 = vector.shape_cast %54 : vector<1x128x512xbf16> to vector<128x512xbf16>
    %cst_30 = arith.constant dense<0.000000e+00> : vector<8x512xf32>
    %56 = tpu.matmul %53, %55, %cst_30 {dimension_numbers = #tpu.dot_dimension_numbers<[1], [0], [0], [1], [0, 0, 1, 1], [], []>} : vector<8x128xbf16>, vector<128x512xbf16>, vector<8x512xf32> -> vector<8x512xf32>
    %57 = arith.addf %51, %56 : vector<8x512xf32>
    %58 = vector.extract_strided_slice %46 {offsets = [16, 0], sizes = [8, 128], strides = [1, 1]} : vector<32x128xf32> to vector<8x128xf32>
    %59 = arith.truncf %58 : vector<8x128xf32> to vector<8x128xbf16>
    %c2 = arith.constant 2 : index
    %c0_31 = arith.constant 0 : index
    %c0_32 = arith.constant 0 : index
    %60 = vector.load %arg10[%c2, %c0_31, %c0_32] : memref<4x128x512xbf16, #tpu.memory_space<vmem>>, vector<1x128x512xbf16>
    %61 = vector.shape_cast %60 : vector<1x128x512xbf16> to vector<128x512xbf16>
    %cst_33 = arith.constant dense<0.000000e+00> : vector<8x512xf32>
    %62 = tpu.matmul %59, %61, %cst_33 {dimension_numbers = #tpu.dot_dimension_numbers<[1], [0], [0], [1], [0, 0, 1, 1], [], []>} : vector<8x128xbf16>, vector<128x512xbf16>, vector<8x512xf32> -> vector<8x512xf32>
    %63 = arith.addf %57, %62 : vector<8x512xf32>
    %64 = vector.extract_strided_slice %46 {offsets = [24, 0], sizes = [8, 128], strides = [1, 1]} : vector<32x128xf32> to vector<8x128xf32>
    %65 = arith.truncf %64 : vector<8x128xf32> to vector<8x128xbf16>
    %c3 = arith.constant 3 : index
    %c0_34 = arith.constant 0 : index
    %c0_35 = arith.constant 0 : index
    %66 = vector.load %arg10[%c3, %c0_34, %c0_35] : memref<4x128x512xbf16, #tpu.memory_space<vmem>>, vector<1x128x512xbf16>
    %67 = vector.shape_cast %66 : vector<1x128x512xbf16> to vector<128x512xbf16>
    %cst_36 = arith.constant dense<0.000000e+00> : vector<8x512xf32>
    %68 = tpu.matmul %65, %67, %cst_36 {dimension_numbers = #tpu.dot_dimension_numbers<[1], [0], [0], [1], [0, 0, 1, 1], [], []>} : vector<8x128xbf16>, vector<128x512xbf16>, vector<8x512xf32> -> vector<8x512xf32>
    %69 = arith.addf %63, %68 : vector<8x512xf32>
    %c0_37 = arith.constant 0 : index
    %c0_38 = arith.constant 0 : index
    %70 = vector.load %arg11[%c0_37, %c0_38] : memref<1x512xf32, #tpu.memory_space<vmem>>, vector<1x512xf32>
    %71 = vector.broadcast %70 : vector<1x512xf32> to vector<8x512xf32>
    %72 = arith.addf %69, %71 : vector<8x512xf32>
    %cst_39 = arith.constant 0.000000e+00 : f32
    %73 = vector.broadcast %cst_39 : f32 to vector<8x512xf32>
    %74 = arith.maximumf %72, %73 : vector<8x512xf32>
    %75 = arith.truncf %74 : vector<8x512xf32> to vector<8x512xbf16>
    %c0_40 = arith.constant 0 : index
    %c0_41 = arith.constant 0 : index
    %76 = vector.load %arg12[%c0_40, %c0_41] : memref<512x128xbf16, #tpu.memory_space<vmem>>, vector<512x128xbf16>
    %cst_42 = arith.constant dense<0.000000e+00> : vector<8x128xf32>
    %77 = tpu.matmul %75, %76, %cst_42 {dimension_numbers = #tpu.dot_dimension_numbers<[1], [0], [0], [1], [0, 0, 1, 1], [], []>} : vector<8x512xbf16>, vector<512x128xbf16>, vector<8x128xf32> -> vector<8x128xf32>
    %c0_43 = arith.constant 0 : index
    %c0_44 = arith.constant 0 : index
    %78 = vector.load %arg13[%c0_43, %c0_44] : memref<1x128xf32, #tpu.memory_space<vmem>>, vector<1x128xf32>
    %79 = vector.broadcast %78 : vector<1x128xf32> to vector<8x128xf32>
    %80 = arith.addf %77, %79 : vector<8x128xf32>
    %cst_45 = arith.constant dense<0xFF800000> : vector<8xf32>
    %81 = vector.multi_reduction <maximumf>, %80, %cst_45 [1] : vector<8x128xf32> to vector<8xf32>
    %82 = vector.shape_cast %81 : vector<8xf32> to vector<8x1xf32>
    %83 = vector.broadcast %82 : vector<8x1xf32> to vector<8x128xf32>
    %84 = arith.subf %80, %83 : vector<8x128xf32>
    %85 = math.exp %84 : vector<8x128xf32>
    %cst_46 = arith.constant dense<0.000000e+00> : vector<8xf32>
    %86 = vector.multi_reduction <add>, %85, %cst_46 [1] : vector<8x128xf32> to vector<8xf32>
    %87 = vector.shape_cast %86 : vector<8xf32> to vector<8x1xf32>
    %88 = tpu.reciprocal %87 : vector<8x1xf32> -> vector<8x1xf32>
    %89 = vector.broadcast %88 : vector<8x1xf32> to vector<8x128xf32>
    %90 = arith.mulf %85, %89 : vector<8x128xf32>
    %c0_47 = arith.constant 0 : index
    %c0_48 = arith.constant 0 : index
    %91 = vector.load %arg14[%c0_47, %c0_48] : memref<8x128xf32, #tpu.memory_space<vmem>>, vector<8x128xf32>
    tpu.vector_store %arg14[%c0_47, %c0_48], %90 {strides = array<i32>} : memref<8x128xf32, #tpu.memory_space<vmem>>, vector<8x128xf32>,
    return
  }
  func.func @transform_0(%arg0: i32) -> (i32, i32) {
    %c0_i32 = arith.constant 0 : i32
    %c0_i32_0 = arith.constant 0 : i32
    return %arg0, %c0_i32 : i32, i32
  }
  func.func @transform_1(%arg0: i32) -> (i32, i32) {
    %c0_i32 = arith.constant 0 : i32
    %c0_i32_0 = arith.constant 0 : i32
    %c0_i32_1 = arith.constant 0 : i32
    return %c0_i32, %c0_i32_0 : i32, i32
  }
  func.func @transform_2(%arg0: i32) -> (i32, i32) {
    %c0_i32 = arith.constant 0 : i32
    %c0_i32_0 = arith.constant 0 : i32
    %c0_i32_1 = arith.constant 0 : i32
    return %c0_i32, %c0_i32_0 : i32, i32
  }
  func.func @transform_3(%arg0: i32) -> (i32, i32) {
    %c0_i32 = arith.constant 0 : i32
    %c0_i32_0 = arith.constant 0 : i32
    %c0_i32_1 = arith.constant 0 : i32
    return %c0_i32, %c0_i32_0 : i32, i32
  }
  func.func @transform_4(%arg0: i32) -> (i32, i32) {
    %c0_i32 = arith.constant 0 : i32
    %c0_i32_0 = arith.constant 0 : i32
    %c0_i32_1 = arith.constant 0 : i32
    return %c0_i32, %c0_i32_0 : i32, i32
  }
  func.func @transform_5(%arg0: i32) -> (i32, i32) {
    %c0_i32 = arith.constant 0 : i32
    %c0_i32_0 = arith.constant 0 : i32
    %c0_i32_1 = arith.constant 0 : i32
    return %c0_i32, %c0_i32_0 : i32, i32
  }
  func.func @transform_6(%arg0: i32) -> (i32, i32) {
    %c0_i32 = arith.constant 0 : i32
    %c0_i32_0 = arith.constant 0 : i32
    %c0_i32_1 = arith.constant 0 : i32
    return %c0_i32, %c0_i32_0 : i32, i32
  }
  func.func @transform_7(%arg0: i32) -> (i32, i32) {
    %c0_i32 = arith.constant 0 : i32
    %c0_i32_0 = arith.constant 0 : i32
    %c0_i32_1 = arith.constant 0 : i32
    return %c0_i32, %c0_i32_0 : i32, i32
  }
  func.func @transform_8(%arg0: i32) -> (i32, i32) {
    %c0_i32 = arith.constant 0 : i32
    %c0_i32_0 = arith.constant 0 : i32
    %c0_i32_1 = arith.constant 0 : i32
    return %c0_i32, %c0_i32_0 : i32, i32
  }
  func.func @transform_9(%arg0: i32) -> (i32, i32, i32) {
    %c0_i32 = arith.constant 0 : i32
    %c0_i32_0 = arith.constant 0 : i32
    %c0_i32_1 = arith.constant 0 : i32
    %c0_i32_2 = arith.constant 0 : i32
    return %c0_i32, %c0_i32_0, %c0_i32_1 : i32, i32, i32
  }
  func.func @transform_10(%arg0: i32) -> (i32, i32) {
    %c0_i32 = arith.constant 0 : i32
    %c0_i32_0 = arith.constant 0 : i32
    %c0_i32_1 = arith.constant 0 : i32
    return %c0_i32, %c0_i32_0 : i32, i32
  }
  func.func @transform_11(%arg0: i32) -> (i32, i32) {
    %c0_i32 = arith.constant 0 : i32
    %c0_i32_0 = arith.constant 0 : i32
    %c0_i32_1 = arith.constant 0 : i32
    return %c0_i32, %c0_i32_0 : i32, i32
  }
  func.func @transform_12(%arg0: i32) -> (i32, i32) {
    %c0_i32 = arith.constant 0 : i32
    %c0_i32_0 = arith.constant 0 : i32
    %c0_i32_1 = arith.constant 0 : i32
    return %c0_i32, %c0_i32_0 : i32, i32
  }
  func.func @transform_13(%arg0: i32) -> (i32, i32) {
    %c0_i32 = arith.constant 0 : i32
    %c0_i32_0 = arith.constant 0 : i32
    return %arg0, %c0_i32 : i32, i32
  }
}

</mosaic_0001>

<bundles_post_ra>
// kernel: badnet_forward.1
= control target key start
LH: loop header
LB: loop body
LE: loop exit
PB: predicated region body
PF: predicated region fallthrough
CT: control target
= control target key end

     0   :  { %s10849_s0 = inlined_call_operand.vmem [shape: f32[448,28], index: 0, kind: input, shape index: {}]   ;;  %s10850_s1 = inlined_call_operand.hbm [shape: bf16[28,1920], index: 1, kind: input, shape index: {}]   ;;  %s10851_s2 = inlined_call_operand.vmem [shape: f32[1,384], index: 2, kind: input, shape index: {}]   ;;  %s10852_s3 = inlined_call_operand.hbm [shape: bf16[96,192], index: 3, kind: input, shape index: {}]   ;;  %s10853_s4 = inlined_call_operand.vmem [shape: bf16[384,192], index: 4, kind: input, shape index: {}]   ;;  %s10854_s5 = inlined_call_operand.vmem [shape: bf16[192,1280], index: 5, kind: input, shape index: {}]   ;;  %s10855_s6 = inlined_call_operand.vmem [shape: f32[1,256], index: 6, kind: input, shape index: {}]   ;;  %s10856_s7 = inlined_call_operand.vmem [shape: bf16[32,64], index: 7, kind: input, shape index: {}]   ;;  %s10857_s8 = inlined_call_operand.vmem [shape: bf16[256,128], index: 8, kind: input, shape index: {}]   ;;  %s10858_s9 = inlined_call_operand.vmem [shape: bf16[4,128,512], index: 9, kind: input, shape index: {}]   ;;  %s10859_s10 = inlined_call_operand.vmem [shape: f32[1,512], index: 10, kind: input, shape index: {}]   ;;  %s10860_s11 = inlined_call_operand.hbm [shape: bf16[512,128], index: 11, kind: input, shape index: {}]   ;;  %s10861_s12 = inlined_call_operand.vmem [shape: f32[1,128], index: 12, kind: input, shape index: {}]   ;;  %s10862_s13 = inlined_call_operand.hbm [shape: f32[16,128], index: 13, kind: output, shape index: {}]  }
   0x1   :  { %10888 = sst [smem:[#allocation56_spill]] %s10852_s3 }
   0x2   :  { %10889 = sst [smem:[#allocation57_spill]] %s10862_s13 }
   0x3   :  { %18 = vsyncpa [#allocation3], 0 }
   0x4   :  { %19 = vsyncpa [#allocation6], 0 }
   0x5   :  { %20 = vsyncpa [#allocation4], 0 }
   0x6   :  { %22 = vsyncpa [#allocation4 + $0x1], 0  ;;  %s8148_s25 = smov 0   ;;  %s8150_s26 = smov 0  }
   0x7   :  { %s8152_s27 = smov 0   ;;  %s8154_s28 = smov 0  }
   0x8 LB: > { %10890 = sst [smem:[#allocation12_spill]] %s8053_s25  ;;  %s8169_s29 = sadd.s32 4294967295, %s8065_s28   ;;  %s8065_s28 = sphi %s8154_s28, %s11100_s28   ;;  %s8061_s27 = sphi %s8152_s27, %s11102_s27   ;;  %s8057_s26 = sphi %s8150_s26, %s11104_s26   ;;  %s8053_s25 = sphi %s8148_s25, %s11103_s25  }
   0x9   : > { %10891 = sst [smem:[#allocation13_spill]] %s8061_s27  ;;  %s6465_s30 = sadd.s32 4294967294, %s8065_s28  }
   0xa   : > { %10892 = sst [smem:[#allocation14_spill]] %s8065_s28  ;;  %s8173_s14 = sadd.s32 1, %s8065_s28  }
   0xb   : > { %10893 = sst [smem:[#allocation15_spill]] %s8173_s14  ;;  %s313_s15 = sadd.s32 1, %s8061_s27 }
   0xc   : > { %s310_s16 = ssub.s32 %s8065_s28, %s8173_s14  ;;  %p323_p0 = scmp.ne.s32.totalorder %s8061_s27, %s8057_s26 }
   0xd   : > { %p311_p1 = scmp.eq.s32.totalorder %s310_s16, 0  ;;  %p324_p2 = scmp.eq.s32.totalorder %s8169_s29, 1 }
   0xe   : > { %p329_p3 = scmp.ne.s32.totalorder %s8057_s26, %s8053_s25  ;;  %p330_p4 = scmp.eq.s32.totalorder %s6465_s30, 1 }
   0xf   : > { %s8184_s17 = scalar_select %p311_p1, %s8061_s27, %s313_s15  }
  0x10   : > { %p8186_p5 = por %p324_p2, %p323_p0  ;;  %p8190_p6 = por %p330_p4, %p329_p3 }
  0x11   : > { %10894 = sst [smem:[#allocation16_spill]] %s8184_s17  ;;  %p6466_p7 = scmp.ge.s32.totalorder %s8065_s28, 1 }
  0x12   : > { %s10895_s18 = scalar_select %p8186_p5, 1, 0 }
  0x13   : > { %s10897_s19 = scalar_select %p8190_p6, 1, 0 }
  0x14   : > { %10896 = sst [smem:[#allocation17_spill]] %s10895_s18  ;;  %p337_p8 = scmp.lt.s32.totalorder %s8065_s28, 3 }
  0x15   : > { %10898 = sst [smem:[#allocation18_spill]] %s10897_s19  ;;  %p10867_p9 = scmp.eq.s32.totalorder %s8169_s29, 0 }
  0x16   : > { %p8197_p10 = pnand %p6466_p7, %p337_p8  ;;  %s8067_s21 = smov [#allocation5]  }
  0x17   : > { %s365_s22 = sshll.u32 %s8067_s21, 4  ;;  %s8068_s24 = smov [#allocation2]   ;;  %s366_s22 = int_to_ptr.vmem [resolvable:$true] %s365_s22 }
  0x18   : > { %s10899_s20 = scalar_select %p8197_p10, 1, 0 }
  0x19   : > { %p7288_p11 = pneg %p8197_p10  ;;  %s349_s30 = sshll.u32 %s8068_s24, 4  ;;  %s8209_s30 = int_to_ptr.vmem [resolvable:$true] %s349_s30 }
  0x1a   : > { %s10901_s3 = sld [smem:[#allocation56_spill]] }
  0x1b   : > { %p8205_p12 = pnand %p10867_p9, %p7288_p11 }
  0x1d   : > { %p8219_p0 = pneg %p8205_p12 }
  0x20   : > { %s7911_s17 = scalar_lea.hbm %s10901_s3, 1536 }
  0x21   : > { %p7912_p13 = scmp.ne.s32.totalorder %s10901_s3, %s7911_s17  ;;  %p7918_p3 = scmp.lt.u32.totalorder %s7911_s17, %s10901_s3 }
  0x23   : > { %p7914_p1 = pnand %p8219_p0, %p7912_p13 }
  0x25   : > { %p7915_p2 = pneg %p7914_p1 }
  0x27   : > { %p7920_p4 = pnand %p7918_p3, %p7915_p2 }
  0x29   : > { %7923 = shalt.err (!%p7920_p4)
}
  0x2a   : > { %s7924_s15 = scalar_lea.vmem %s366_s22, 1536  ;;  %p7932_p9 = scmp.lt.s32.totalorder %s366_s22, %s366_s22 }
  0x2b   : > { %p7925_p7 = scmp.ne.s32.totalorder %s366_s22, %s7924_s15  ;;  %p7933_p6 = scmp.lt.s32.totalorder %s7924_s15, %s7924_s15 }
  0x2d   : > { %p7927_p8 = pnand %p7925_p7, %p8219_p0  ;;  %p7934_p5 = por %p7933_p6, %p7932_p9 }
  0x2f   : > { %p7928_p11 = pneg %p7927_p8 }
  0x31   : > { %p7935_p10 = pnand %p7934_p5, %p7928_p11 }
  0x33   : > { %7938 = shalt.err (!%p7935_p10)
}
  0x34   : > { %s8069_s27 = smov 128   ;;  %s8070_s14 = smov 8  }
  0x35   : > { %7294 = dma.hbm_to_vmem [thread:$0]  (!%p8205_p12), %s10901_s3, 1536, %s366_s22, [#allocation6], %s8069_s27, %s8069_s27, %s8070_s14  }
  0x36   : > { %s7939_s25 = scalar_lea.hbm %s10850_s1, 3840 }
  0x37   : > { %p7940_p13 = scmp.ne.s32.totalorder %s10850_s1, %s7939_s25  ;;  %p7946_p9 = scmp.lt.u32.totalorder %s7939_s25, %s10850_s1 }
  0x39   : > { %p7942_p5 = pnand %p7940_p13, %p8219_p0 }
  0x3b   : > { %p7943_p6 = pneg %p7942_p5 }
  0x3d   : > { %p7948_p10 = pnand %p7946_p9, %p7943_p6 }
  0x3f   : > { %7951 = shalt.err (!%p7948_p10)
}
  0x40   : > { %s7952_s22 = scalar_lea.vmem %s8209_s30, 3840  ;;  %p7960_p4 = scmp.lt.s32.totalorder %s8209_s30, %s8209_s30 }
  0x41   : > { %p7953_p1 = scmp.ne.s32.totalorder %s8209_s30, %s7952_s22  ;;  %p7961_p7 = scmp.lt.s32.totalorder %s7952_s22, %s7952_s22 }
  0x43   : > { %p7955_p2 = pnand %p7953_p1, %p8219_p0  ;;  %p7962_p8 = por %p7961_p7, %p7960_p4 }
  0x45   : > { %p7956_p3 = pneg %p7955_p2 }
  0x47   : > { %p7963_p11 = pnand %p7962_p8, %p7956_p3 }
  0x49   : > { %7966 = shalt.err (!%p7963_p11)
}
  0x4a   : > { %s8071_s13 = smov 960   ;;  %s8072_s25 = smov 60  }
  0x4b   : > { %7291 = dma.hbm_to_vmem [thread:$0]  (!%p8205_p12), %s10850_s1, 3840, %s8209_s30, [#allocation3], %s8071_s13, %s8071_s13, %s8072_s25  }
  0x4c   : > { %s8073_s27 = smov [#allocation7]   ;;  %s7967_s16 = scalar_lea.hbm %s10860_s11, 4096 }
  0x4d   : > { %s399_s14 = sshll.u32 %s8073_s27, 4  ;;  %p7968_p13 = scmp.ne.s32.totalorder %s10860_s11, %s7967_s16  ;;  %s400_s14 = int_to_ptr.vmem [resolvable:$true] %s399_s14 }
  0x4e   : > { %p7974_p9 = scmp.lt.u32.totalorder %s7967_s16, %s10860_s11 }
  0x4f   : > { %p7970_p5 = pnand %p7968_p13, %p8219_p0 }
  0x51   : > { %p7971_p6 = pneg %p7970_p5 }
  0x53   : > { %p7976_p10 = pnand %p7974_p9, %p7971_p6 }
  0x55   : > { %7979 = shalt.err (!%p7976_p10)
}
  0x56   : > { %s7980_s30 = scalar_lea.vmem %s400_s14, 4096  ;;  %p7988_p4 = scmp.lt.s32.totalorder %s400_s14, %s400_s14 }
  0x57   : > { %p7981_p1 = scmp.ne.s32.totalorder %s400_s14, %s7980_s30  ;;  %p7989_p7 = scmp.lt.s32.totalorder %s7980_s30, %s7980_s30 }
  0x59   : > { %p7983_p2 = pnand %p7981_p1, %p8219_p0  ;;  %p7990_p8 = por %p7989_p7, %p7988_p4 }
  0x5b   : > { %p7984_p3 = pneg %p7983_p2 }
  0x5d   : > { %p7991_p11 = pnand %p7990_p8, %p7984_p3 }
  0x5f   : > { %7994 = shalt.err (!%p7991_p11)
}
  0x60   : > { %s8074_s13 = smov 64   ;;  %s8075_s25 = smov 4  }
  0x61   : > { %7297 = dma.hbm_to_vmem [thread:$0]  (!%p8205_p12), %s10860_s11, 4096, %s400_s14, [#allocation6], %s8074_s13, %s8074_s13, %s8075_s25  }
  0x62   : > { %p10903_p13 = scmp.ne.s32.totalorder %s10899_s20, 0 }
  0x64   : > { %427 = sbr.rel (%p10903_p13) target bundleno = 2939 (0xb7b), region = 72 }
  0x6b   : > { %p10904_p5 = scmp.eq.s32.totalorder %s8169_s29, 0 }
  0x6d   : > { %8040 = dma.done.wait (%p10904_p5), [#allocation3], 3840   ;;  %p10905_p0 = pmov %p10904_p5 }
  0x6f   : > { %8042 = vsyncadd (%p10905_p0), [#allocation3], 4294963456  ;;  %p10906_p6 = pmov %p10905_p0 }
  0x70   : > { %p10907_p9 = pmov %p10905_p0 }
  0x71   : > { %8044 = dma.done.wait (%p10906_p6), [#allocation6], 5632  }
  0x72   : > { %8046 = vsyncadd (%p10907_p9), [#allocation6], 4294961664  ;;  %s479_s23 = smul.u32 28, %s8169_s29  ;;  %v10875_v0 = vmov 0   ;;  %v7351_v1 = vld [vmem:[#allocation2 + $0x4] ss:$60 sps:$4 sm:$0xff]  }
  0x73   : > { %818 = vmatprep.mubr.bf16.mxu0 %v10875_v0  ;;  %983 = vmatprep.mubr.bf16.mxu1 %v10875_v0  ;;  %v7353_v2 = vld [vmem:[#allocation2 + $0xc] ss:$60 sps:$4 sm:$0xff]   ;;  %v7355_v3 = vld [vmem:[#allocation2] ss:$60 sps:$4 sm:$0xff]   ;;  %vm740_vm0 = vcmask 1045504   ;;  %vm697_vm1 = vcmask 228352  }
  0x74   : > { %p480_p12 = scmp.lt.s32.totalorder %s479_s23, 55  ;;  %786 = vmatprep.subr.bf16.mxu0 %v7351_v1  ;;  %v7356_v4 = vld [vmem:[#allocation2 + $0x8] ss:$60 sps:$4 sm:$0xff]   ;;  %951 = vmatprep.subr.bf16.mxu1 %v7353_v2  ;;  %v7357_v5 = vld [vmem:[#allocation2 + $0x7c] ss:$60 sps:$4 sm:$0x3f]  }
  0x75   : > { %787 = vmatpush1.bf16.msra.mxu0 %v7355_v3  ;;  %952 = vmatpush1.bf16.msra.mxu1 %v7356_v4  ;;  %v7359_v6 = vld [vmem:[#allocation2 + $0x84] ss:$60 sps:$4 sm:$0x3f]   ;;  %v7361_v8 = vld [vmem:[#allocation2 + $0x78] ss:$60 sps:$4 sm:$0x3f]  }
  0x76   : > { %s11106_s23 = smov (!%p480_p12, %s479_s23), 55  ;;  %6507 = vmatprep.subr.msk.bf16.mxu0 %vm740_vm0, %v7357_v5  ;;  %v7362_v9 = vld [vmem:[#allocation2 + $0x80] ss:$60 sps:$4 sm:$0x3f]   ;;  %6522 = vmatprep.subr.msk.bf16.mxu1 %vm740_vm0, %v7359_v6  ;;  %v742_v11 = vsel %vm740_vm0, %v7361_v8, 0  ;;  %vm2633_vm2 = vcmask 523264  }
  0x77   : > { %s6476_s20 = sshll.u32 %s11106_s23, 3  ;;  %v748_v12 = vsel %vm740_vm0, %v7362_v9, 0  ;;  %v7365_v14 = vld [vmem:[#allocation2 + $0x14] ss:$60 sps:$4 sm:$0xff]   ;;  %v7371_v25 = vld [vmem:[#allocation2 + $0x1c] ss:$60 sps:$4 sm:$0xff]  }
  0x78   : > { %s8292_s27 = scalar_lea.vmem %s10849_s0, %s6476_s20  ;;  %v7363_v15 = vld [vmem:[#allocation2 + $0x10] ss:$60 sps:$4 sm:$0xff]   ;;  %v7368_v20 = vld [vmem:[#allocation2 + $0x88] ss:$60 sps:$4 sm:$0x3f]   ;;  %s11093_s30 = sld [smem:[#allocation17_spill]] }
  0x79   : > { %v486_v7 = vld [vmem:[%s8292_s27] sm:$0xff]  ;;  %v487_v10 = vld [vmem:[%s8292_s27 + $0x8] sm:$0xff]  ;;  %789 = vmatpush1.bf16.msra.mxu0 %v742_v11  ;;  %954 = vmatpush1.bf16.msra.mxu1 %v748_v12  ;;  %v488_v16 = vld [vmem:[%s8292_s27 + $0x10] sm:$0xff]  ;;  %v754_v21 = vsel %vm740_vm0, %v7368_v20, 0  ;;  %s476_s13 = sand.u32 1, %s8057_s26   ;;  %s7126_s28 = sshll.u32 %s8169_s29, 7 }
  0x7a   : > { %v8300_v13 = vpack.c.bf16 %v487_v10, %v486_v7  ;;  %1116 = vmatprep.subr.bf16.mxu0 %v7365_v14  ;;  %v489_v17 = vld [vmem:[%s8292_s27 + $0x18] sm:$0xff]  ;;  %v7366_v18 = vld [vmem:[#allocation2 + $0x8c] ss:$60 sps:$4 sm:$0x3f]   ;;  %v490_v22 = vld [vmem:[%s8292_s27 + $0x20] sm:$0xff]  ;;  %1281 = vmatprep.subr.bf16.mxu1 %v7371_v25  ;;  %s6475_s25 = sshll.u32 %s476_s13, 3 }
  0x7b   : > { %v8310_v19 = vpack.c.bf16 %v489_v17, %v488_v16  ;;  %v491_v23 = vld [vmem:[%s8292_s27 + $0x28] sm:$0xff]  ;;  %v7369_v24 = vld [vmem:[#allocation2 + $0x18] ss:$60 sps:$4 sm:$0xff]   ;;  %v7377_v28 = vld [vmem:[#allocation2 + $0x24] ss:$60 sps:$4 sm:$0xff]   ;;  %s478_s3 = scalar_lea.vmem [#allocation8], %s6475_s25 }
  0x7c   : > { %6508 = vmatmul.mubr.msk.bf16.vlgmr.msra.gmra.mrb[0].mxu0 %vm697_vm1, %v8300_v13  ;;  %6523 = vmatmul.mubr.msk.bf16.vlgmr.msra.gmra.mrb[0].mxu1 %vm697_vm1, %v8300_v13  ;;  %v7372_v26 = vld [vmem:[#allocation2 + $0x94] ss:$60 sps:$4 sm:$0x3f]   ;;  %v8322_v29 = vpack.c.bf16 %v491_v23, %v490_v22  ;;  %v493_v32 = vld [vmem:[%s8292_s27 + $0x38] sm:$0xff]  ;;  %v494_v34 = vld [vmem:[%s8292_s27 + $0x40] sm:$0xff]  ;;  %s6375_s23 = sshll.u32 %s478_s3, 4  ;;  %s10809_s23 = int_to_ptr.vmem [resolvable:$true] %s6375_s23 }
  0x7d   : > { %828 = vmatprep.mubr.bf16.mxu0 %v10875_v0  ;;  %992 = vmatprep.mubr.bf16.mxu1 %v10875_v0  ;;  %v7374_v27 = vld [vmem:[#allocation2 + $0x90] ss:$60 sps:$4 sm:$0x3f]   ;;  %v497_v38 = vld [vmem:[%s8292_s27 + $0x58] sm:$0xff]  ;;  %v498_v40 = vld [vmem:[%s8292_s27 + $0x60] sm:$0xff]  ;;  %s11094_s18 = sld [smem:[#allocation57_spill]] }
  0x7e   : > { %1117 = vmatpush1.bf16.msra.mxu0 %v7363_v15  ;;  %1282 = vmatpush1.bf16.msra.mxu1 %v7369_v24  ;;  %v760_v30 = vsel %vm740_vm0, %v7374_v27, 0  ;;  %v492_v31 = vld [vmem:[%s8292_s27 + $0x30] sm:$0xff]  ;;  %v495_v35 = vld [vmem:[%s8292_s27 + $0x48] sm:$0xff]  ;;  %v501_v44 = vld [vmem:[%s8292_s27 + $0x78] sm:$0xff]  ;;  %s6362_s14 = scalar_lea.sflag [#allocation4], %s476_s13  ;;  %s7995_s19 = scalar_lea.vmem %s10809_s23, 128 }
  0x7f   : > { %6537 = vmatprep.subr.msk.bf16.mxu0 %vm740_vm0, %v7366_v18  ;;  %6552 = vmatprep.subr.msk.bf16.mxu1 %vm740_vm0, %v7372_v26  ;;  %v8334_v33 = vpack.c.bf16 %v493_v32, %v492_v31  ;;  %v8344_v36 = vpack.c.bf16 %v495_v35, %v494_v34  ;;  %v496_v37 = vld [vmem:[%s8292_s27 + $0x50] sm:$0xff]  ;;  %v499_v41 = vld [vmem:[%s8292_s27 + $0x68] sm:$0xff]  ;;  %v502_v46 = vld [vmem:[%s8292_s27 + $0x80] sm:$0xff]  ;;  %p7996_p10 = scmp.ne.s32.totalorder %s10809_s23, %s7995_s19  ;;  %p11095_p1 = scmp.ne.s32.totalorder %s11093_s30, 0 }
  0x80   : > { %v8354_v39 = vpack.c.bf16 %v497_v38, %v496_v37  ;;  %v8364_v42 = vpack.c.bf16 %v499_v41, %v498_v40  ;;  %v500_v43 = vld [vmem:[%s8292_s27 + $0x70] sm:$0xff]  ;;  %v503_v47 = vld [vmem:[%s8292_s27 + $0x88] sm:$0xff]  ;;  %v505_v50 = vld [vmem:[%s8292_s27 + $0x98] sm:$0xff]  ;;  %s8077_s29 = smov [#allocation8]  }
  0x81   : > { %v8374_v45 = vpack.c.bf16 %v501_v44, %v500_v43  ;;  %v8384_v48 = vpack.c.bf16 %v503_v47, %v502_v46  ;;  %v504_v49 = vld [vmem:[%s8292_s27 + $0x90] sm:$0xff]  ;;  %v506_v52 = vld [vmem:[%s8292_s27 + $0xa0] sm:$0xff]  ;;  %v507_v53 = vld [vmem:[%s8292_s27 + $0xa8] sm:$0xff]  ;;  %p7997_p2 = pnand %p7996_p10, %p11095_p1  ;;  %s7999_s17 = sshll.u32 %s8077_s29, 4  ;;  %s8000_s17 = int_to_ptr.vmem [resolvable:$false] %s7999_s17 }
  0x82   : > { %1119 = vmatpush1.bf16.msra.mxu0 %v754_v21  ;;  %1284 = vmatpush1.bf16.msra.mxu1 %v760_v30  ;;  %v8394_v51 = vpack.c.bf16 %v505_v50, %v504_v49  ;;  %v8404_v54 = vpack.c.bf16 %v507_v53, %v506_v52  ;;  %v508_v55 = vld [vmem:[%s8292_s27 + $0xb0] sm:$0xff]  ;;  %v509_v56 = vld [vmem:[%s8292_s27 + $0xb8] sm:$0xff]  ;;  %v7383_v58 = vld [vmem:[#allocation2 + $0x2c] ss:$60 sps:$4 sm:$0xff]   ;;  %s8001_s16 = scalar_lea.vmem %s8000_s17, 256  ;;  %p8002_p4 = scmp.lt.s32.totalorder %s10809_s23, %s8000_s17 }
  0x83   : > { %1446 = vmatprep.subr.bf16.mxu0 %v7377_v28  ;;  %v8414_v57 = vpack.c.bf16 %v509_v56, %v508_v55  ;;  %v510_v59 = vld [vmem:[%s8292_s27 + $0xc0] sm:$0xff]  ;;  %v511_v60 = vld [vmem:[%s8292_s27 + $0xc8] sm:$0xff]  ;;  %1611 = vmatprep.subr.bf16.mxu1 %v7383_v58  ;;  %v512_v62 = vld [vmem:[%s8292_s27 + $0xd0] sm:$0xff]  ;;  %p7998_p3 = pneg %p7997_p2  ;;  %p8003_p7 = scmp.lt.s32.totalorder %s8001_s16, %s7995_s19 }
  0x84   : > { %6509 = vmatmul.mubr.msk.bf16.gmra.mrb[4].mxu0 %vm697_vm1, %v8310_v19  ;;  %6524 = vmatmul.mubr.msk.bf16.gmra.mrb[4].mxu1 %vm697_vm1, %v8310_v19  ;;  %v8424_v61 = vpack.c.bf16 %v511_v60, %v510_v59  ;;  %v513_v63 = vld [vmem:[%s8292_s27 + $0xd8] sm:$0xff]  ;;  %v7381_v3 = vld [vmem:[#allocation2 + $0x28] ss:$60 sps:$4 sm:$0xff]   ;;  %v7389_v10 = vld [vmem:[#allocation2 + $0x34] ss:$60 sps:$4 sm:$0xff]   ;;  %s10807_s27 = scalar_lea.hbm %s11094_s18, %s7126_s28 }
  0x85   : > { %838 = vmatprep.mubr.bf16.mxu0 %v10875_v0  ;;  %1002 = vmatprep.mubr.bf16.mxu1 %v10875_v0  ;;  %v8434_v1 = vpack.c.bf16 %v513_v63, %v512_v62  ;;  %v7375_v2 = vld [vmem:[#allocation2 + $0x20] ss:$60 sps:$4 sm:$0xff]   ;;  %v7380_v5 = vld [vmem:[#allocation2 + $0x98] ss:$60 sps:$4 sm:$0x3f]   ;;  %p8004_p8 = por %p8003_p7, %p8002_p4 }
  0x86   : > { %v7378_v4 = vld [vmem:[#allocation2 + $0x9c] ss:$60 sps:$4 sm:$0x3f]   ;;  %v7384_v6 = vld [vmem:[#allocation2 + $0xa4] ss:$60 sps:$4 sm:$0x3f]  }
  0x87   : > { %10908 = vst [vmem:[#allocation19_spill] sm:$0xff] %v8434_v1  ;;  %v7386_v7 = vld [vmem:[#allocation2 + $0xa0] ss:$60 sps:$4 sm:$0x3f]   ;;  %v766_v8 = vsel %vm740_vm0, %v7380_v5, 0  ;;  %p8005_p11 = pnand %p8004_p8, %p7998_p3 }
  0x88   : > { %v772_v9 = vsel %vm740_vm0, %v7386_v7, 0  ;;  %v7393_v11 = vld [vmem:[#allocation2 + $0x38] ss:$60 sps:$4 sm:$0xff]   ;;  %v7387_v31 = vld [vmem:[#allocation2 + $0x30] ss:$60 sps:$4 sm:$0xff]  }
  0x89   : > { %v7390_v35 = vld [vmem:[#allocation2 + $0xac] ss:$60 sps:$4 sm:$0x3f]  }
  0x8a   : > { %v7392_v38 = vld [vmem:[#allocation2 + $0xa8] ss:$60 sps:$4 sm:$0x3f]   ;;  %v7394_v40 = vld [vmem:[#allocation2 + $0xb0] ss:$60 sps:$4 sm:$0x3f]  }
  0x8b   : > { %v778_v44 = vsel %vm740_vm0, %v7392_v38, 0  ;;  %v784_v46 = vsel %vm740_vm0, %v7394_v40, 0 }
  0x8c   : > { %6510 = vmatmul.mubr.msk.bf16.gmra.mrb[8].mxu0 %vm697_vm1, %v8322_v29  ;;  %6525 = vmatmul.mubr.msk.bf16.gmra.mrb[8].mxu1 %vm697_vm1, %v8322_v29 }
  0x8d   : > { %848 = vmatprep.mubr.bf16.mxu0 %v10875_v0  ;;  %1012 = vmatprep.mubr.bf16.mxu1 %v10875_v0 }
  0x94   : > { %6511 = vmatmul.mubr.msk.bf16.gmra.mrb[12].mxu0 %vm697_vm1, %v8334_v33  ;;  %6526 = vmatmul.mubr.msk.bf16.gmra.mrb[12].mxu1 %vm697_vm1, %v8334_v33 }
  0x95   : > { %858 = vmatprep.mubr.bf16.mxu0 %v10875_v0  ;;  %1022 = vmatprep.mubr.bf16.mxu1 %v10875_v0 }
  0x9c   : > { %6512 = vmatmul.mubr.msk.bf16.gmra.mrb[16].mxu0 %vm697_vm1, %v8344_v36  ;;  %6527 = vmatmul.mubr.msk.bf16.gmra.mrb[16].mxu1 %vm697_vm1, %v8344_v36 }
  0x9d   : > { %868 = vmatprep.mubr.bf16.mxu0 %v10875_v0  ;;  %1032 = vmatprep.mubr.bf16.mxu1 %v10875_v0 }
  0xa4   : > { %6513 = vmatmul.mubr.msk.bf16.gmra.mrb[20].mxu0 %vm697_vm1, %v8354_v39  ;;  %6528 = vmatmul.mubr.msk.bf16.gmra.mrb[20].mxu1 %vm697_vm1, %v8354_v39 }
  0xa5   : > { %878 = vmatprep.mubr.bf16.mxu0 %v10875_v0  ;;  %1042 = vmatprep.mubr.bf16.mxu1 %v10875_v0 }
  0xac   : > { %6514 = vmatmul.mubr.msk.bf16.gmra.mrb[24].mxu0 %vm697_vm1, %v8364_v42  ;;  %6529 = vmatmul.mubr.msk.bf16.gmra.mrb[24].mxu1 %vm697_vm1, %v8364_v42 }
  0xad   : > { %888 = vmatprep.mubr.bf16.mxu0 %v10875_v0  ;;  %1052 = vmatprep.mubr.bf16.mxu1 %v10875_v0 }
  0xb4   : > { %6515 = vmatmul.mubr.msk.bf16.gmra.mrb[28].mxu0 %vm697_vm1, %v8374_v45  ;;  %6530 = vmatmul.mubr.msk.bf16.gmra.mrb[28].mxu1 %vm697_vm1, %v8374_v45 }
  0xb5   : > { %898 = vmatprep.mubr.bf16.mxu0 %v10875_v0  ;;  %1062 = vmatprep.mubr.bf16.mxu1 %v10875_v0 }
  0xbc   : > { %6516 = vmatmul.mubr.msk.bf16.gmra.mrb[32].mxu0 %vm697_vm1, %v8384_v48  ;;  %6531 = vmatmul.mubr.msk.bf16.gmra.mrb[32].mxu1 %vm697_vm1, %v8384_v48 }
  0xbd   : > { %908 = vmatprep.mubr.bf16.mxu0 %v10875_v0  ;;  %1072 = vmatprep.mubr.bf16.mxu1 %v10875_v0 }
  0xc4   : > { %6517 = vmatmul.mubr.msk.bf16.gmra.mrb[36].mxu0 %vm697_vm1, %v8394_v51  ;;  %6532 = vmatmul.mubr.msk.bf16.gmra.mrb[36].mxu1 %vm697_vm1, %v8394_v51 }
  0xc5   : > { %918 = vmatprep.mubr.bf16.mxu0 %v10875_v0  ;;  %1082 = vmatprep.mubr.bf16.mxu1 %v10875_v0 }
  0xcc   : > { %6518 = vmatmul.mubr.msk.bf16.gmra.mrb[40].mxu0 %vm697_vm1, %v8404_v54  ;;  %6533 = vmatmul.mubr.msk.bf16.gmra.mrb[40].mxu1 %vm697_vm1, %v8404_v54 }
  0xcd   : > { %928 = vmatprep.mubr.bf16.mxu0 %v10875_v0  ;;  %1092 = vmatprep.mubr.bf16.mxu1 %v10875_v0 }
  0xd4   : > { %6519 = vmatmul.mubr.msk.bf16.gmra.mrb[44].mxu0 %vm697_vm1, %v8414_v57  ;;  %6534 = vmatmul.mubr.msk.bf16.gmra.mrb[44].mxu1 %vm697_vm1, %v8414_v57 }
  0xd5   : > { %938 = vmatprep.mubr.bf16.mxu0 %v10875_v0  ;;  %1102 = vmatprep.mubr.bf16.mxu1 %v10875_v0 }
  0xdc   : > { %6520 = vmatmul.mubr.msk.bf16.gmra.mrb[48].mxu0 %vm697_vm1, %v8424_v61  ;;  %6535 = vmatmul.mubr.msk.bf16.gmra.mrb[48].mxu1 %vm697_vm1, %v8424_v61 }
  0xdd   : > { %944 = vmatprep.mubr.bf16.mxu0 %v10875_v0  ;;  %1109 = vmatprep.mubr.bf16.mxu1 %v10875_v0 }
  0xe4   : > { %6521 = vmatmul.mubr.msk.bf16.gmra.mrb[52].mxu0 %vm697_vm1, %v8434_v1  ;;  %6536 = vmatmul.mubr.msk.bf16.gmra.mrb[52].mxu1 %vm697_vm1, %v8434_v1 }
  0xe5   : > { %1148 = vmatprep.mubr.bf16.mxu0 %v10875_v0  ;;  %1313 = vmatprep.mubr.bf16.mxu1 %v10875_v0 }
  0xec   : > { %6538 = vmatmul.mubr.msk.bf16.vlgmr.msra.gmra.mrb[56].mxu0 %vm697_vm1, %v8300_v13  ;;  %6553 = vmatmul.mubr.msk.bf16.vlgmr.msra.gmra.mrb[56].mxu1 %vm697_vm1, %v8300_v13 }
  0xed   : > { %1156 = vmatprep.mubr.bf16.mxu0 %v10875_v0  ;;  %1319 = vmatprep.mubr.bf16.mxu1 %v10875_v0 }
  0xee   : > { %1447 = vmatpush1.bf16.msra.mxu0 %v7375_v2  ;;  %1612 = vmatpush1.bf16.msra.mxu1 %v7381_v3 }
  0xef   : > { %6567 = vmatprep.subr.msk.bf16.mxu0 %vm740_vm0, %v7378_v4  ;;  %6582 = vmatprep.subr.msk.bf16.mxu1 %vm740_vm0, %v7384_v6 }
  0xf2   : > { %1449 = vmatpush1.bf16.msra.mxu0 %v766_v8  ;;  %1614 = vmatpush1.bf16.msra.mxu1 %v772_v9 }
  0xf3   : > { %1776 = vmatprep.subr.bf16.mxu0 %v7389_v10  ;;  %7217 = vmatprep.subr.bf16.mxu1 %v7393_v11 }
  0xf4   : > { %6539 = vmatmul.mubr.msk.bf16.gmra.mrb[60].mxu0 %vm697_vm1, %v8310_v19  ;;  %6554 = vmatmul.mubr.msk.bf16.gmra.mrb[60].mxu1 %vm697_vm1, %v8310_v19 }
  0xf5   : > { %1166 = vmatprep.mubr.bf16.mxu0 %v10875_v0  ;;  %1329 = vmatprep.mubr.bf16.mxu1 %v10875_v0 }
  0xfc   : > { %6540 = vmatmul.mubr.msk.bf16.gmra.mrb[64].mxu0 %vm697_vm1, %v8322_v29  ;;  %6555 = vmatmul.mubr.msk.bf16.gmra.mrb[64].mxu1 %vm697_vm1, %v8322_v29 }
  0xfd   : > { %1176 = vmatprep.mubr.bf16.mxu0 %v10875_v0  ;;  %1339 = vmatprep.mubr.bf16.mxu1 %v10875_v0 }
 0x104   : > { %6541 = vmatmul.mubr.msk.bf16.gmra.mrb[68].mxu0 %vm697_vm1, %v8334_v33  ;;  %6556 = vmatmul.mubr.msk.bf16.gmra.mrb[68].mxu1 %vm697_vm1, %v8334_v33 }
 0x105   : > { %1186 = vmatprep.mubr.bf16.mxu0 %v10875_v0  ;;  %1349 = vmatprep.mubr.bf16.mxu1 %v10875_v0 }
 0x10c   : > { %6542 = vmatmul.mubr.msk.bf16.gmra.mrb[72].mxu0 %vm697_vm1, %v8344_v36  ;;  %6557 = vmatmul.mubr.msk.bf16.gmra.mrb[72].mxu1 %vm697_vm1, %v8344_v36 }
 0x10d   : > { %1196 = vmatprep.mubr.bf16.mxu0 %v10875_v0  ;;  %1359 = vmatprep.mubr.bf16.mxu1 %v10875_v0 }
 0x114   : > { %6543 = vmatmul.mubr.msk.bf16.gmra.mrb[76].mxu0 %vm697_vm1, %v8354_v39  ;;  %6558 = vmatmul.mubr.msk.bf16.gmra.mrb[76].mxu1 %vm697_vm1, %v8354_v39 }
 0x115   : > { %1206 = vmatprep.mubr.bf16.mxu0 %v10875_v0  ;;  %1369 = vmatprep.mubr.bf16.mxu1 %v10875_v0 }
 0x11c   : > { %6544 = vmatmul.mubr.msk.bf16.gmra.mrb[80].mxu0 %vm697_vm1, %v8364_v42  ;;  %6559 = vmatmul.mubr.msk.bf16.gmra.mrb[80].mxu1 %vm697_vm1, %v8364_v42 }
 0x11d   : > { %1216 = vmatprep.mubr.bf16.mxu0 %v10875_v0  ;;  %1379 = vmatprep.mubr.bf16.mxu1 %v10875_v0 }
 0x124   : > { %6545 = vmatmul.mubr.msk.bf16.gmra.mrb[84].mxu0 %vm697_vm1, %v8374_v45  ;;  %6560 = vmatmul.mubr.msk.bf16.gmra.mrb[84].mxu1 %vm697_vm1, %v8374_v45 }
 0x125   : > { %1226 = vmatprep.mubr.bf16.mxu0 %v10875_v0  ;;  %1389 = vmatprep.mubr.bf16.mxu1 %v10875_v0 }
 0x12c   : > { %6546 = vmatmul.mubr.msk.bf16.gmra.mrb[88].mxu0 %vm697_vm1, %v8384_v48  ;;  %6561 = vmatmul.mubr.msk.bf16.gmra.mrb[88].mxu1 %vm697_vm1, %v8384_v48 }
 0x12d   : > { %1236 = vmatprep.mubr.bf16.mxu0 %v10875_v0  ;;  %1399 = vmatprep.mubr.bf16.mxu1 %v10875_v0 }
 0x134   : > { %6547 = vmatmul.mubr.msk.bf16.gmra.mrb[92].mxu0 %vm697_vm1, %v8394_v51  ;;  %6562 = vmatmul.mubr.msk.bf16.gmra.mrb[92].mxu1 %vm697_vm1, %v8394_v51 }
 0x135   : > { %1246 = vmatprep.mubr.bf16.mxu0 %v10875_v0  ;;  %1409 = vmatprep.mubr.bf16.mxu1 %v10875_v0 }
 0x13c   : > { %6548 = vmatmul.mubr.msk.bf16.gmra.mrb[96].mxu0 %vm697_vm1, %v8404_v54  ;;  %6563 = vmatmul.mubr.msk.bf16.gmra.mrb[96].mxu1 %vm697_vm1, %v8404_v54 }
 0x13d   : > { %1256 = vmatprep.mubr.bf16.mxu0 %v10875_v0  ;;  %1419 = vmatprep.mubr.bf16.mxu1 %v10875_v0 }
 0x144   : > { %6549 = vmatmul.mubr.msk.bf16.gmra.mrb[100].mxu0 %vm697_vm1, %v8414_v57  ;;  %6564 = vmatmul.mubr.msk.bf16.gmra.mrb[100].mxu1 %vm697_vm1, %v8414_v57 }
 0x145   : > { %1266 = vmatprep.mubr.bf16.mxu0 %v10875_v0  ;;  %1429 = vmatprep.mubr.bf16.mxu1 %v10875_v0 }
 0x14c   : > { %6550 = vmatmul.mubr.msk.bf16.gmra.mrb[104].mxu0 %vm697_vm1, %v8424_v61  ;;  %6565 = vmatmul.mubr.msk.bf16.gmra.mrb[104].mxu1 %vm697_vm1, %v8424_v61 }
 0x14d   : > { %1274 = vmatprep.mubr.bf16.mxu0 %v10875_v0  ;;  %1439 = vmatprep.mubr.bf16.mxu1 %v10875_v0 }
 0x14f   : > { %v820_v12 = vpop.f32.mrb[0].mxu0  ;;  %v8524_v14 = vpop.f32.mrb[0].mxu1 }
 0x150   : > { %v8526_v15 = vpop.f32.mrb[1].mxu0  ;;  %v987_v16 = vpop.f32.mrb[1].mxu1 }
 0x151   : > { %v824_v17 = vpop.f32.mrb[2].mxu0  ;;  %v8528_v18 = vpop.f32.mrb[2].mxu1 }
 0x152   : > { %v8530_v20 = vpop.f32.mrb[3].mxu0  ;;  %v990_v21 = vpop.f32.mrb[3].mxu1 }
 0x153   : > { %v8532_v22 = vadd.f32 %v990_v21, %v820_v12 }
 0x154   : > { %6551 = vmatmul.mubr.msk.bf16.gmra.mrb[108].mxu0 %vm697_vm1, %v8434_v1  ;;  %6566 = vmatmul.mubr.msk.bf16.gmra.mrb[108].mxu1 %vm697_vm1, %v8434_v1 }
 0x155   : > { %1478 = vmatprep.mubr.bf16.mxu0 %v10875_v0  ;;  %1643 = vmatprep.mubr.bf16.mxu1 %v10875_v0 }
 0x157   : > { %v830_v23 = vpop.f32.mrb[4].mxu0  ;;  %v8540_v24 = vpop.f32.mrb[4].mxu1 }
 0x158   : > { %v8542_v25 = vpop.f32.mrb[5].mxu0  ;;  %v996_v26 = vpop.f32.mrb[5].mxu1 }
 0x159   : > { %v8544_v27 = vadd.f32 %v996_v26, %v824_v17  ;;  %v834_v28 = vpop.f32.mrb[6].mxu0  ;;  %v8546_v30 = vpop.f32.mrb[6].mxu1 }
 0x15a   : > { %v8548_v32 = vpop.f32.mrb[7].mxu0  ;;  %v1000_v34 = vpop.f32.mrb[7].mxu1 }
 0x15b   : > { %v8550_v37 = vadd.f32 %v1000_v34, %v830_v23 }
 0x15c   : > { %6568 = vmatmul.mubr.msk.bf16.vlgmr.msra.gmra.mrb[112].mxu0 %vm697_vm1, %v8300_v13  ;;  %6583 = vmatmul.mubr.msk.bf16.vlgmr.msra.gmra.mrb[112].mxu1 %vm697_vm1, %v8300_v13 }
 0x15d   : > { %1484 = vmatprep.mubr.bf16.mxu0 %v10875_v0  ;;  %1649 = vmatprep.mubr.bf16.mxu1 %v10875_v0 }
 0x15e   : > { %1777 = vmatpush1.bf16.msra.mxu0 %v7387_v31  ;;  %7218 = vmatpush3.bf16.msra.mxu1 %v7393_v11 }
 0x15f   : > { %v840_v41 = vpop.f32.mrb[8].mxu0  ;;  %v8558_v43 = vpop.f32.mrb[8].mxu1  ;;  %6597 = vmatprep.subr.msk.bf16.mxu0 %vm740_vm0, %v7390_v35  ;;  %7273 = vmatprep.subr.msk.bf16.mxu1 %vm740_vm0, %v7394_v40 }
 0x160   : > { %v8564_v47 = vpop.f32.mrb[9].mxu0  ;;  %v1006_v49 = vpop.f32.mrb[9].mxu1 }
 0x161   : > { %v8566_v50 = vadd.f32 %v1006_v49, %v834_v28  ;;  %v844_v52 = vpop.f32.mrb[10].mxu0  ;;  %v8568_v53 = vpop.f32.mrb[10].mxu1 }
 0x162   : > { %v8570_v55 = vpop.f32.mrb[11].mxu0  ;;  %v1010_v56 = vpop.f32.mrb[11].mxu1  ;;  %1779 = vmatpush1.bf16.msra.mxu0 %v778_v44  ;;  %7220 = vmatpush3.bf16.msra.mxu1 %v784_v46 }
 0x163   : > { %v8572_v58 = vadd.f32 %v1010_v56, %v840_v41 }
 0x164   : > { %6569 = vmatmul.mubr.msk.bf16.gmra.mrb[116].mxu0 %vm697_vm1, %v8310_v19  ;;  %6584 = vmatmul.mubr.msk.bf16.gmra.mrb[116].mxu1 %vm697_vm1, %v8310_v19 }
 0x165   : > { %1493 = vmatprep.mubr.bf16.mxu0 %v10875_v0  ;;  %1657 = vmatprep.mubr.bf16.mxu1 %v10875_v0 }
 0x167   : > { %v850_v59 = vpop.f32.mrb[12].mxu0  ;;  %v8580_v60 = vpop.f32.mrb[12].mxu1 }
 0x168   : > { %v8582_v62 = vpop.f32.mrb[13].mxu0  ;;  %v1016_v63 = vpop.f32.mrb[13].mxu1 }
 0x169   : > { %v8584_v2 = vadd.f32 %v1016_v63, %v844_v52  ;;  %v854_v3 = vpop.f32.mrb[14].mxu0  ;;  %v8586_v4 = vpop.f32.mrb[14].mxu1 }
 0x16a   : > { %v8588_v5 = vpop.f32.mrb[15].mxu0  ;;  %v1020_v6 = vpop.f32.mrb[15].mxu1 }
 0x16b   : > { %v8590_v7 = vadd.f32 %v1020_v6, %v850_v59 }
 0x16c   : > { %6570 = vmatmul.mubr.msk.bf16.gmra.mrb[120].mxu0 %vm697_vm1, %v8322_v29  ;;  %6585 = vmatmul.mubr.msk.bf16.gmra.mrb[120].mxu1 %vm697_vm1, %v8322_v29 }
 0x16d   : > { %1503 = vmatprep.mubr.bf16.mxu0 %v10875_v0  ;;  %1667 = vmatprep.mubr.bf16.mxu1 %v10875_v0 }
 0x16f   : > { %v860_v8 = vpop.f32.mrb[16].mxu0  ;;  %v8598_v9 = vpop.f32.mrb[16].mxu1 }
 0x170   : > { %v8600_v10 = vpop.f32.mrb[17].mxu0  ;;  %v1026_v11 = vpop.f32.mrb[17].mxu1 }
 0x171   : > { %v8602_v12 = vadd.f32 %v1026_v11, %v854_v3  ;;  %v864_v16 = vpop.f32.mrb[18].mxu0  ;;  %v8604_v17 = vpop.f32.mrb[18].mxu1 }
 0x172   : > { %v8606_v21 = vpop.f32.mrb[19].mxu0  ;;  %v1030_v23 = vpop.f32.mrb[19].mxu1 }
 0x173   : > { %v8608_v26 = vadd.f32 %v1030_v23, %v860_v8 }
 0x174   : > { %6571 = vmatmul.mubr.msk.bf16.gmra.mrb[124].mxu0 %vm697_vm1, %v8334_v33  ;;  %6586 = vmatmul.mubr.msk.bf16.gmra.mrb[124].mxu1 %vm697_vm1, %v8334_v33 }
 0x175   : > { %1513 = vmatprep.mubr.bf16.mxu0 %v10875_v0  ;;  %1677 = vmatprep.mubr.bf16.mxu1 %v10875_v0 }
 0x177   : > { %v870_v28 = vpop.f32.mrb[20].mxu0  ;;  %v8616_v31 = vpop.f32.mrb[20].mxu1 }
 0x178   : > { %v8618_v34 = vpop.f32.mrb[21].mxu0  ;;  %v1036_v35 = vpop.f32.mrb[21].mxu1 }
 0x179   : > { %v8620_v38 = vadd.f32 %v1036_v35, %v864_v16  ;;  %v874_v40 = vpop.f32.mrb[22].mxu0  ;;  %v8622_v41 = vpop.f32.mrb[22].mxu1 }
 0x17a   : > { %v8624_v44 = vpop.f32.mrb[23].mxu0  ;;  %v1040_v46 = vpop.f32.mrb[23].mxu1 }
 0x17b   : > { %v8626_v49 = vadd.f32 %v1040_v46, %v870_v28 }
 0x17c   : > { %6572 = vmatmul.mubr.msk.bf16.gmra.mrb[128].mxu0 %vm697_vm1, %v8344_v36  ;;  %6587 = vmatmul.mubr.msk.bf16.gmra.mrb[128].mxu1 %vm697_vm1, %v8344_v36 }
 0x17d   : > { %1523 = vmatprep.mubr.bf16.mxu0 %v10875_v0  ;;  %1687 = vmatprep.mubr.bf16.mxu1 %v10875_v0 }
 0x17f   : > { %v880_v52 = vpop.f32.mrb[24].mxu0  ;;  %v8634_v56 = vpop.f32.mrb[24].mxu1 }
 0x180   : > { %v8636_v59 = vpop.f32.mrb[25].mxu0  ;;  %v1046_v63 = vpop.f32.mrb[25].mxu1 }
 0x181   : > { %v8638_v3 = vadd.f32 %v1046_v63, %v874_v40  ;;  %v884_v6 = vpop.f32.mrb[26].mxu0  ;;  %v8640_v8 = vpop.f32.mrb[26].mxu1 }
 0x182   : > { %10909 = vst [vmem:[#allocation20_spill] sm:$0xff] %v8640_v8  ;;  %v8642_v11 = vpop.f32.mrb[27].mxu0  ;;  %v1050_v16 = vpop.f32.mrb[27].mxu1 }
 0x183   : > { %10910 = vst [vmem:[#allocation21_spill] sm:$0xff] %v8642_v11  ;;  %v8644_v23 = vadd.f32 %v1050_v16, %v880_v52 }
 0x184   : > { %6573 = vmatmul.mubr.msk.bf16.gmra.mrb[132].mxu0 %vm697_vm1, %v8354_v39  ;;  %6588 = vmatmul.mubr.msk.bf16.gmra.mrb[132].mxu1 %vm697_vm1, %v8354_v39 }
 0x185   : > { %10911 = vst [vmem:[#allocation22_spill] sm:$0xff] %v8644_v23  ;;  %1533 = vmatprep.mubr.bf16.mxu0 %v10875_v0  ;;  %1697 = vmatprep.mubr.bf16.mxu1 %v10875_v0 }
 0x187   : > { %v890_v28 = vpop.f32.mrb[28].mxu0  ;;  %v8652_v35 = vpop.f32.mrb[28].mxu1 }
 0x188   : > { %10912 = vst [vmem:[#allocation23_spill] sm:$0xff] %v8652_v35  ;;  %v8654_v40 = vpop.f32.mrb[29].mxu0  ;;  %v1056_v46 = vpop.f32.mrb[29].mxu1 }
 0x189   : > { %10913 = vst [vmem:[#allocation24_spill] sm:$0xff] %v8654_v40  ;;  %v8656_v63 = vadd.f32 %v1056_v46, %v884_v6  ;;  %v894_v52 = vpop.f32.mrb[30].mxu0  ;;  %v8658_v16 = vpop.f32.mrb[30].mxu1 }
 0x18a   : > { %10915 = vst [vmem:[#allocation26_spill] sm:$0xff] %v8658_v16  ;;  %v8660_v8 = vpop.f32.mrb[31].mxu0  ;;  %v1060_v23 = vpop.f32.mrb[31].mxu1 }
 0x18b   : > { %10914 = vst [vmem:[#allocation25_spill] sm:$0xff] %v8656_v63  ;;  %10916 = vst [vmem:[#allocation27_spill] sm:$0xff] %v8660_v8  ;;  %v8662_v11 = vadd.f32 %v1060_v23, %v890_v28 }
 0x18c   : > { %6574 = vmatmul.mubr.msk.bf16.gmra.mrb[136].mxu0 %vm697_vm1, %v8364_v42  ;;  %6589 = vmatmul.mubr.msk.bf16.gmra.mrb[136].mxu1 %vm697_vm1, %v8364_v42 }
 0x18d   : > { %10917 = vst [vmem:[#allocation28_spill] sm:$0xff] %v8662_v11  ;;  %1543 = vmatprep.mubr.bf16.mxu0 %v10875_v0  ;;  %1707 = vmatprep.mubr.bf16.mxu1 %v10875_v0 }
 0x18f   : > { %v900_v6 = vpop.f32.mrb[32].mxu0  ;;  %v8670_v46 = vpop.f32.mrb[32].mxu1 }
 0x190   : > { %10918 = vst [vmem:[#allocation29_spill] sm:$0xff] %v8670_v46  ;;  %v8672_v35 = vpop.f32.mrb[33].mxu0  ;;  %v1066_v16 = vpop.f32.mrb[33].mxu1 }
 0x191   : > { %10919 = vst [vmem:[#allocation30_spill] sm:$0xff] %v8672_v35  ;;  %v904_v8 = vpop.f32.mrb[34].mxu0  ;;  %v8674_v63 = vpop.f32.mrb[34].mxu1  ;;  %v8676_v23 = vadd.f32 %v1066_v16, %v894_v52 }
 0x192   : > { %10920 = vst [vmem:[#allocation31_spill] sm:$0xff] %v8674_v63  ;;  %v8678_v28 = vpop.f32.mrb[35].mxu0  ;;  %v1070_v11 = vpop.f32.mrb[35].mxu1 }
 0x193   : > { %10921 = vst [vmem:[#allocation32_spill] sm:$0xff] %v8676_v23  ;;  %10922 = vst [vmem:[#allocation33_spill] sm:$0xff] %v8678_v28  ;;  %v8680_v40 = vadd.f32 %v1070_v11, %v900_v6 }
 0x194   : > { %6575 = vmatmul.mubr.msk.bf16.gmra.mrb[140].mxu0 %vm697_vm1, %v8374_v45  ;;  %6590 = vmatmul.mubr.msk.bf16.gmra.mrb[140].mxu1 %vm697_vm1, %v8374_v45 }
 0x195   : > { %10923 = vst [vmem:[#allocation34_spill] sm:$0xff] %v8680_v40  ;;  %1553 = vmatprep.mubr.bf16.mxu0 %v10875_v0  ;;  %1717 = vmatprep.mubr.bf16.mxu1 %v10875_v0 }
 0x197   : > { %v910_v46 = vpop.f32.mrb[36].mxu0  ;;  %v8688_v35 = vpop.f32.mrb[36].mxu1 }
 0x198   : > { %10924 = vst [vmem:[#allocation35_spill] sm:$0xff] %v8688_v35  ;;  %v8690_v52 = vpop.f32.mrb[37].mxu0  ;;  %v1076_v16 = vpop.f32.mrb[37].mxu1 }
 0x199   : > { %10925 = vst [vmem:[#allocation36_spill] sm:$0xff] %v8690_v52  ;;  %v914_v63 = vpop.f32.mrb[38].mxu0  ;;  %v8692_v28 = vpop.f32.mrb[38].mxu1  ;;  %v8694_v11 = vadd.f32 %v1076_v16, %v904_v8 }
 0x19a   : > { %10926 = vst [vmem:[#allocation37_spill] sm:$0xff] %v8692_v28  ;;  %v8696_v6 = vpop.f32.mrb[39].mxu0  ;;  %v1080_v40 = vpop.f32.mrb[39].mxu1 }
 0x19b   : > { %10927 = vst [vmem:[#allocation38_spill] sm:$0xff] %v8694_v11  ;;  %10928 = vst [vmem:[#allocation39_spill] sm:$0xff] %v8696_v6  ;;  %v8698_v23 = vadd.f32 %v1080_v40, %v910_v46 }
 0x19c   : > { %6576 = vmatmul.mubr.msk.bf16.gmra.mrb[144].mxu0 %vm697_vm1, %v8384_v48  ;;  %6591 = vmatmul.mubr.msk.bf16.gmra.mrb[144].mxu1 %vm697_vm1, %v8384_v48 }
 0x19d   : > { %10929 = vst [vmem:[#allocation40_spill] sm:$0xff] %v8698_v23  ;;  %1563 = vmatprep.mubr.bf16.mxu0 %v10875_v0  ;;  %1727 = vmatprep.mubr.bf16.mxu1 %v10875_v0 }
 0x19f   : > { %v920_v35 = vpop.f32.mrb[40].mxu0  ;;  %v8706_v52 = vpop.f32.mrb[40].mxu1 }
 0x1a0   : > { %10930 = vst [vmem:[#allocation41_spill] sm:$0xff] %v8706_v52  ;;  %v8708_v8 = vpop.f32.mrb[41].mxu0  ;;  %v1086_v16 = vpop.f32.mrb[41].mxu1 }
 0x1a1   : > { %10931 = vst [vmem:[#allocation42_spill] sm:$0xff] %v8708_v8  ;;  %v924_v28 = vpop.f32.mrb[42].mxu0  ;;  %v8710_v6 = vpop.f32.mrb[42].mxu1  ;;  %v8712_v40 = vadd.f32 %v1086_v16, %v914_v63 }
 0x1a2   : > { %10932 = vst [vmem:[#allocation43_spill] sm:$0xff] %v8710_v6  ;;  %v8714_v46 = vpop.f32.mrb[43].mxu0  ;;  %v1090_v23 = vpop.f32.mrb[43].mxu1 }
 0x1a3   : > { %10933 = vst [vmem:[#allocation44_spill] sm:$0xff] %v8712_v40  ;;  %10934 = vst [vmem:[#allocation45_spill] sm:$0xff] %v8714_v46  ;;  %v8716_v11 = vadd.f32 %v1090_v23, %v920_v35 }
 0x1a4   : > { %6577 = vmatmul.mubr.msk.bf16.gmra.mrb[148].mxu0 %vm697_vm1, %v8394_v51  ;;  %6592 = vmatmul.mubr.msk.bf16.gmra.mrb[148].mxu1 %vm697_vm1, %v8394_v51 }
 0x1a5   : > { %10935 = vst [vmem:[#allocation46_spill] sm:$0xff] %v8716_v11  ;;  %1573 = vmatprep.mubr.bf16.mxu0 %v10875_v0  ;;  %1737 = vmatprep.mubr.bf16.mxu1 %v10875_v0 }
 0x1a7   : > { %v930_v52 = vpop.f32.mrb[44].mxu0  ;;  %v8724_v8 = vpop.f32.mrb[44].mxu1 }
 0x1a8   : > { %10936 = vst [vmem:[#allocation47_spill] sm:$0xff] %v8724_v8  ;;  %v8726_v63 = vpop.f32.mrb[45].mxu0  ;;  %v1096_v16 = vpop.f32.mrb[45].mxu1 }
 0x1a9   : > { %10937 = vst [vmem:[#allocation48_spill] sm:$0xff] %v8726_v63  ;;  %v934_v6 = vpop.f32.mrb[46].mxu0  ;;  %v8728_v46 = vpop.f32.mrb[46].mxu1  ;;  %v8730_v35 = vadd.f32 %v1096_v16, %v924_v28 }
 0x1aa   : > { %10938 = vst [vmem:[#allocation49_spill] sm:$0xff] %v8728_v46  ;;  %v8732_v23 = vpop.f32.mrb[47].mxu0  ;;  %v1100_v11 = vpop.f32.mrb[47].mxu1 }
 0x1ab   : > { %10939 = vst [vmem:[#allocation50_spill] sm:$0xff] %v8730_v35  ;;  %10940 = vst [vmem:[#allocation51_spill] sm:$0xff] %v8732_v23  ;;  %v8734_v40 = vadd.f32 %v1100_v11, %v930_v52 }
 0x1ac   : > { %6578 = vmatmul.mubr.msk.bf16.gmra.mrb[152].mxu0 %vm697_vm1, %v8404_v54  ;;  %6593 = vmatmul.mubr.msk.bf16.gmra.mrb[152].mxu1 %vm697_vm1, %v8404_v54 }
 0x1ad   : > { %10941 = vst [vmem:[#allocation52_spill] sm:$0xff] %v8734_v40  ;;  %1583 = vmatprep.mubr.bf16.mxu0 %v10875_v0  ;;  %1747 = vmatprep.mubr.bf16.mxu1 %v10875_v0 }
 0x1af   : > { %v940_v8 = vpop.f32.mrb[48].mxu0  ;;  %v1104_v63 = vpop.f32.mrb[48].mxu1 }
 0x1b0   : > { %v941_v46 = vpop.f32.mrb[49].mxu0  ;;  %v1105_v28 = vpop.f32.mrb[49].mxu1 }
 0x1b1   : > { %v942_v16 = vpop.f32.mrb[50].mxu0  ;;  %v1107_v35 = vpop.f32.mrb[50].mxu1  ;;  %v8742_v23 = vadd.f32 %v1105_v28, %v934_v6 }
 0x1b2   : > { %v943_v52 = vpop.f32.mrb[51].mxu0  ;;  %v1108_v11 = vpop.f32.mrb[51].mxu1 }
 0x1b3   : > { %10942 = vst [vmem:[#allocation53_spill] sm:$0xff] %v8742_v23 }
 0x1b4   : > { %6579 = vmatmul.mubr.msk.bf16.gmra.mrb[156].mxu0 %vm697_vm1, %v8414_v57  ;;  %6594 = vmatmul.mubr.msk.bf16.gmra.mrb[156].mxu1 %vm697_vm1, %v8414_v57 }
 0x1b5   : > { %1593 = vmatprep.mubr.bf16.mxu0 %v10875_v0  ;;  %1757 = vmatprep.mubr.bf16.mxu1 %v10875_v0 }
 0x1b7   : > { %v946_v8 = vpop.f32.mrb[52].mxu0  ;;  %v1111_v63 = vpop.f32.mrb[52].mxu1 }
 0x1b8   : > { %v947_v46 = vpop.f32.mrb[53].mxu0  ;;  %v1112_v40 = vpop.f32.mrb[53].mxu1 }
 0x1b9   : > { %v948_v16 = vpop.f32.mrb[54].mxu0  ;;  %v1113_v35 = vpop.f32.mrb[54].mxu1 }
 0x1ba   : > { %v949_v6 = vpop.f32.mrb[55].mxu0  ;;  %v1114_v28 = vpop.f32.mrb[55].mxu1 }
 0x1bc   : > { %6580 = vmatmul.mubr.msk.bf16.gmra.mrb[160].mxu0 %vm697_vm1, %v8424_v61  ;;  %6595 = vmatmul.mubr.msk.bf16.gmra.mrb[160].mxu1 %vm697_vm1, %v8424_v61 }
 0x1bd   : > { %1603 = vmatprep.mubr.bf16.mxu0 %v10875_v0  ;;  %1767 = vmatprep.mubr.bf16.mxu1 %v10875_v0 }
 0x1bf   : > { %v1150_v52 = vpop.f32.mrb[56].mxu0  ;;  %v1315_v11 = vpop.f32.mrb[56].mxu1 }
 0x1c0   : > { %v1151_v8 = vpop.f32.mrb[57].mxu0  ;;  %v1316_v63 = vpop.f32.mrb[57].mxu1 }
 0x1c1   : > { %v1152_v46 = vpop.f32.mrb[58].mxu0  ;;  %v1317_v40 = vpop.f32.mrb[58].mxu1 }
 0x1c2   : > { %v2083_v16 = vadd.f32 %v1152_v46, %v8526_v15  ;;  %v1154_v35 = vpop.f32.mrb[59].mxu0  ;;  %v1318_v6 = vpop.f32.mrb[59].mxu1 }
 0x1c3   : > { %v8758_v28 = vadd.f32 %v1154_v35, %v8524_v14 }
 0x1c4   : > { %6581 = vmatmul.mubr.msk.bf16.gmra.mrb[164].mxu0 %vm697_vm1, %v8434_v1  ;;  %6596 = vmatmul.mubr.msk.bf16.gmra.mrb[164].mxu1 %vm697_vm1, %v8434_v1 }
 0x1c5   : > { %10943 = vst [vmem:[#allocation54_spill] sm:$0xff] %v8758_v28  ;;  %1808 = vmatprep.mubr.bf16.mxu0 %v10875_v0  ;;  %7221 = vmatprep.mubr.msk.bf16.mxu1 %vm697_vm1, %v8300_v13 }
 0x1c7   : > { %v1158_v52 = vpop.f32.mrb[60].mxu0  ;;  %v1321_v11 = vpop.f32.mrb[60].mxu1 }
 0x1c8   : > { %v2086_v15 = vadd.f32 %v1158_v52, %v8530_v20  ;;  %v1160_v8 = vpop.f32.mrb[61].mxu0  ;;  %v1323_v63 = vpop.f32.mrb[61].mxu1  ;;  %v8769_v14 = vadd.f32 %v8532_v22, %v1321_v11 }
 0x1c9   : > { %v1162_v46 = vpop.f32.mrb[62].mxu0  ;;  %v1325_v40 = vpop.f32.mrb[62].mxu1  ;;  %v8772_v35 = vadd.f32 %v1160_v8, %v8528_v18  ;;  %v8774_v6 = vadd.f32 %v2083_v16, %v1323_v63  ;;  %v10944_v18 = vmov 0  }
 0x1ca   : > { %v2089_v0 = vadd.f32 %v1162_v46, %v8542_v25  ;;  %v1164_v28 = vpop.f32.mrb[63].mxu0  ;;  %v1327_v23 = vpop.f32.mrb[63].mxu1  ;;  %v8778_v1 = vadd.f32 %v8544_v27, %v1325_v40 }
 0x1cb   : > { %v8781_v20 = vadd.f32 %v1164_v28, %v8540_v24  ;;  %v8783_v52 = vadd.f32 %v2086_v15, %v1327_v23 }
 0x1cc   : > { %6598 = vmatmul.mubr.msk.bf16.vlgmr.msra.gmra.mrb[168].mxu0 %vm697_vm1, %v8300_v13  ;;  %7222 = vmatmul.mubr.msk.bf16.vlgmr.msra.gmra.mrb[168].mxu1 %vm697_vm1, %v8310_v19 }
 0x1cd   : > { %1814 = vmatprep.mubr.bf16.mxu0 %v10944_v18  ;;  %7225 = vmatprep.mubr.msk.bf16.mxu1 %vm697_vm1, %v8322_v29 }
 0x1cf   : > { %v1168_v22 = vpop.f32.mrb[64].mxu0  ;;  %v1331_v25 = vpop.f32.mrb[64].mxu1 }
 0x1d0   : > { %v2092_v27 = vadd.f32 %v1168_v22, %v8548_v32  ;;  %v1170_v16 = vpop.f32.mrb[65].mxu0  ;;  %v1333_v24 = vpop.f32.mrb[65].mxu1  ;;  %v8794_v23 = vadd.f32 %v8550_v37, %v1331_v25 }
 0x1d1   : > { %v1172_v28 = vpop.f32.mrb[66].mxu0  ;;  %v1335_v11 = vpop.f32.mrb[66].mxu1  ;;  %v8797_v13 = vadd.f32 %v1170_v16, %v8546_v30  ;;  %v8799_v15 = vadd.f32 %v2089_v0, %v1333_v24 }
 0x1d2   : > { %v2095_v8 = vadd.f32 %v1172_v28, %v8564_v47  ;;  %v1174_v63 = vpop.f32.mrb[67].mxu0  ;;  %v1337_v46 = vpop.f32.mrb[67].mxu1  ;;  %v8803_v40 = vadd.f32 %v8566_v50, %v1335_v11 }
 0x1d3   : > { %v8806_v32 = vadd.f32 %v1174_v63, %v8558_v43  ;;  %v8808_v22 = vadd.f32 %v2092_v27, %v1337_v46 }
 0x1d4   : > { %6599 = vmatmul.mubr.msk.bf16.gmra.mrb[172].mxu0 %vm697_vm1, %v8310_v19  ;;  %7226 = vmatmul.mubr.msk.bf16.gmra.mrb[172].mxu1 %vm697_vm1, %v8334_v33 }
 0x1d5   : > { %1820 = vmatprep.mubr.bf16.mxu0 %v10944_v18  ;;  %7229 = vmatprep.mubr.msk.bf16.mxu1 %vm697_vm1, %v8344_v36 }
 0x1d7   : > { %v1178_v0 = vpop.f32.mrb[68].mxu0  ;;  %v1341_v30 = vpop.f32.mrb[68].mxu1 }
 0x1d8   : > { %v2098_v37 = vadd.f32 %v1178_v0, %v8570_v55  ;;  %v1180_v47 = vpop.f32.mrb[69].mxu0  ;;  %v1343_v43 = vpop.f32.mrb[69].mxu1  ;;  %v8819_v50 = vadd.f32 %v8572_v58, %v1341_v30 }
 0x1d9   : > { %v8822_v25 = vadd.f32 %v1180_v47, %v8568_v53  ;;  %v1182_v19 = vpop.f32.mrb[70].mxu0  ;;  %v1345_v27 = vpop.f32.mrb[70].mxu1  ;;  %v8824_v16 = vadd.f32 %v2095_v8, %v1343_v43 }
 0x1da   : > { %v2101_v24 = vadd.f32 %v1182_v19, %v8582_v62  ;;  %v1184_v28 = vpop.f32.mrb[71].mxu0  ;;  %v1347_v11 = vpop.f32.mrb[71].mxu1  ;;  %v8828_v63 = vadd.f32 %v8584_v2, %v1345_v27 }
 0x1db   : > { %v8831_v55 = vadd.f32 %v1184_v28, %v8580_v60  ;;  %v8833_v46 = vadd.f32 %v2098_v37, %v1347_v11 }
 0x1dc   : > { %6600 = vmatmul.mubr.msk.bf16.gmra.mrb[176].mxu0 %vm697_vm1, %v8322_v29  ;;  %7230 = vmatmul.mubr.msk.bf16.gmra.mrb[176].mxu1 %vm697_vm1, %v8354_v39 }
 0x1dd   : > { %1830 = vmatprep.mubr.bf16.mxu0 %v10944_v18  ;;  %7233 = vmatprep.mubr.msk.bf16.mxu1 %vm697_vm1, %v8364_v42 }
 0x1df   : > { %v1188_v53 = vpop.f32.mrb[72].mxu0  ;;  %v1351_v58 = vpop.f32.mrb[72].mxu1 }
 0x1e0   : > { %v2104_v62 = vadd.f32 %v1188_v53, %v8588_v5  ;;  %v1190_v2 = vpop.f32.mrb[73].mxu0  ;;  %v1353_v60 = vpop.f32.mrb[73].mxu1  ;;  %v8844_v8 = vadd.f32 %v8590_v7, %v1351_v58 }
 0x1e1   : > { %v8847_v0 = vadd.f32 %v1190_v2, %v8586_v4  ;;  %v1192_v29 = vpop.f32.mrb[74].mxu0  ;;  %v1355_v30 = vpop.f32.mrb[74].mxu1  ;;  %v8849_v37 = vadd.f32 %v2101_v24, %v1353_v60 }
 0x1e2   : > { %v2107_v47 = vadd.f32 %v1192_v29, %v8600_v10  ;;  %v1194_v43 = vpop.f32.mrb[75].mxu0  ;;  %v1357_v19 = vpop.f32.mrb[75].mxu1  ;;  %v8853_v27 = vadd.f32 %v8602_v12, %v1355_v30 }
 0x1e3   : > { %v8856_v5 = vadd.f32 %v1194_v43, %v8598_v9  ;;  %v8858_v28 = vadd.f32 %v2104_v62, %v1357_v19 }
 0x1e4   : > { %6601 = vmatmul.mubr.msk.bf16.gmra.mrb[180].mxu0 %vm697_vm1, %v8334_v33  ;;  %7234 = vmatmul.mubr.msk.bf16.gmra.mrb[180].mxu1 %vm697_vm1, %v8374_v45 }
 0x1e5   : > { %1840 = vmatprep.mubr.bf16.mxu0 %v10944_v18  ;;  %7237 = vmatprep.mubr.msk.bf16.mxu1 %vm697_vm1, %v8384_v48 }
 0x1e7   : > { %v1198_v4 = vpop.f32.mrb[76].mxu0  ;;  %v1361_v7 = vpop.f32.mrb[76].mxu1 }
 0x1e8   : > { %v2110_v10 = vadd.f32 %v1198_v4, %v8606_v21  ;;  %v1200_v12 = vpop.f32.mrb[77].mxu0  ;;  %v1363_v9 = vpop.f32.mrb[77].mxu1  ;;  %v8869_v24 = vadd.f32 %v8608_v26, %v1361_v7 }
 0x1e9   : > { %v8872_v11 = vadd.f32 %v1200_v12, %v8604_v17  ;;  %v1202_v33 = vpop.f32.mrb[78].mxu0  ;;  %v1365_v53 = vpop.f32.mrb[78].mxu1  ;;  %v8874_v58 = vadd.f32 %v2107_v47, %v1363_v9 }
 0x1ea   : > { %v2113_v62 = vadd.f32 %v1202_v33, %v8618_v34  ;;  %v1204_v2 = vpop.f32.mrb[79].mxu0  ;;  %v1367_v60 = vpop.f32.mrb[79].mxu1  ;;  %v8878_v29 = vadd.f32 %v8620_v38, %v1365_v53 }
 0x1eb   : > { %v8881_v21 = vadd.f32 %v1204_v2, %v8616_v31  ;;  %v8883_v30 = vadd.f32 %v2110_v10, %v1367_v60  ;;  %v10949_v60 = vld [vmem:[#allocation20_spill] sm:$0xff] }
 0x1ec   : > { %6602 = vmatmul.mubr.msk.bf16.gmra.mrb[184].mxu0 %vm697_vm1, %v8344_v36  ;;  %7238 = vmatmul.mubr.msk.bf16.gmra.mrb[184].mxu1 %vm697_vm1, %v8394_v51 }
 0x1ed   : > { %1850 = vmatprep.mubr.bf16.mxu0 %v10944_v18  ;;  %7241 = vmatprep.mubr.msk.bf16.mxu1 %vm697_vm1, %v8404_v54 }
 0x1ef   : > { %v1208_v17 = vpop.f32.mrb[80].mxu0  ;;  %v1371_v26 = vpop.f32.mrb[80].mxu1 }
 0x1f0   : > { %v2116_v34 = vadd.f32 %v1208_v17, %v8624_v44  ;;  %v1210_v38 = vpop.f32.mrb[81].mxu0  ;;  %v1373_v31 = vpop.f32.mrb[81].mxu1  ;;  %v8894_v47 = vadd.f32 %v8626_v49, %v1371_v26 }
 0x1f1   : > { %v8897_v43 = vadd.f32 %v1210_v38, %v8622_v41  ;;  %v1212_v36 = vpop.f32.mrb[82].mxu0  ;;  %v1375_v19 = vpop.f32.mrb[82].mxu1  ;;  %v8899_v4 = vadd.f32 %v2113_v62, %v1373_v31  ;;  %v10947_v62 = vld [vmem:[#allocation22_spill] sm:$0xff]  ;;  %v10951_v38 = vld [vmem:[#allocation24_spill] sm:$0xff] }
 0x1f2   : > { %v2119_v7 = vadd.f32 %v1212_v36, %v8636_v59  ;;  %v1214_v10 = vpop.f32.mrb[83].mxu0  ;;  %v1377_v12 = vpop.f32.mrb[83].mxu1  ;;  %v8903_v9 = vadd.f32 %v8638_v3, %v1375_v19  ;;  %v10946_v59 = vld [vmem:[#allocation21_spill] sm:$0xff] }
 0x1f3   : > { %v8906_v44 = vadd.f32 %v1214_v10, %v8634_v56  ;;  %v8908_v33 = vadd.f32 %v2116_v34, %v1377_v12  ;;  %v10952_v10 = vld [vmem:[#allocation25_spill] sm:$0xff] }
 0x1f4   : > { %10945 = vst [vmem:[#allocation55_spill] sm:$0xff] %v8903_v9  ;;  %6603 = vmatmul.mubr.msk.bf16.gmra.mrb[188].mxu0 %vm697_vm1, %v8354_v39  ;;  %7242 = vmatmul.mubr.msk.bf16.gmra.mrb[188].mxu1 %vm697_vm1, %v8414_v57 }
 0x1f5   : > { %1860 = vmatprep.mubr.bf16.mxu0 %v10944_v18  ;;  %7245 = vmatprep.mubr.msk.bf16.mxu1 %vm697_vm1, %v8424_v61 }
 0x1f7   : > { %v1218_v41 = vpop.f32.mrb[84].mxu0  ;;  %v1381_v49 = vpop.f32.mrb[84].mxu1 }
 0x1f8   : > { %v2122_v3 = vadd.f32 %v1218_v41, %v10946_v59  ;;  %v1220_v53 = vpop.f32.mrb[85].mxu0  ;;  %v1383_v56 = vpop.f32.mrb[85].mxu1  ;;  %v8919_v2 = vadd.f32 %v10947_v62, %v1381_v49  ;;  %v10954_v41 = vld [vmem:[#allocation23_spill] sm:$0xff] }
 0x1f9   : > { %v8922_v17 = vadd.f32 %v1220_v53, %v10949_v60  ;;  %v1222_v39 = vpop.f32.mrb[86].mxu0  ;;  %v1385_v26 = vpop.f32.mrb[86].mxu1  ;;  %v8924_v34 = vadd.f32 %v2119_v7, %v1383_v56  ;;  %v10957_v49 = vld [vmem:[#allocation19_spill] sm:$0xff]  ;;  %v10959_v60 = vld [vmem:[#allocation28_spill] sm:$0xff] }
 0x1fa   : > { %10948 = vst [vmem:[#allocation21_spill] sm:$0xff] %v8919_v2  ;;  %v2125_v31 = vadd.f32 %v1222_v39, %v10951_v38  ;;  %v1224_v36 = vpop.f32.mrb[87].mxu0  ;;  %v1387_v19 = vpop.f32.mrb[87].mxu1  ;;  %v8928_v12 = vadd.f32 %v10952_v10, %v1385_v26  ;;  %v10958_v56 = vld [vmem:[#allocation27_spill] sm:$0xff] }
 0x1fb   : > { %10950 = vst [vmem:[#allocation22_spill] sm:$0xff] %v8924_v34  ;;  %v8931_v59 = vadd.f32 %v1224_v36, %v10954_v41  ;;  %v8933_v9 = vadd.f32 %v2122_v3, %v1387_v19  ;;  %v10961_v36 = vld [vmem:[#allocation26_spill] sm:$0xff] }
 0x1fc   : > { %10953 = vst [vmem:[#allocation20_spill] sm:$0xff] %v8928_v12  ;;  %6604 = vmatmul.mubr.msk.bf16.gmra.mrb[192].mxu0 %vm697_vm1, %v8364_v42  ;;  %7246 = vmatmul.mubr.msk.bf16.gmra.mrb[192].mxu1 %vm697_vm1, %v10957_v49  ;;  %v10963_v41 = vld [vmem:[#allocation30_spill] sm:$0xff] }
 0x1fd   : > { %10955 = vst [vmem:[#allocation24_spill] sm:$0xff] %v8931_v59  ;;  %10956 = vst [vmem:[#allocation25_spill] sm:$0xff] %v8933_v9  ;;  %1870 = vmatprep.mubr.bf16.mxu0 %v10944_v18  ;;  %v10964_v9 = vld [vmem:[#allocation32_spill] sm:$0xff] }
 0x1ff   : > { %v1228_v7 = vpop.f32.mrb[88].mxu0  ;;  %v1391_v53 = vpop.f32.mrb[88].mxu1 }
 0x200   : > { %v2128_v62 = vadd.f32 %v1228_v7, %v10958_v56  ;;  %v8942_v39 = vadd.f32 %v10959_v60, %v1391_v53  ;;  %v1230_v26 = vpop.f32.mrb[89].mxu0  ;;  %v1393_v38 = vpop.f32.mrb[89].mxu1  ;;  %v10966_v7 = vld [vmem:[#allocation29_spill] sm:$0xff] }
 0x201   : > { %v8945_v3 = vadd.f32 %v1230_v26, %v10961_v36  ;;  %v8947_v19 = vadd.f32 %v2125_v31, %v1393_v38  ;;  %v1232_v42 = vpop.f32.mrb[90].mxu0  ;;  %v1395_v10 = vpop.f32.mrb[90].mxu1  ;;  %v10969_v26 = vld [vmem:[#allocation33_spill] sm:$0xff]  ;;  %v10970_v36 = vld [vmem:[#allocation34_spill] sm:$0xff] }
 0x202   : > { %10960 = vst [vmem:[#allocation23_spill] sm:$0xff] %v8942_v39  ;;  %v2131_v12 = vadd.f32 %v1232_v42, %v10963_v41  ;;  %v8951_v59 = vadd.f32 %v10964_v9, %v1395_v10  ;;  %v1234_v2 = vpop.f32.mrb[91].mxu0  ;;  %v1397_v34 = vpop.f32.mrb[91].mxu1  ;;  %v10972_v41 = vld [vmem:[#allocation31_spill] sm:$0xff] }
 0x203   : > { %10962 = vst [vmem:[#allocation19_spill] sm:$0xff] %v8947_v19  ;;  %v8954_v56 = vadd.f32 %v1234_v2, %v10966_v7  ;;  %v8956_v53 = vadd.f32 %v2128_v62, %v1397_v34  ;;  %v10974_v7 = vld [vmem:[#allocation36_spill] sm:$0xff] }
 0x204   : > { %10965 = vst [vmem:[#allocation27_spill] sm:$0xff] %v8951_v59  ;;  %6605 = vmatmul.mubr.msk.bf16.gmra.mrb[196].mxu0 %vm697_vm1, %v8374_v45 }
 0x205   : > { %10967 = vst [vmem:[#allocation28_spill] sm:$0xff] %v8954_v56  ;;  %10968 = vst [vmem:[#allocation26_spill] sm:$0xff] %v8956_v53  ;;  %1880 = vmatprep.mubr.bf16.mxu0 %v10944_v18  ;;  %v10975_v53 = vld [vmem:[#allocation38_spill] sm:$0xff] }
 0x207   : > { %v1238_v31 = vpop.f32.mrb[92].mxu0  ;;  %v1401_v60 = vpop.f32.mrb[92].mxu1 }
 0x208   : > { %v2134_v38 = vadd.f32 %v1238_v31, %v10969_v26  ;;  %v8963_v42 = vadd.f32 %v10970_v36, %v1401_v60  ;;  %v1240_v9 = vpop.f32.mrb[93].mxu0  ;;  %v1403_v10 = vpop.f32.mrb[93].mxu1  ;;  %v10977_v31 = vld [vmem:[#allocation35_spill] sm:$0xff] }
 0x209   : > { %v8966_v59 = vadd.f32 %v1240_v9, %v10972_v41  ;;  %v8968_v2 = vadd.f32 %v2131_v12, %v1403_v10  ;;  %v1242_v34 = vpop.f32.mrb[94].mxu0  ;;  %v1405_v62 = vpop.f32.mrb[94].mxu1  ;;  %v10980_v9 = vld [vmem:[#allocation39_spill] sm:$0xff]  ;;  %v10981_v41 = vld [vmem:[#allocation40_spill] sm:$0xff] }
 0x20a   : > { %10971 = vst [vmem:[#allocation30_spill] sm:$0xff] %v8963_v42  ;;  %v2137_v45 = vadd.f32 %v1242_v34, %v10974_v7  ;;  %v8972_v56 = vadd.f32 %v10975_v53, %v1405_v62  ;;  %v1244_v39 = vpop.f32.mrb[95].mxu0  ;;  %v1407_v19 = vpop.f32.mrb[95].mxu1  ;;  %v10983_v7 = vld [vmem:[#allocation37_spill] sm:$0xff] }
 0x20b   : > { %10973 = vst [vmem:[#allocation32_spill] sm:$0xff] %v8968_v2  ;;  %v8975_v26 = vadd.f32 %v1244_v39, %v10977_v31  ;;  %v8977_v60 = vadd.f32 %v2134_v38, %v1407_v19  ;;  %v10985_v31 = vld [vmem:[#allocation42_spill] sm:$0xff] }
 0x20c   : > { %10976 = vst [vmem:[#allocation29_spill] sm:$0xff] %v8972_v56  ;;  %6606 = vmatmul.mubr.msk.bf16.gmra.mrb[200].mxu0 %vm697_vm1, %v8384_v48 }
 0x20d   : > { %10978 = vst [vmem:[#allocation33_spill] sm:$0xff] %v8975_v26  ;;  %10979 = vst [vmem:[#allocation34_spill] sm:$0xff] %v8977_v60  ;;  %1890 = vmatprep.mubr.bf16.mxu0 %v10944_v18  ;;  %v10986_v60 = vld [vmem:[#allocation44_spill] sm:$0xff] }
 0x20f   : > { %v1248_v12 = vpop.f32.mrb[96].mxu0  ;;  %v1411_v36 = vpop.f32.mrb[96].mxu1 }
 0x210   : > { %v2140_v10 = vadd.f32 %v1248_v12, %v10980_v9  ;;  %v8984_v34 = vadd.f32 %v10981_v41, %v1411_v36  ;;  %v1250_v53 = vpop.f32.mrb[97].mxu0  ;;  %v1413_v62 = vpop.f32.mrb[97].mxu1  ;;  %v10988_v12 = vld [vmem:[#allocation41_spill] sm:$0xff] }
 0x211   : > { %v8987_v56 = vadd.f32 %v1250_v53, %v10983_v7  ;;  %v8989_v39 = vadd.f32 %v2137_v45, %v1413_v62  ;;  %v1252_v19 = vpop.f32.mrb[98].mxu0  ;;  %v1415_v38 = vpop.f32.mrb[98].mxu1  ;;  %v10991_v53 = vld [vmem:[#allocation45_spill] sm:$0xff]  ;;  %v10992_v7 = vld [vmem:[#allocation46_spill] sm:$0xff] }
 0x212   : > { %10982 = vst [vmem:[#allocation31_spill] sm:$0xff] %v8984_v34  ;;  %v2143_v48 = vadd.f32 %v1252_v19, %v10985_v31  ;;  %v8993_v26 = vadd.f32 %v10986_v60, %v1415_v38  ;;  %v1254_v42 = vpop.f32.mrb[99].mxu0  ;;  %v1417_v2 = vpop.f32.mrb[99].mxu1  ;;  %v10994_v31 = vld [vmem:[#allocation43_spill] sm:$0xff] }
 0x213   : > { %10984 = vst [vmem:[#allocation36_spill] sm:$0xff] %v8989_v39  ;;  %v8996_v9 = vadd.f32 %v1254_v42, %v10988_v12  ;;  %v8998_v36 = vadd.f32 %v2140_v10, %v1417_v2  ;;  %v10995_v12 = vld [vmem:[#allocation48_spill] sm:$0xff] }
 0x214   : > { %10987 = vst [vmem:[#allocation38_spill] sm:$0xff] %v8993_v26  ;;  %6607 = vmatmul.mubr.msk.bf16.gmra.mrb[204].mxu0 %vm697_vm1, %v8394_v51 }
 0x215   : > { %10989 = vst [vmem:[#allocation35_spill] sm:$0xff] %v8996_v9  ;;  %10990 = vst [vmem:[#allocation39_spill] sm:$0xff] %v8998_v36  ;;  %1900 = vmatprep.mubr.bf16.mxu0 %v10944_v18  ;;  %v10996_v36 = vld [vmem:[#allocation50_spill] sm:$0xff] }
 0x217   : > { %v1258_v45 = vpop.f32.mrb[100].mxu0  ;;  %v1421_v41 = vpop.f32.mrb[100].mxu1 }
 0x218   : > { %v2146_v62 = vadd.f32 %v1258_v45, %v10991_v53  ;;  %v9005_v19 = vadd.f32 %v10992_v7, %v1421_v41  ;;  %v1260_v60 = vpop.f32.mrb[101].mxu0  ;;  %v1423_v38 = vpop.f32.mrb[101].mxu1  ;;  %v10998_v45 = vld [vmem:[#allocation47_spill] sm:$0xff] }
 0x219   : > { %v9008_v26 = vadd.f32 %v1260_v60, %v10994_v31  ;;  %v9010_v42 = vadd.f32 %v2143_v48, %v1423_v38  ;;  %v1262_v2 = vpop.f32.mrb[102].mxu0  ;;  %v1425_v10 = vpop.f32.mrb[102].mxu1  ;;  %v11001_v60 = vld [vmem:[#allocation51_spill] sm:$0xff]  ;;  %v11002_v31 = vld [vmem:[#allocation52_spill] sm:$0xff] }
 0x21a   : > { %10993 = vst [vmem:[#allocation40_spill] sm:$0xff] %v9005_v19  ;;  %v2149_v51 = vadd.f32 %v1262_v2, %v10995_v12  ;;  %v9014_v9 = vadd.f32 %v10996_v36, %v1425_v10  ;;  %v1264_v34 = vpop.f32.mrb[103].mxu0  ;;  %v1427_v39 = vpop.f32.mrb[103].mxu1  ;;  %v11003_v12 = vld [vmem:[#allocation49_spill] sm:$0xff] }
 0x21b   : > { %v9017_v53 = vadd.f32 %v1264_v34, %v10998_v45  ;;  %v9019_v41 = vadd.f32 %v2146_v62, %v1427_v39  ;;  %v11004_v45 = vld [vmem:[#allocation53_spill] sm:$0xff] }
 0x21c   : > { %10997 = vst [vmem:[#allocation37_spill] sm:$0xff] %v9014_v9  ;;  %6608 = vmatmul.mubr.msk.bf16.gmra.mrb[208].mxu0 %vm697_vm1, %v8404_v54 }
 0x21d   : > { %10999 = vst [vmem:[#allocation42_spill] sm:$0xff] %v9017_v53  ;;  %11000 = vst [vmem:[#allocation44_spill] sm:$0xff] %v9019_v41  ;;  %1910 = vmatprep.mubr.bf16.mxu0 %v10944_v18 }
 0x21f   : > { %v1268_v48 = vpop.f32.mrb[104].mxu0  ;;  %v1431_v7 = vpop.f32.mrb[104].mxu1 }
 0x220   : > { %v2152_v38 = vadd.f32 %v1268_v48, %v11001_v60  ;;  %v9026_v2 = vadd.f32 %v11002_v31, %v1431_v7  ;;  %v1270_v36 = vpop.f32.mrb[105].mxu0  ;;  %v1433_v10 = vpop.f32.mrb[105].mxu1 }
 0x221   : > { %v9029_v9 = vadd.f32 %v1270_v36, %v11003_v12  ;;  %v9031_v34 = vadd.f32 %v2149_v51, %v1433_v10  ;;  %v1272_v39 = vpop.f32.mrb[106].mxu0  ;;  %v1435_v62 = vpop.f32.mrb[106].mxu1 }
 0x222   : > { %v9034_v54 = vadd.f32 %v11004_v45, %v1435_v62  ;;  %v1273_v41 = vpop.f32.mrb[107].mxu0  ;;  %v1437_v53 = vpop.f32.mrb[107].mxu1 }
 0x223   : > { %v9036_v19 = vadd.f32 %v2152_v38, %v1437_v53 }
 0x224   : > { %6609 = vmatmul.mubr.msk.bf16.gmra.mrb[212].mxu0 %vm697_vm1, %v8414_v57 }
 0x225   : > { %1920 = vmatprep.mubr.bf16.mxu0 %v10944_v18 }
 0x227   : > { %v1276_v48 = vpop.f32.mrb[108].mxu0  ;;  %v1441_v7 = vpop.f32.mrb[108].mxu1 }
 0x228   : > { %v1277_v60 = vpop.f32.mrb[109].mxu0  ;;  %v1442_v31 = vpop.f32.mrb[109].mxu1 }
 0x229   : > { %v1278_v51 = vpop.f32.mrb[110].mxu0  ;;  %v1443_v36 = vpop.f32.mrb[110].mxu1  ;;  %v11005_v31 = vld [vmem:[#allocation54_spill] sm:$0xff] }
 0x22a   : > { %v1279_v10 = vpop.f32.mrb[111].mxu0  ;;  %v1444_v12 = vpop.f32.mrb[111].mxu1 }
 0x22c   : > { %6610 = vmatmul.mubr.msk.bf16.gmra.mrb[216].mxu0 %vm697_vm1, %v8424_v61 }
 0x22d   : > { %1930 = vmatprep.mubr.bf16.mxu0 %v10944_v18 }
 0x22f   : > { %v1480_v53 = vpop.f32.mrb[112].mxu0  ;;  %v1645_v41 = vpop.f32.mrb[112].mxu1 }
 0x230   : > { %v1481_v38 = vpop.f32.mrb[113].mxu0  ;;  %v1646_v39 = vpop.f32.mrb[113].mxu1 }
 0x231   : > { %v1482_v57 = vpop.f32.mrb[114].mxu0  ;;  %v1647_v62 = vpop.f32.mrb[114].mxu1 }
 0x232   : > { %v1483_v45 = vpop.f32.mrb[115].mxu0  ;;  %v1648_v48 = vpop.f32.mrb[115].mxu1 }
 0x234   : > { %6611 = vmatmul.mubr.msk.bf16.gmra.mrb[220].mxu0 %vm697_vm1, %v10957_v49 }
 0x237   : > { %v1486_v7 = vpop.f32.mrb[116].mxu0  ;;  %v1651_v60 = vpop.f32.mrb[116].mxu1 }
 0x238   : > { %v2156_v51 = vadd.f32 %v11005_v31, %v1486_v7  ;;  %v1488_v36 = vpop.f32.mrb[117].mxu0  ;;  %v1652_v10 = vpop.f32.mrb[117].mxu1 }
 0x239   : > { %v1489_v61 = vpop.f32.mrb[118].mxu0  ;;  %v1653_v12 = vpop.f32.mrb[118].mxu1 }
 0x23a   : > { %v2159_v53 = vadd.f32 %v8772_v35, %v1489_v61  ;;  %v9049_v41 = vadd.f32 %v8774_v6, %v1653_v12  ;;  %v1491_v38 = vpop.f32.mrb[119].mxu0  ;;  %v1655_v39 = vpop.f32.mrb[119].mxu1 }
 0x23b   : > { %v9052_v57 = vadd.f32 %v8769_v14, %v1491_v38  ;;  %v9054_v62 = vadd.f32 %v2156_v51, %v1655_v39 }
 0x23f   : > { %v1495_v49 = vpop.f32.mrb[120].mxu0  ;;  %v1659_v45 = vpop.f32.mrb[120].mxu1 }
 0x240   : > { %v2162_v48 = vadd.f32 %v8781_v20, %v1495_v49  ;;  %v9058_v7 = vadd.f32 %v8783_v52, %v1659_v45  ;;  %v1497_v60 = vpop.f32.mrb[121].mxu0  ;;  %v1661_v31 = vpop.f32.mrb[121].mxu1 }
 0x241   : > { %v9061_v35 = vadd.f32 %v8778_v1, %v1497_v60  ;;  %v9063_v6 = vadd.f32 %v2159_v53, %v1661_v31  ;;  %v1499_v36 = vpop.f32.mrb[122].mxu0  ;;  %v1663_v10 = vpop.f32.mrb[122].mxu1 }
 0x242   : > { %v2165_v14 = vadd.f32 %v8797_v13, %v1499_v36  ;;  %v9067_v51 = vadd.f32 %v8799_v15, %v1663_v10  ;;  %v1501_v61 = vpop.f32.mrb[123].mxu0  ;;  %v1665_v12 = vpop.f32.mrb[123].mxu1 }
 0x243   : > { %v9070_v20 = vadd.f32 %v8794_v23, %v1501_v61  ;;  %v9072_v52 = vadd.f32 %v2162_v48, %v1665_v12 }
 0x247   : > { %v1505_v38 = vpop.f32.mrb[124].mxu0  ;;  %v1669_v39 = vpop.f32.mrb[124].mxu1 }
 0x248   : > { %v2168_v1 = vadd.f32 %v8806_v32, %v1505_v38  ;;  %v9076_v53 = vadd.f32 %v8808_v22, %v1669_v39  ;;  %v1507_v49 = vpop.f32.mrb[125].mxu0  ;;  %v1671_v45 = vpop.f32.mrb[125].mxu1 }
 0x249   : > { %v9079_v13 = vadd.f32 %v8803_v40, %v1507_v49  ;;  %v9081_v15 = vadd.f32 %v2165_v14, %v1671_v45  ;;  %v1509_v60 = vpop.f32.mrb[126].mxu0  ;;  %v1673_v31 = vpop.f32.mrb[126].mxu1 }
 0x24a   : > { %v2171_v23 = vadd.f32 %v8822_v25, %v1509_v60  ;;  %v9085_v48 = vadd.f32 %v8824_v16, %v1673_v31  ;;  %v1511_v36 = vpop.f32.mrb[127].mxu0  ;;  %v1675_v10 = vpop.f32.mrb[127].mxu1 }
 0x24b   : > { %v9088_v32 = vadd.f32 %v8819_v50, %v1511_v36  ;;  %v9090_v22 = vadd.f32 %v2168_v1, %v1675_v10 }
 0x24f   : > { %v1515_v61 = vpop.f32.mrb[128].mxu0  ;;  %v1679_v12 = vpop.f32.mrb[128].mxu1 }
 0x250   : > { %v2174_v40 = vadd.f32 %v8831_v55, %v1515_v61  ;;  %v9094_v14 = vadd.f32 %v8833_v46, %v1679_v12  ;;  %v1517_v38 = vpop.f32.mrb[129].mxu0  ;;  %v1681_v39 = vpop.f32.mrb[129].mxu1 }
 0x251   : > { %v9097_v25 = vadd.f32 %v8828_v63, %v1517_v38  ;;  %v9099_v16 = vadd.f32 %v2171_v23, %v1681_v39  ;;  %v1519_v49 = vpop.f32.mrb[130].mxu0  ;;  %v1683_v45 = vpop.f32.mrb[130].mxu1 }
 0x252   : > { %v2177_v50 = vadd.f32 %v8847_v0, %v1519_v49  ;;  %v9103_v1 = vadd.f32 %v8849_v37, %v1683_v45  ;;  %v1521_v60 = vpop.f32.mrb[131].mxu0  ;;  %v1685_v31 = vpop.f32.mrb[131].mxu1 }
 0x253   : > { %v9106_v55 = vadd.f32 %v8844_v8, %v1521_v60  ;;  %v9108_v46 = vadd.f32 %v2174_v40, %v1685_v31 }
 0x257   : > { %v1525_v36 = vpop.f32.mrb[132].mxu0  ;;  %v1689_v10 = vpop.f32.mrb[132].mxu1 }
 0x258   : > { %v2180_v63 = vadd.f32 %v8856_v5, %v1525_v36  ;;  %v9112_v23 = vadd.f32 %v8858_v28, %v1689_v10  ;;  %v1527_v61 = vpop.f32.mrb[133].mxu0  ;;  %v1691_v12 = vpop.f32.mrb[133].mxu1 }
 0x259   : > { %v9115_v0 = vadd.f32 %v8853_v27, %v1527_v61  ;;  %v9117_v37 = vadd.f32 %v2177_v50, %v1691_v12  ;;  %v1529_v38 = vpop.f32.mrb[134].mxu0  ;;  %v1693_v39 = vpop.f32.mrb[134].mxu1 }
 0x25a   : > { %v2183_v8 = vadd.f32 %v8872_v11, %v1529_v38  ;;  %v9121_v40 = vadd.f32 %v8874_v58, %v1693_v39  ;;  %v1531_v49 = vpop.f32.mrb[135].mxu0  ;;  %v1695_v45 = vpop.f32.mrb[135].mxu1 }
 0x25b   : > { %v9124_v5 = vadd.f32 %v8869_v24, %v1531_v49  ;;  %v9126_v28 = vadd.f32 %v2180_v63, %v1695_v45 }
 0x25f   : > { %v1535_v60 = vpop.f32.mrb[136].mxu0  ;;  %v1699_v31 = vpop.f32.mrb[136].mxu1 }
 0x260   : > { %v2186_v27 = vadd.f32 %v8881_v21, %v1535_v60  ;;  %v9130_v50 = vadd.f32 %v8883_v30, %v1699_v31  ;;  %v1537_v36 = vpop.f32.mrb[137].mxu0  ;;  %v1701_v10 = vpop.f32.mrb[137].mxu1 }
 0x261   : > { %v9133_v11 = vadd.f32 %v8878_v29, %v1537_v36  ;;  %v9135_v58 = vadd.f32 %v2183_v8, %v1701_v10  ;;  %v1539_v61 = vpop.f32.mrb[138].mxu0  ;;  %v1703_v12 = vpop.f32.mrb[138].mxu1 }
 0x262   : > { %11006 = vst [vmem:[#allocation41_spill] sm:$0xff] %v9130_v50  ;;  %v2189_v24 = vadd.f32 %v8897_v43, %v1539_v61  ;;  %v9139_v63 = vadd.f32 %v8899_v4, %v1703_v12  ;;  %v1541_v38 = vpop.f32.mrb[139].mxu0  ;;  %v1705_v39 = vpop.f32.mrb[139].mxu1  ;;  %v11010_v43 = vld [vmem:[#allocation55_spill] sm:$0xff] }
 0x263   : > { %v9142_v21 = vadd.f32 %v8894_v47, %v1541_v38  ;;  %v9144_v30 = vadd.f32 %v2186_v27, %v1705_v39  ;;  %v11012_v27 = vld [vmem:[#allocation22_spill] sm:$0xff] }
 0x264   : > { %11007 = vst [vmem:[#allocation45_spill] sm:$0xff] %v9139_v63 }
 0x265   : > { %11008 = vst [vmem:[#allocation46_spill] sm:$0xff] %v9142_v21 }
 0x267   : > { %v1545_v49 = vpop.f32.mrb[140].mxu0  ;;  %v1709_v45 = vpop.f32.mrb[140].mxu1 }
 0x268   : > { %v2192_v29 = vadd.f32 %v8906_v44, %v1545_v49  ;;  %v9148_v8 = vadd.f32 %v8908_v33, %v1709_v45  ;;  %v1547_v60 = vpop.f32.mrb[141].mxu0  ;;  %v1711_v31 = vpop.f32.mrb[141].mxu1  ;;  %v11014_v44 = vld [vmem:[#allocation21_spill] sm:$0xff] }
 0x269   : > { %v9151_v36 = vadd.f32 %v11010_v43, %v1547_v60  ;;  %v9153_v4 = vadd.f32 %v2189_v24, %v1711_v31  ;;  %v1549_v10 = vpop.f32.mrb[142].mxu0  ;;  %v1713_v61 = vpop.f32.mrb[142].mxu1  ;;  %v11016_v60 = vld [vmem:[#allocation24_spill] sm:$0xff]  ;;  %v11017_v24 = vld [vmem:[#allocation25_spill] sm:$0xff] }
 0x26a   : > { %11009 = vst [vmem:[#allocation43_spill] sm:$0xff] %v9148_v8  ;;  %v2195_v47 = vadd.f32 %v8922_v17, %v1549_v10  ;;  %v9157_v12 = vadd.f32 %v11012_v27, %v1713_v61  ;;  %v1551_v38 = vpop.f32.mrb[143].mxu0  ;;  %v1715_v39 = vpop.f32.mrb[143].mxu1  ;;  %v11019_v17 = vld [vmem:[#allocation20_spill] sm:$0xff] }
 0x26b   : > { %11011 = vst [vmem:[#allocation48_spill] sm:$0xff] %v9151_v36  ;;  %v9160_v49 = vadd.f32 %v11014_v44, %v1551_v38  ;;  %v9162_v33 = vadd.f32 %v2192_v29, %v1715_v39  ;;  %v11021_v29 = vld [vmem:[#allocation19_spill] sm:$0xff] }
 0x26c   : > { %11013 = vst [vmem:[#allocation50_spill] sm:$0xff] %v9157_v12 }
 0x26d   : > { %11015 = vst [vmem:[#allocation47_spill] sm:$0xff] %v9160_v49 }
 0x26f   : > { %v1555_v45 = vpop.f32.mrb[144].mxu0  ;;  %v1719_v18 = vpop.f32.mrb[144].mxu1 }
 0x270   : > { %v2198_v43 = vadd.f32 %v11016_v60, %v1555_v45  ;;  %v9166_v31 = vadd.f32 %v11017_v24, %v1719_v18  ;;  %v1557_v8 = vpop.f32.mrb[145].mxu0  ;;  %v1721_v36 = vpop.f32.mrb[145].mxu1  ;;  %v11023_v45 = vld [vmem:[#allocation23_spill] sm:$0xff] }
 0x271   : > { %v9169_v10 = vadd.f32 %v11019_v17, %v1557_v8  ;;  %v9171_v61 = vadd.f32 %v2195_v47, %v1721_v36  ;;  %v1559_v27 = vpop.f32.mrb[146].mxu0  ;;  %v1723_v12 = vpop.f32.mrb[146].mxu1  ;;  %v11025_v8 = vld [vmem:[#allocation28_spill] sm:$0xff]  ;;  %v11026_v36 = vld [vmem:[#allocation26_spill] sm:$0xff] }
 0x272   : > { %11018 = vst [vmem:[#allocation51_spill] sm:$0xff] %v9166_v31  ;;  %v2201_v38 = vadd.f32 %v8945_v3, %v1559_v27  ;;  %v9175_v39 = vadd.f32 %v11021_v29, %v1723_v12  ;;  %v1561_v44 = vpop.f32.mrb[147].mxu0  ;;  %v1725_v49 = vpop.f32.mrb[147].mxu1  ;;  %v11028_v3 = vld [vmem:[#allocation27_spill] sm:$0xff] }
 0x273   : > { %11020 = vst [vmem:[#allocation52_spill] sm:$0xff] %v9169_v10  ;;  %v9178_v60 = vadd.f32 %v11023_v45, %v1561_v44  ;;  %v9180_v18 = vadd.f32 %v2198_v43, %v1725_v49  ;;  %v11030_v49 = vld [vmem:[#allocation32_spill] sm:$0xff] }
 0x274   : > { %11022 = vst [vmem:[#allocation49_spill] sm:$0xff] %v9175_v39 }
 0x275   : > { %11024 = vst [vmem:[#allocation53_spill] sm:$0xff] %v9178_v60 }
 0x277   : > { %v1565_v24 = vpop.f32.mrb[148].mxu0  ;;  %v1729_v31 = vpop.f32.mrb[148].mxu1 }
 0x278   : > { %v2204_v17 = vadd.f32 %v11025_v8, %v1565_v24  ;;  %v9184_v47 = vadd.f32 %v11026_v36, %v1729_v31  ;;  %v1567_v10 = vpop.f32.mrb[149].mxu0  ;;  %v1731_v63 = vpop.f32.mrb[149].mxu1  ;;  %v11032_v24 = vld [vmem:[#allocation30_spill] sm:$0xff] }
 0x279   : > { %v9187_v27 = vadd.f32 %v11028_v3, %v1567_v10  ;;  %v9189_v12 = vadd.f32 %v2201_v38, %v1731_v63  ;;  %v1569_v29 = vpop.f32.mrb[150].mxu0  ;;  %v1733_v39 = vpop.f32.mrb[150].mxu1  ;;  %v11034_v10 = vld [vmem:[#allocation33_spill] sm:$0xff]  ;;  %v11035_v63 = vld [vmem:[#allocation34_spill] sm:$0xff] }
 0x27a   : > { %11027 = vst [vmem:[#allocation54_spill] sm:$0xff] %v9184_v47  ;;  %v2207_v44 = vadd.f32 %v8966_v59, %v1569_v29  ;;  %v9193_v43 = vadd.f32 %v11030_v49, %v1733_v39  ;;  %v1571_v45 = vpop.f32.mrb[151].mxu0  ;;  %v1735_v60 = vpop.f32.mrb[151].mxu1  ;;  %v11037_v59 = vld [vmem:[#allocation29_spill] sm:$0xff] }
 0x27b   : > { %11029 = vst [vmem:[#allocation55_spill] sm:$0xff] %v9187_v27  ;;  %v9196_v8 = vadd.f32 %v11032_v24, %v1571_v45  ;;  %v9198_v31 = vadd.f32 %v2204_v17, %v1735_v60  ;;  %v11039_v60 = vld [vmem:[#allocation36_spill] sm:$0xff] }
 0x27c   : > { %11031 = vst [vmem:[#allocation22_spill] sm:$0xff] %v9193_v43 }
 0x27d   : > { %11033 = vst [vmem:[#allocation21_spill] sm:$0xff] %v9196_v8 }
 0x27f   : > { %v1575_v36 = vpop.f32.mrb[152].mxu0  ;;  %v1739_v47 = vpop.f32.mrb[152].mxu1 }
 0x280   : > { %v2210_v3 = vadd.f32 %v11034_v10, %v1575_v36  ;;  %v9202_v38 = vadd.f32 %v11035_v63, %v1739_v47  ;;  %v1577_v27 = vpop.f32.mrb[153].mxu0  ;;  %v1741_v21 = vpop.f32.mrb[153].mxu1  ;;  %v11041_v36 = vld [vmem:[#allocation31_spill] sm:$0xff] }
 0x281   : > { %v9205_v29 = vadd.f32 %v11037_v59, %v1577_v27  ;;  %v9207_v39 = vadd.f32 %v2207_v44, %v1741_v21  ;;  %v1579_v49 = vpop.f32.mrb[154].mxu0  ;;  %v1743_v43 = vpop.f32.mrb[154].mxu1  ;;  %v11043_v27 = vld [vmem:[#allocation35_spill] sm:$0xff] }
 0x282   : > { %11036 = vst [vmem:[#allocation24_spill] sm:$0xff] %v9202_v38  ;;  %v2213_v45 = vadd.f32 %v8987_v56, %v1579_v49  ;;  %v9211_v17 = vadd.f32 %v11039_v60, %v1743_v43  ;;  %v1581_v24 = vpop.f32.mrb[155].mxu0  ;;  %v1745_v8 = vpop.f32.mrb[155].mxu1  ;;  %v11044_v21 = vld [vmem:[#allocation39_spill] sm:$0xff]  ;;  %v11046_v56 = vld [vmem:[#allocation38_spill] sm:$0xff] }
 0x283   : > { %11038 = vst [vmem:[#allocation25_spill] sm:$0xff] %v9205_v29  ;;  %v9214_v10 = vadd.f32 %v11041_v36, %v1581_v24  ;;  %v9216_v47 = vadd.f32 %v2210_v3, %v1745_v8 }
 0x284   : > { %11040 = vst [vmem:[#allocation20_spill] sm:$0xff] %v9211_v17 }
 0x285   : > { %11042 = vst [vmem:[#allocation19_spill] sm:$0xff] %v9214_v10 }
 0x287   : > { %v1585_v63 = vpop.f32.mrb[156].mxu0  ;;  %v1749_v38 = vpop.f32.mrb[156].mxu1 }
 0x288   : > { %v2216_v59 = vadd.f32 %v11043_v27, %v1585_v63  ;;  %v9220_v44 = vadd.f32 %v11044_v21, %v1749_v38  ;;  %v1587_v29 = vpop.f32.mrb[157].mxu0  ;;  %v1751_v50 = vpop.f32.mrb[157].mxu1  ;;  %v11049_v63 = vld [vmem:[#allocation40_spill] sm:$0xff] }
 0x289   : > { %v9223_v49 = vadd.f32 %v11046_v56, %v1587_v29  ;;  %v9225_v43 = vadd.f32 %v2213_v45, %v1751_v50  ;;  %v1589_v60 = vpop.f32.mrb[158].mxu0  ;;  %v1753_v17 = vpop.f32.mrb[158].mxu1  ;;  %v11050_v29 = vld [vmem:[#allocation42_spill] sm:$0xff]  ;;  %v11051_v50 = vld [vmem:[#allocation44_spill] sm:$0xff] }
 0x28a   : > { %11045 = vst [vmem:[#allocation23_spill] sm:$0xff] %v9220_v44  ;;  %v2219_v24 = vadd.f32 %v9008_v26, %v1589_v60  ;;  %v9229_v8 = vadd.f32 %v9010_v42, %v1753_v17  ;;  %v1591_v3 = vpop.f32.mrb[159].mxu0  ;;  %v1755_v36 = vpop.f32.mrb[159].mxu1  ;;  %v11053_v26 = vld [vmem:[#allocation37_spill] sm:$0xff] }
 0x28b   : > { %11047 = vst [vmem:[#allocation28_spill] sm:$0xff] %v9223_v49  ;;  %v9232_v27 = vadd.f32 %v11049_v63, %v1591_v3  ;;  %v9234_v38 = vadd.f32 %v2216_v59, %v1755_v36 }
 0x28c   : > { %11048 = vst [vmem:[#allocation26_spill] sm:$0xff] %v9229_v8 }
 0x28f   : > { %v1595_v21 = vpop.f32.mrb[160].mxu0  ;;  %v1759_v44 = vpop.f32.mrb[160].mxu1 }
 0x290   : > { %v2222_v56 = vadd.f32 %v11050_v29, %v1595_v21  ;;  %v9238_v45 = vadd.f32 %v11051_v50, %v1759_v44  ;;  %v1597_v49 = vpop.f32.mrb[161].mxu0  ;;  %v1761_v10 = vpop.f32.mrb[161].mxu1  ;;  %v9254_v29 = vld [vmem:[#allocation5 + $0x4] ss:$8 sps:$4 sm:$0xff]  }
 0x291   : > { %v9241_v60 = vadd.f32 %v11053_v26, %v1597_v49  ;;  %v9243_v42 = vadd.f32 %v2219_v24, %v1761_v10  ;;  %v1599_v17 = vpop.f32.mrb[162].mxu0  ;;  %v1763_v8 = vpop.f32.mrb[162].mxu1  ;;  %11056 = vst [vmem:[#allocation33_spill] sm:$0xff] %v9254_v29  ;;  %6638 = vmatprep.mubr.msk.bf16.mxu1 %vm2633_vm2, %v9254_v29 }
 0x292   : > { %11052 = vst [vmem:[#allocation27_spill] sm:$0xff] %v9238_v45  ;;  %v2225_v3 = vadd.f32 %v9029_v9, %v1599_v17  ;;  %v9247_v59 = vadd.f32 %v9031_v34, %v1763_v8  ;;  %v1601_v36 = vpop.f32.mrb[163].mxu0  ;;  %v1765_v63 = vpop.f32.mrb[163].mxu1 }
 0x293   : > { %v9250_v21 = vadd.f32 %v9026_v2, %v1601_v36  ;;  %v9252_v44 = vadd.f32 %v2222_v56, %v1765_v63  ;;  %v2372_v36 = vlaneseq }
 0x294   : > { %11054 = vst [vmem:[#allocation32_spill] sm:$0xff] %v9247_v59 }
 0x295   : > { %11055 = vst [vmem:[#allocation30_spill] sm:$0xff] %v9250_v21  ;;  %v9266_v63 = vshrl.u32 %v2372_v36, 7 }
 0x297   : > { %v1605_v10 = vpop.f32.mrb[164].mxu0  ;;  %v1769_v49 = vpop.f32.mrb[164].mxu1  ;;  %11058 = vst [vmem:[#allocation29_spill] sm:$0xff] %v9266_v63 }
 0x298   : > { %v9259_v9 = vadd.f32 %v9036_v19, %v1769_v49  ;;  %v1606_v34 = vpop.f32.mrb[165].mxu0  ;;  %v1771_v24 = vpop.f32.mrb[165].mxu1 }
 0x299   : > { %v9262_v8 = vadd.f32 %v9034_v54, %v1606_v34  ;;  %v9264_v2 = vadd.f32 %v2225_v3, %v1771_v24  ;;  %v1608_v56 = vpop.f32.mrb[166].mxu0  ;;  %v1773_v50 = vpop.f32.mrb[166].mxu1  ;;  %v10881_v54 = vsub.s32 2, %v9266_v63  ;;  %v2370_v3 = vld [vmem:[%s10851_s2] sm:$0x7] }
 0x29a   : > { %11057 = vst [vmem:[#allocation34_spill] sm:$0xff] %v9259_v9  ;;  %v1609_v26 = vpop.f32.mrb[167].mxu0  ;;  %v1774_v17 = vpop.f32.mrb[167].mxu1 }
 0x29b   : > { %v9274_v34 = vrot.slane %v2370_v3, %v10881_v54 }
 0x29f   : > { %v1810_v29 = vpop.f32.mrb[168].mxu0  ;;  %v7223_v10 = vpop.f32.mrb[168].mxu1 }
 0x2a0   : > { %v1811_v59 = vpop.f32.mrb[169].mxu0  ;;  %v1975_v21 = vpop.f32.mrb[169].mxu1 }
 0x2a1   : > { %v1812_v19 = vpop.f32.mrb[170].mxu0  ;;  %v7224_v49 = vpop.f32.mrb[170].mxu1 }
 0x2a2   : > { %v1813_v9 = vpop.f32.mrb[171].mxu0  ;;  %v1977_v45 = vpop.f32.mrb[171].mxu1  ;;  %v9281_v19 = vsub.s32 0, %v9266_v63 }
 0x2a4   : > { %11059 = vst [vmem:[#allocation36_spill] sm:$0xff] %v9281_v19 }
 0x2a7   : > { %v1816_v24 = vpop.f32.mrb[172].mxu0  ;;  %v7227_v56 = vpop.f32.mrb[172].mxu1 }
 0x2a8   : > { %v2306_v29 = vadd.f32 %v7227_v56, %v9072_v52  ;;  %v1817_v59 = vpop.f32.mrb[173].mxu0  ;;  %v1987_v21 = vpop.f32.mrb[173].mxu1  ;;  %v9286_v52 = vsub.s32 1, %v9266_v63 }
 0x2a9   : > { %v2300_v50 = vadd.f32 %v9054_v62, %v1987_v21  ;;  %v1818_v9 = vpop.f32.mrb[174].mxu0  ;;  %v7228_v45 = vpop.f32.mrb[174].mxu1 }
 0x2aa   : > { %v2395_v26 = vadd.f32 %v9274_v34, %v2306_v29  ;;  %v2309_v17 = vadd.f32 %v7228_v45, %v9081_v15  ;;  %v1819_v36 = vpop.f32.mrb[175].mxu0  ;;  %v1990_v10 = vpop.f32.mrb[175].mxu1  ;;  %11060 = vst [vmem:[#allocation31_spill] sm:$0xff] %v9286_v52  ;;  %v9291_v15 = vrot.slane %v2370_v3, %v9281_v19 }
 0x2ab   : > { %v2389_v49 = vadd.f32 %v9274_v34, %v2300_v50  ;;  %v2303_v24 = vadd.f32 %v9063_v6, %v1990_v10  ;;  %v9294_v50 = vrot.slane %v2370_v3, %v9286_v52 }
 0x2ac   : > { %v2398_v62 = vadd.f32 %v9274_v34, %v2309_v17  ;;  %v2467_v59 = vmax.f32 %v2395_v26, 0.0 }
 0x2ad   : > { %v2392_v56 = vadd.f32 %v9274_v34, %v2303_v24  ;;  %v2461_v21 = vmax.f32 %v2389_v49, 0.0 }
 0x2ae   : > { %v2470_v29 = vmax.f32 %v2398_v62, 0.0 }
 0x2af   : > { %v2464_v9 = vmax.f32 %v2392_v56, 0.0  ;;  %v1822_v45 = vpop.f32.mrb[176].mxu0  ;;  %v7231_v36 = vpop.f32.mrb[176].mxu1 }
 0x2b0   : > { %v9296_v6 = vpack.c.bf16 %v2470_v29, %v2467_v59  ;;  %v2298_v10 = vadd.f32 %v9052_v57, %v1822_v45  ;;  %v2318_v17 = vadd.f32 %v7231_v36, %v9108_v46  ;;  %v1824_v54 = vpop.f32.mrb[177].mxu0  ;;  %v2003_v24 = vpop.f32.mrb[177].mxu1 }
 0x2b1   : > { %v9300_v26 = vpack.c.bf16 %v2464_v9, %v2461_v21  ;;  %v2299_v62 = vadd.f32 %v9049_v41, %v1824_v54  ;;  %v2312_v49 = vadd.f32 %v9090_v22, %v2003_v24  ;;  %v1826_v56 = vpop.f32.mrb[178].mxu0  ;;  %v7232_v63 = vpop.f32.mrb[178].mxu1 }
 0x2b2   : > { %v2387_v19 = vadd.f32 %v9291_v15, %v2298_v10  ;;  %v2407_v3 = vadd.f32 %v9274_v34, %v2318_v17  ;;  %v2301_v59 = vadd.f32 %v9061_v35, %v1826_v56  ;;  %v2321_v57 = vadd.f32 %v7232_v63, %v9117_v37  ;;  %v1828_v29 = vpop.f32.mrb[179].mxu0  ;;  %v2006_v46 = vpop.f32.mrb[179].mxu1 }
 0x2b3   : > { %v2388_v45 = vadd.f32 %v9294_v50, %v2299_v62  ;;  %v2401_v21 = vadd.f32 %v9274_v34, %v2312_v49  ;;  %v2302_v41 = vadd.f32 %v9058_v7, %v1828_v29  ;;  %v2315_v22 = vadd.f32 %v9099_v16, %v2006_v46 }
 0x2b4   : > { %v2390_v54 = vadd.f32 %v9291_v15, %v2301_v59  ;;  %v2410_v9 = vadd.f32 %v9274_v34, %v2321_v57  ;;  %v2459_v10 = vmax.f32 %v2387_v19, 0.0  ;;  %v2479_v37 = vmax.f32 %v2407_v3, 0.0 }
 0x2b5   : > { %v2391_v36 = vadd.f32 %v9294_v50, %v2302_v41  ;;  %v2404_v35 = vadd.f32 %v9274_v34, %v2315_v22  ;;  %v2460_v24 = vmax.f32 %v2388_v45, 0.0  ;;  %v2473_v62 = vmax.f32 %v2401_v21, 0.0 }
 0x2b6   : > { %v2462_v63 = vmax.f32 %v2390_v54, 0.0  ;;  %v2482_v17 = vmax.f32 %v2410_v9, 0.0 }
 0x2b7   : > { %v2463_v56 = vmax.f32 %v2391_v36, 0.0  ;;  %v2476_v49 = vmax.f32 %v2404_v35, 0.0  ;;  %v1832_v52 = vpop.f32.mrb[180].mxu0  ;;  %v7235_v7 = vpop.f32.mrb[180].mxu1 }
 0x2b8   : > { %v2543_v29 = vpack.c.bf16 %v2462_v63, %v2459_v10  ;;  %v9316_v16 = vpack.c.bf16 %v2482_v17, %v2479_v37  ;;  %v2304_v59 = vadd.f32 %v9070_v20, %v1832_v52  ;;  %v2330_v57 = vadd.f32 %v7235_v7, %v9144_v30  ;;  %v1834_v46 = vpop.f32.mrb[181].mxu0  ;;  %v2019_v41 = vpop.f32.mrb[181].mxu1 }
 0x2b9   : > { %v9320_v22 = vpack.c.bf16 %v2476_v49, %v2473_v62  ;;  %v2305_v19 = vadd.f32 %v9067_v51, %v1834_v46  ;;  %v2324_v3 = vadd.f32 %v9126_v28, %v2019_v41  ;;  %v1836_v45 = vpop.f32.mrb[182].mxu0  ;;  %v7236_v21 = vpop.f32.mrb[182].mxu1  ;;  %v2544_v54 = vpack.c.bf16 %v2463_v56, %v2460_v24 }
 0x2ba   : > { %v2393_v9 = vadd.f32 %v9291_v15, %v2304_v59  ;;  %v2419_v36 = vadd.f32 %v9274_v34, %v2330_v57  ;;  %v2307_v35 = vadd.f32 %v9079_v13, %v1836_v45  ;;  %v2333_v20 = vadd.f32 %v7236_v21, %v9153_v4  ;;  %v1838_v30 = vpop.f32.mrb[183].mxu0  ;;  %v2022_v52 = vpop.f32.mrb[183].mxu1 }
 0x2bb   : > { %v2394_v10 = vadd.f32 %v9294_v50, %v2305_v19  ;;  %v2413_v37 = vadd.f32 %v9274_v34, %v2324_v3  ;;  %v2308_v51 = vadd.f32 %v9076_v53, %v1838_v30  ;;  %v2327_v28 = vadd.f32 %v9135_v58, %v2022_v52  ;;  %2652 = vmatprep.subr.bf16.mxu1 %v2544_v54 }
 0x2bc   : > { %v2396_v63 = vadd.f32 %v9291_v15, %v2307_v35  ;;  %v2422_v17 = vadd.f32 %v9274_v34, %v2333_v20  ;;  %2653 = vmatpush1.bf16.msra.mxu1 %v2543_v29  ;;  %v2465_v24 = vmax.f32 %v2393_v9, 0.0  ;;  %v2491_v62 = vmax.f32 %v2419_v36, 0.0 }
 0x2bd   : > { %v2397_v13 = vadd.f32 %v9294_v50, %v2308_v51  ;;  %v2416_v4 = vadd.f32 %v9274_v34, %v2327_v28  ;;  %v2466_v7 = vmax.f32 %v2394_v10, 0.0  ;;  %v2485_v59 = vmax.f32 %v2413_v37, 0.0 }
 0x2be   : > { %v2468_v56 = vmax.f32 %v2396_v63, 0.0  ;;  %v2494_v49 = vmax.f32 %v2422_v17, 0.0 }
 0x2bf   : > { %v2469_v57 = vmax.f32 %v2397_v13, 0.0  ;;  %v2488_v53 = vmax.f32 %v2416_v4, 0.0  ;;  %v1842_v46 = vpop.f32.mrb[184].mxu0  ;;  %v7239_v58 = vpop.f32.mrb[184].mxu1 }
 0x2c0   : > { %v2546_v41 = vpack.c.bf16 %v2468_v56, %v2465_v24  ;;  %v9336_v19 = vpack.c.bf16 %v2494_v49, %v2491_v62  ;;  %v2310_v3 = vadd.f32 %v9088_v32, %v1842_v46  ;;  %v2342_v29 = vadd.f32 %v7239_v58, %v9180_v18  ;;  %v1844_v45 = vpop.f32.mrb[185].mxu0  ;;  %v2035_v21 = vpop.f32.mrb[185].mxu1 }
 0x2c1   : > { %v9340_v54 = vpack.c.bf16 %v2488_v53, %v2485_v59  ;;  %v2311_v9 = vadd.f32 %v9085_v48, %v1844_v45  ;;  %v2336_v36 = vadd.f32 %v9162_v33, %v2035_v21  ;;  %v1846_v35 = vpop.f32.mrb[186].mxu0  ;;  %v7240_v20 = vpop.f32.mrb[186].mxu1  ;;  %v2547_v30 = vpack.c.bf16 %v2469_v57, %v2466_v7 }
 0x2c2   : > { %v2399_v52 = vadd.f32 %v9291_v15, %v2310_v3  ;;  %v2431_v10 = vadd.f32 %v9274_v34, %v2342_v29  ;;  %v2313_v37 = vadd.f32 %v9097_v25, %v1846_v35  ;;  %v2345_v32 = vadd.f32 %v7240_v20, %v9189_v12  ;;  %v1848_v18 = vpop.f32.mrb[187].mxu0  ;;  %v2038_v51 = vpop.f32.mrb[187].mxu1 }
 0x2c3   : > { %v2400_v28 = vadd.f32 %v9294_v50, %v2311_v9  ;;  %v2425_v63 = vadd.f32 %v9274_v34, %v2336_v36  ;;  %v2314_v48 = vadd.f32 %v9094_v14, %v1848_v18  ;;  %v2339_v33 = vadd.f32 %v9171_v61, %v2038_v51  ;;  %2654 = vmatprep.subr.bf16.mxu1 %v2547_v30 }
 0x2c4   : > { %v2402_v17 = vadd.f32 %v9291_v15, %v2313_v37  ;;  %v2434_v13 = vadd.f32 %v9274_v34, %v2345_v32  ;;  %2655 = vmatpush1.bf16.msra.mxu1 %v2546_v41  ;;  %v2471_v4 = vmax.f32 %v2399_v52, 0.0  ;;  %v2503_v24 = vmax.f32 %v2431_v10, 0.0 }
 0x2c5   : > { %v2403_v25 = vadd.f32 %v9294_v50, %v2314_v48  ;;  %v2428_v12 = vadd.f32 %v9274_v34, %v2339_v33  ;;  %v2472_v49 = vmax.f32 %v2400_v28, 0.0  ;;  %v2497_v7 = vmax.f32 %v2425_v63, 0.0 }
 0x2c6   : > { %v2474_v62 = vmax.f32 %v2402_v17, 0.0  ;;  %v2506_v56 = vmax.f32 %v2434_v13, 0.0 }
 0x2c7   : > { %v2475_v59 = vmax.f32 %v2403_v25, 0.0  ;;  %v2500_v14 = vmax.f32 %v2428_v12, 0.0  ;;  %v1852_v57 = vpop.f32.mrb[188].mxu0  ;;  %v7243_v61 = vpop.f32.mrb[188].mxu1 }
 0x2c8   : > { %v2549_v53 = vpack.c.bf16 %v2474_v62, %v2471_v4  ;;  %v9356_v46 = vpack.c.bf16 %v2506_v56, %v2503_v24  ;;  %v2316_v58 = vadd.f32 %v9106_v55, %v1852_v57  ;;  %v2354_v41 = vadd.f32 %v7243_v61, %v9216_v47  ;;  %v1854_v3 = vpop.f32.mrb[189].mxu0  ;;  %v2051_v29 = vpop.f32.mrb[189].mxu1 }
 0x2c9   : > { %v9360_v45 = vpack.c.bf16 %v2500_v14, %v2497_v7  ;;  %v2317_v21 = vadd.f32 %v9103_v1, %v1854_v3  ;;  %v2348_v9 = vadd.f32 %v9198_v31, %v2051_v29  ;;  %v1856_v36 = vpop.f32.mrb[190].mxu0  ;;  %v7244_v35 = vpop.f32.mrb[190].mxu1  ;;  %v2550_v20 = vpack.c.bf16 %v2475_v59, %v2472_v49 }
 0x2ca   : > { %v2405_v30 = vadd.f32 %v9291_v15, %v2316_v58  ;;  %v2443_v52 = vadd.f32 %v9274_v34, %v2354_v41  ;;  %v2319_v10 = vadd.f32 %v9115_v0, %v1856_v36  ;;  %v2357_v55 = vadd.f32 %v7244_v35, %v9225_v43  ;;  %v1858_v47 = vpop.f32.mrb[191].mxu0  ;;  %v2054_v37 = vpop.f32.mrb[191].mxu1 }
 0x2cb   : > { %v2406_v32 = vadd.f32 %v9294_v50, %v2317_v21  ;;  %v2437_v18 = vadd.f32 %v9274_v34, %v2348_v9  ;;  %v2320_v1 = vadd.f32 %v9112_v23, %v1858_v47  ;;  %v2351_v31 = vadd.f32 %v9207_v39, %v2054_v37  ;;  %2656 = vmatprep.subr.bf16.mxu1 %v2550_v20 }
 0x2cc   : > { %v2408_v51 = vadd.f32 %v9291_v15, %v2319_v10  ;;  %v2446_v28 = vadd.f32 %v9274_v34, %v2357_v55  ;;  %2657 = vmatpush1.bf16.msra.mxu1 %v2549_v53  ;;  %v2477_v63 = vmax.f32 %v2405_v30, 0.0  ;;  %v2515_v48 = vmax.f32 %v2443_v52, 0.0 }
 0x2cd   : > { %v2409_v0 = vadd.f32 %v9294_v50, %v2320_v1  ;;  %v2440_v43 = vadd.f32 %v9274_v34, %v2351_v31  ;;  %v2478_v13 = vmax.f32 %v2406_v32, 0.0  ;;  %v2509_v25 = vmax.f32 %v2437_v18, 0.0 }
 0x2ce   : > { %v2480_v33 = vmax.f32 %v2408_v51, 0.0  ;;  %v2518_v17 = vmax.f32 %v2446_v28, 0.0 }
 0x2cf   : > { %v2481_v12 = vmax.f32 %v2409_v0, 0.0  ;;  %v2512_v23 = vmax.f32 %v2440_v43, 0.0  ;;  %v1862_v4 = vpop.f32.mrb[192].mxu0  ;;  %v7247_v39 = vpop.f32.mrb[192].mxu1  ;;  %v11062_v0 = vld [vmem:[#allocation46_spill] sm:$0xff] }
 0x2d0   : > { %v2552_v24 = vpack.c.bf16 %v2480_v33, %v2477_v63  ;;  %v9376_v62 = vpack.c.bf16 %v2518_v17, %v2515_v48  ;;  %v2322_v56 = vadd.f32 %v9124_v5, %v1862_v4  ;;  %v2366_v49 = vadd.f32 %v7247_v39, %v9252_v44  ;;  %v1864_v7 = vpop.f32.mrb[193].mxu0  ;;  %v2067_v59 = vpop.f32.mrb[193].mxu1  ;;  %v11063_v33 = vld [vmem:[#allocation45_spill] sm:$0xff] }
 0x2d1   : > { %v9380_v14 = vpack.c.bf16 %v2512_v23, %v2509_v25  ;;  %v2323_v57 = vadd.f32 %v9121_v40, %v1864_v7  ;;  %v2360_v61 = vadd.f32 %v9234_v38, %v2067_v59  ;;  %v1866_v53 = vpop.f32.mrb[194].mxu0  ;;  %v7248_v58 = vpop.f32.mrb[194].mxu1  ;;  %v2553_v41 = vpack.c.bf16 %v2481_v12, %v2478_v13  ;;  %v11061_v40 = vld [vmem:[#allocation41_spill] sm:$0xff]  ;;  %v11064_v12 = vld [vmem:[#allocation48_spill] sm:$0xff] }
 0x2d2   : > { %v2411_v3 = vadd.f32 %v9291_v15, %v2322_v56  ;;  %v2455_v29 = vadd.f32 %v9274_v34, %v2366_v49  ;;  %v2325_v21 = vadd.f32 %v9133_v11, %v1866_v53  ;;  %v2369_v5 = vadd.f32 %v7248_v58, %v9264_v2  ;;  %v1868_v44 = vpop.f32.mrb[195].mxu0  ;;  %v2070_v9 = vpop.f32.mrb[195].mxu1 }
 0x2d3   : > { %v2412_v36 = vadd.f32 %v9294_v50, %v2323_v57  ;;  %v2449_v35 = vadd.f32 %v9274_v34, %v2360_v61  ;;  %v2326_v20 = vadd.f32 %v11061_v40, %v1868_v44  ;;  %v2363_v38 = vadd.f32 %v9243_v42, %v2070_v9  ;;  %2658 = vmatprep.subr.bf16.mxu1 %v2553_v41  ;;  %v11068_v40 = vld [vmem:[#allocation52_spill] sm:$0xff] }
 0x2d4   : > { %v2414_v30 = vadd.f32 %v9291_v15, %v2325_v21  ;;  %v2458_v52 = vadd.f32 %v9274_v34, %v2369_v5  ;;  %2659 = vmatpush1.bf16.msra.mxu1 %v2552_v24  ;;  %v2483_v10 = vmax.f32 %v2411_v3, 0.0  ;;  %v2527_v55 = vmax.f32 %v2455_v29, 0.0  ;;  %v11065_v24 = vld [vmem:[#allocation43_spill] sm:$0xff]  ;;  %v11067_v5 = vld [vmem:[#allocation50_spill] sm:$0xff] }
 0x2d5   : > { %v2415_v11 = vadd.f32 %v9294_v50, %v2326_v20  ;;  %v2452_v2 = vadd.f32 %v9274_v34, %v2363_v38  ;;  %v2484_v32 = vmax.f32 %v2412_v36, 0.0  ;;  %v2521_v18 = vmax.f32 %v2449_v35, 0.0  ;;  %v11066_v3 = vld [vmem:[#allocation47_spill] sm:$0xff] }
 0x2d6   : > { %v2486_v47 = vmax.f32 %v2414_v30, 0.0  ;;  %v2530_v37 = vmax.f32 %v2458_v52, 0.0  ;;  %v11069_v52 = vld [vmem:[#allocation51_spill] sm:$0xff] }
 0x2d7   : > { %v2487_v1 = vmax.f32 %v2415_v11, 0.0  ;;  %v2524_v31 = vmax.f32 %v2452_v2, 0.0  ;;  %v1872_v51 = vpop.f32.mrb[196].mxu0 }
 0x2d8   : > { %v2555_v42 = vpack.c.bf16 %v2486_v47, %v2483_v10  ;;  %v9396_v28 = vpack.c.bf16 %v2530_v37, %v2527_v55  ;;  %v2328_v43 = vadd.f32 %v11062_v0, %v1872_v51  ;;  %v1874_v63 = vpop.f32.mrb[197].mxu0  ;;  %v11071_v0 = vld [vmem:[#allocation49_spill] sm:$0xff] }
 0x2d9   : > { %v9399_v48 = vpack.c.bf16 %v2524_v31, %v2521_v18  ;;  %v2329_v17 = vadd.f32 %v11063_v33, %v1874_v63  ;;  %v1876_v34 = vpop.f32.mrb[198].mxu0  ;;  %v2556_v13 = vpack.c.bf16 %v2487_v1, %v2484_v32  ;;  %v11070_v31 = vld [vmem:[#allocation53_spill] sm:$0xff] }
 0x2da   : > { %v2417_v25 = vadd.f32 %v9291_v15, %v2328_v43  ;;  %v2331_v23 = vadd.f32 %v11064_v12, %v1876_v34  ;;  %v1878_v4 = vpop.f32.mrb[199].mxu0  ;;  %v11072_v34 = vld [vmem:[#allocation55_spill] sm:$0xff] }
 0x2db   : > { %v2418_v39 = vadd.f32 %v9294_v50, %v2329_v17  ;;  %v2332_v56 = vadd.f32 %v11065_v24, %v1878_v4  ;;  %2660 = vmatprep.subr.bf16.mxu1 %v2556_v13 }
 0x2dc   : > { %v2420_v49 = vadd.f32 %v9291_v15, %v2331_v23  ;;  %2661 = vmatpush1.bf16.msra.mxu1 %v2555_v42  ;;  %v2489_v59 = vmax.f32 %v2417_v25, 0.0  ;;  %v11073_v23 = vld [vmem:[#allocation54_spill] sm:$0xff] }
 0x2dd   : > { %v2421_v7 = vadd.f32 %v9294_v50, %v2332_v56  ;;  %v2490_v61 = vmax.f32 %v2418_v39, 0.0 }
 0x2de   : > { %v2492_v57 = vmax.f32 %v2420_v49, 0.0 }
 0x2df   : > { %v2493_v53 = vmax.f32 %v2421_v7, 0.0  ;;  %v1882_v58 = vpop.f32.mrb[200].mxu0 }
 0x2e0   : > { %v2558_v41 = vpack.c.bf16 %v2492_v57, %v2489_v59  ;;  %v2334_v29 = vadd.f32 %v11066_v3, %v1882_v58  ;;  %v1884_v21 = vpop.f32.mrb[201].mxu0 }
 0x2e1   : > { %v2335_v44 = vadd.f32 %v11067_v5, %v1884_v21  ;;  %v1886_v9 = vpop.f32.mrb[202].mxu0  ;;  %v2559_v36 = vpack.c.bf16 %v2493_v53, %v2490_v61  ;;  %v7413_v61 = vld [vmem:[%s10853_s4] ss:$8 sps:$4 sm:$0xff]   ;;  %v7415_v53 = vld [vmem:[%s10853_s4 + $0x4] ss:$8 sps:$4 sm:$0xff]   ;;  %v11075_v5 = vld [vmem:[#allocation22_spill] sm:$0xff] }
 0x2e2   : > { %v2423_v35 = vadd.f32 %v9291_v15, %v2334_v29  ;;  %v2337_v20 = vadd.f32 %v11068_v40, %v1886_v9  ;;  %v1888_v38 = vpop.f32.mrb[203].mxu0  ;;  %v7418_v21 = vld [vmem:[%s10853_s4 + $0x14] ss:$8 sps:$4 sm:$0xff]   ;;  %3132 = vmatprep.subr.bf16.mxu0 %v7415_v53 }
 0x2e3   : > { %v2424_v30 = vadd.f32 %v9294_v50, %v2335_v44  ;;  %v2338_v11 = vadd.f32 %v11069_v52, %v1888_v38  ;;  %2662 = vmatprep.subr.bf16.mxu1 %v2559_v36  ;;  %v11076_v40 = vld [vmem:[#allocation25_spill] sm:$0xff]  ;;  %3133 = vmatpush1.bf16.msra.mxu0 %v7413_v61 }
 0x2e4   : > { %v2426_v2 = vadd.f32 %v9291_v15, %v2337_v20  ;;  %2663 = vmatpush1.bf16.msra.mxu1 %v2558_v41  ;;  %v2495_v55 = vmax.f32 %v2423_v35, 0.0  ;;  %v11074_v41 = vld [vmem:[#allocation21_spill] sm:$0xff]  ;;  %3134 = vmatprep.subr.bf16.mxu0 %v7418_v21 }
 0x2e5   : > { %v2427_v10 = vadd.f32 %v9294_v50, %v2338_v11  ;;  %v2496_v37 = vmax.f32 %v2424_v30, 0.0  ;;  %v7416_v30 = vld [vmem:[%s10853_s4 + $0x10] ss:$8 sps:$4 sm:$0xff]   ;;  %v11077_v11 = vld [vmem:[#allocation24_spill] sm:$0xff] }
 0x2e6   : > { %v2498_v47 = vmax.f32 %v2426_v2, 0.0 }
 0x2e7   : > { %v2499_v32 = vmax.f32 %v2427_v10, 0.0  ;;  %v1892_v18 = vpop.f32.mrb[204].mxu0  ;;  %v7421_v10 = vld [vmem:[%s10853_s4 + $0x24] ss:$8 sps:$4 sm:$0xff]   ;;  %3135 = vmatpush1.bf16.msra.mxu0 %v7416_v30 }
 0x2e8   : > { %v2561_v1 = vpack.c.bf16 %v2498_v47, %v2495_v55  ;;  %v2340_v51 = vadd.f32 %v11070_v31, %v1892_v18  ;;  %v1894_v42 = vpop.f32.mrb[205].mxu0  ;;  %v7419_v18 = vld [vmem:[%s10853_s4 + $0x20] ss:$8 sps:$4 sm:$0xff]   ;;  %3136 = vmatprep.subr.bf16.mxu0 %v7421_v10 }
 0x2e9   : > { %v2341_v43 = vadd.f32 %v11071_v0, %v1894_v42  ;;  %v1896_v63 = vpop.f32.mrb[206].mxu0  ;;  %v2562_v33 = vpack.c.bf16 %v2499_v32, %v2496_v37  ;;  %v7424_v42 = vld [vmem:[%s10853_s4 + $0x34] ss:$8 sps:$4 sm:$0xff]  }
 0x2ea   : > { %v2429_v17 = vadd.f32 %v9291_v15, %v2340_v51  ;;  %v2343_v13 = vadd.f32 %v11072_v34, %v1896_v63  ;;  %v1898_v25 = vpop.f32.mrb[207].mxu0 }
 0x2eb   : > { %v2430_v12 = vadd.f32 %v9294_v50, %v2341_v43  ;;  %v2344_v4 = vadd.f32 %v11073_v23, %v1898_v25  ;;  %2664 = vmatprep.subr.bf16.mxu1 %v2562_v33  ;;  %v11078_v43 = vld [vmem:[#allocation19_spill] sm:$0xff]  ;;  %v11080_v23 = vld [vmem:[#allocation28_spill] sm:$0xff]  ;;  %3137 = vmatpush1.bf16.msra.mxu0 %v7419_v18 }
 0x2ec   : > { %v2432_v39 = vadd.f32 %v9291_v15, %v2343_v13  ;;  %2665 = vmatpush1.bf16.msra.mxu1 %v2561_v1  ;;  %v2501_v56 = vmax.f32 %v2429_v17, 0.0  ;;  %v11079_v17 = vld [vmem:[#allocation20_spill] sm:$0xff]  ;;  %3138 = vmatprep.subr.bf16.mxu0 %v7424_v42 }
 0x2ed   : > { %v2433_v24 = vadd.f32 %v9294_v50, %v2344_v4  ;;  %v2502_v49 = vmax.f32 %v2430_v12, 0.0 }
 0x2ee   : > { %v2504_v7 = vmax.f32 %v2432_v39, 0.0 }
 0x2ef   : > { %v2505_v59 = vmax.f32 %v2433_v24, 0.0  ;;  %v1902_v57 = vpop.f32.mrb[208].mxu0  ;;  %v7422_v24 = vld [vmem:[%s10853_s4 + $0x30] ss:$8 sps:$4 sm:$0xff]  }
 0x2f0   : > { %v2564_v58 = vpack.c.bf16 %v2504_v7, %v2501_v56  ;;  %v2346_v3 = vadd.f32 %v11074_v41, %v1902_v57  ;;  %v1904_v29 = vpop.f32.mrb[209].mxu0  ;;  %3139 = vmatpush1.bf16.msra.mxu0 %v7422_v24  ;;  %v7425_v41 = vld [vmem:[%s10853_s4 + $0x40] ss:$8 sps:$4 sm:$0xff]   ;;  %v7434_v24 = vld [vmem:[%s10853_s4 + $0x70] ss:$8 sps:$4 sm:$0xff]  }
 0x2f1   : > { %v2347_v44 = vadd.f32 %v11075_v5, %v1904_v29  ;;  %v1906_v9 = vpop.f32.mrb[210].mxu0  ;;  %v2565_v36 = vpack.c.bf16 %v2505_v59, %v2502_v49  ;;  %v11081_v49 = vld [vmem:[#allocation23_spill] sm:$0xff]  ;;  %v7430_v5 = vld [vmem:[%s10853_s4 + $0x54] ss:$8 sps:$4 sm:$0xff]  }
 0x2f2   : > { %v2435_v35 = vadd.f32 %v9291_v15, %v2346_v3  ;;  %v2349_v20 = vadd.f32 %v11076_v40, %v1906_v9  ;;  %v1908_v38 = vpop.f32.mrb[211].mxu0  ;;  %v7427_v59 = vld [vmem:[%s10853_s4 + $0x44] ss:$8 sps:$4 sm:$0xff]  }
 0x2f3   : > { %v2436_v52 = vadd.f32 %v9294_v50, %v2347_v44  ;;  %v2350_v2 = vadd.f32 %v11077_v11, %v1908_v38  ;;  %2666 = vmatprep.subr.bf16.mxu1 %v2565_v36  ;;  %3140 = vmatprep.subr.bf16.mxu0 %v7427_v59  ;;  %v7439_v59 = vld [vmem:[%s10853_s4 + $0x84] ss:$8 sps:$4 sm:$0xff]  }
 0x2f4   : > { %v2438_v55 = vadd.f32 %v9291_v15, %v2349_v20  ;;  %2667 = vmatpush1.bf16.msra.mxu1 %v2564_v58  ;;  %v2507_v37 = vmax.f32 %v2435_v35, 0.0  ;;  %v11082_v35 = vld [vmem:[#allocation26_spill] sm:$0xff]  ;;  %3141 = vmatpush1.bf16.msra.mxu0 %v7425_v41 }
 0x2f5   : > { %v2439_v47 = vadd.f32 %v9294_v50, %v2350_v2  ;;  %v2508_v1 = vmax.f32 %v2436_v52, 0.0  ;;  %v7428_v2 = vld [vmem:[%s10853_s4 + $0x50] ss:$8 sps:$4 sm:$0xff]   ;;  %3142 = vmatprep.subr.bf16.mxu0 %v7430_v5 }
 0x2f6   : > { %v2510_v32 = vmax.f32 %v2438_v55, 0.0  ;;  %v11083_v55 = vld [vmem:[#allocation27_spill] sm:$0xff] }
 0x2f7   : > { %v2511_v31 = vmax.f32 %v2439_v47, 0.0  ;;  %v1912_v51 = vpop.f32.mrb[212].mxu0 }
 0x2f8   : > { %v2567_v0 = vpack.c.bf16 %v2510_v32, %v2507_v37  ;;  %v2352_v63 = vadd.f32 %v11078_v43, %v1912_v51  ;;  %v1914_v33 = vpop.f32.mrb[213].mxu0  ;;  %3143 = vmatpush1.bf16.msra.mxu0 %v7428_v2  ;;  %v7403_v2 = vld [vmem:[#allocation5 + $0x20] ss:$8 sps:$4 sm:$0xff]  }
 0x2f9   : > { %v2353_v34 = vadd.f32 %v11079_v17, %v1914_v33  ;;  %v1916_v13 = vpop.f32.mrb[214].mxu0  ;;  %v2568_v25 = vpack.c.bf16 %v2511_v31, %v2508_v1  ;;  %v7431_v1 = vld [vmem:[%s10853_s4 + $0x60] ss:$8 sps:$4 sm:$0xff]  }
 0x2fa   : > { %v2441_v12 = vadd.f32 %v9291_v15, %v2352_v63  ;;  %v2355_v4 = vadd.f32 %v11080_v23, %v1916_v13  ;;  %v1918_v39 = vpop.f32.mrb[215].mxu0  ;;  %v11084_v63 = vld [vmem:[#allocation30_spill] sm:$0xff] }
 0x2fb   : > { %v2442_v56 = vadd.f32 %v9294_v50, %v2353_v34  ;;  %v2356_v7 = vadd.f32 %v11081_v49, %v1918_v39  ;;  %2668 = vmatprep.subr.bf16.mxu1 %v2568_v25  ;;  %v11085_v34 = vld [vmem:[#allocation32_spill] sm:$0xff]  ;;  %v11086_v49 = vld [vmem:[#allocation34_spill] sm:$0xff] }
 0x2fc   : > { %v2444_v57 = vadd.f32 %v9291_v15, %v2355_v4  ;;  %2669 = vmatpush1.bf16.msra.mxu1 %v2567_v0  ;;  %v2513_v53 = vmax.f32 %v2441_v12, 0.0  ;;  %v7436_v0 = vld [vmem:[%s10853_s4 + $0x74] ss:$8 sps:$4 sm:$0xff]  }
 0x2fd   : > { %v2445_v61 = vadd.f32 %v9294_v50, %v2356_v7  ;;  %v2514_v3 = vmax.f32 %v2442_v56, 0.0 }
 0x2fe   : > { %v2516_v58 = vmax.f32 %v2444_v57, 0.0 }
 0x2ff   : > { %v2517_v29 = vmax.f32 %v2445_v61, 0.0  ;;  %v1922_v21 = vpop.f32.mrb[216].mxu0 }
 0x300   : > { %v2570_v44 = vpack.c.bf16 %v2516_v58, %v2513_v53  ;;  %v2358_v9 = vadd.f32 %v9232_v27, %v1922_v21  ;;  %v1924_v36 = vpop.f32.mrb[217].mxu0  ;;  %v7433_v27 = vld [vmem:[%s10853_s4 + $0x64] ss:$8 sps:$4 sm:$0xff]   ;;  %v7437_v58 = vld [vmem:[%s10853_s4 + $0x80] ss:$8 sps:$4 sm:$0xff]  }
 0x301   : > { %v2359_v40 = vadd.f32 %v11082_v35, %v1924_v36  ;;  %v1926_v20 = vpop.f32.mrb[218].mxu0  ;;  %v2571_v38 = vpack.c.bf16 %v2517_v29, %v2514_v3  ;;  %3144 = vmatprep.subr.bf16.mxu0 %v7433_v27  ;;  %v7442_v29 = vld [vmem:[%s10853_s4 + $0x94] ss:$8 sps:$4 sm:$0xff]   ;;  %v11087_v36 = vmov 0   ;;  %v7443_v35 = vld [vmem:[%s10853_s4 + $0xa0] ss:$8 sps:$4 sm:$0xff]  }
 0x302   : > { %v2447_v30 = vadd.f32 %v9291_v15, %v2358_v9  ;;  %v2361_v52 = vadd.f32 %v9241_v60, %v1926_v20  ;;  %v1928_v11 = vpop.f32.mrb[219].mxu0  ;;  %3145 = vmatpush1.bf16.msra.mxu0 %v7431_v1  ;;  %v9521_v9 = vld [vmem:[#allocation5 + $0x14] ss:$8 sps:$4 sm:$0xff]   ;;  %v7446_v20 = vld [vmem:[%s10853_s4 + $0xb0] ss:$8 sps:$4 sm:$0xff]  }
 0x303   : > { %v2448_v10 = vadd.f32 %v9294_v50, %v2359_v40  ;;  %v2362_v47 = vadd.f32 %v11083_v55, %v1928_v11  ;;  %2670 = vmatprep.subr.bf16.mxu1 %v2571_v38  ;;  %3146 = vmatprep.subr.bf16.mxu0 %v7436_v0  ;;  %v7448_v40 = vld [vmem:[%s10853_s4 + $0xb4] ss:$8 sps:$4 sm:$0xff]   ;;  %v7400_v38 = vld [vmem:[#allocation5 + $0x10] ss:$8 sps:$4 sm:$0xff]   ;;  %v7404_v55 = vld [vmem:[#allocation5 + $0x34] ss:$8 sps:$4 sm:$0xff]  }
 0x304   : > { %v2450_v37 = vadd.f32 %v9291_v15, %v2361_v52  ;;  %2671 = vmatpush1.bf16.msra.mxu1 %v2570_v44  ;;  %v2519_v32 = vmax.f32 %v2447_v30, 0.0  ;;  %v7445_v44 = vld [vmem:[%s10853_s4 + $0xa4] ss:$8 sps:$4 sm:$0xff]   ;;  %v7401_v52 = vld [vmem:[#allocation5 + $0x24] ss:$8 sps:$4 sm:$0xff]  }
 0x305   : > { %v2451_v60 = vadd.f32 %v9294_v50, %v2362_v47  ;;  %v2520_v31 = vmax.f32 %v2448_v10, 0.0  ;;  %v7451_v30 = vld [vmem:[%s10853_s4 + $0xc4] ss:$8 sps:$4 sm:$0xff]   ;;  %v7454_v11 = vld [vmem:[%s10853_s4 + $0xd4] ss:$8 sps:$4 sm:$0xff]  }
 0x306   : > { %v2522_v18 = vmax.f32 %v2450_v37, 0.0  ;;  %3147 = vmatpush1.bf16.msra.mxu0 %v7434_v24  ;;  %v7457_v10 = vld [vmem:[%s10853_s4 + $0xe4] ss:$8 sps:$4 sm:$0xff]   ;;  %v7406_v47 = vld [vmem:[#allocation5 + $0x30] ss:$8 sps:$4 sm:$0xff]  }
 0x307   : > { %v2523_v51 = vmax.f32 %v2451_v60, 0.0  ;;  %v1932_v42 = vpop.f32.mrb[220].mxu0  ;;  %3148 = vmatprep.subr.bf16.mxu0 %v7439_v59  ;;  %v7409_v27 = vld [vmem:[#allocation5 + $0x40] ss:$8 sps:$4 sm:$0xff]   ;;  %v7493_v37 = vld [vmem:[%s10854_s5 + $0x54] ss:$40 sps:$4 sm:$0xff]  }
 0x308   : > { %v2573_v43 = vpack.c.bf16 %v2522_v18, %v2519_v32  ;;  %v2364_v33 = vadd.f32 %v11084_v63, %v1932_v42  ;;  %v1934_v17 = vpop.f32.mrb[221].mxu0  ;;  %v7491_v60 = vld [vmem:[%s10854_s5 + $0x50] ss:$40 sps:$4 sm:$0xff]   ;;  %v7499_v32 = vld [vmem:[%s10854_s5 + $0xa4] ss:$40 sps:$4 sm:$0xff]  }
 0x309   : > { %v2365_v13 = vadd.f32 %v11085_v34, %v1934_v17  ;;  %v1936_v25 = vpop.f32.mrb[222].mxu0  ;;  %v2574_v12 = vpack.c.bf16 %v2523_v51, %v2520_v31  ;;  %v7497_v18 = vld [vmem:[%s10854_s5 + $0xa0] ss:$40 sps:$4 sm:$0xff]   ;;  %v7505_v1 = vld [vmem:[%s10854_s5 + $0xf4] ss:$40 sps:$4 sm:$0xff]  }
 0x30a   : > { %v2453_v23 = vadd.f32 %v9291_v15, %v2364_v33  ;;  %v2367_v4 = vadd.f32 %v9262_v8, %v1936_v25  ;;  %v1938_v39 = vpop.f32.mrb[223].mxu0  ;;  %3149 = vmatpush1.bf16.msra.mxu0 %v7437_v58  ;;  %v7503_v31 = vld [vmem:[%s10854_s5 + $0xf0] ss:$40 sps:$4 sm:$0xff]   ;;  %v7511_v51 = vld [vmem:[%s10854_s5 + $0x144] ss:$40 sps:$4 sm:$0xff]  }
 0x30b   : > { %v2454_v56 = vadd.f32 %v9294_v50, %v2365_v13  ;;  %v2368_v7 = vadd.f32 %v11086_v49, %v1938_v39  ;;  %2672 = vmatprep.subr.bf16.mxu1 %v2574_v12  ;;  %3150 = vmatprep.subr.bf16.mxu0 %v7442_v29  ;;  %v7509_v42 = vld [vmem:[%s10854_s5 + $0x140] ss:$40 sps:$4 sm:$0xff]   ;;  %v7517_v0 = vld [vmem:[%s10854_s5 + $0x194] ss:$40 sps:$4 sm:$0xff]   ;;  %v7523_v63 = vld [vmem:[%s10854_s5 + $0x1e4] ss:$40 sps:$4 sm:$0xff]  }
 0x30c   : > { %v2456_v57 = vadd.f32 %v9291_v15, %v2367_v4  ;;  %2673 = vmatpush1.bf16.msra.mxu1 %v2573_v43  ;;  %v2525_v61 = vmax.f32 %v2453_v23, 0.0  ;;  %v7440_v15 = vld [vmem:[%s10853_s4 + $0x90] ss:$8 sps:$4 sm:$0xff]   ;;  %v7521_v33 = vld [vmem:[%s10854_s5 + $0x1e0] ss:$40 sps:$4 sm:$0xff]  }
 0x30d   : > { %v2457_v8 = vadd.f32 %v9294_v50, %v2368_v7  ;;  %v2526_v41 = vmax.f32 %v2454_v56, 0.0  ;;  %v9516_v50 = vld [vmem:[#allocation5] ss:$8 sps:$4 sm:$0xff]   ;;  %v7529_v17 = vld [vmem:[%s10854_s5 + $0x234] ss:$40 sps:$4 sm:$0xff]  }
 0x30e   : > { %v2528_v53 = vmax.f32 %v2456_v57, 0.0  ;;  %3151 = vmatpush1.bf16.msra.mxu0 %v7440_v15  ;;  %v7515_v43 = vld [vmem:[%s10854_s5 + $0x190] ss:$40 sps:$4 sm:$0xff]   ;;  %v7535_v13 = vld [vmem:[%s10854_s5 + $0x284] ss:$40 sps:$4 sm:$0xff]  }
 0x30f   : > { %v2529_v3 = vmax.f32 %v2457_v8, 0.0  ;;  %3152 = vmatprep.subr.bf16.mxu0 %v7445_v44  ;;  %v7527_v34 = vld [vmem:[%s10854_s5 + $0x230] ss:$40 sps:$4 sm:$0xff]   ;;  %v7533_v25 = vld [vmem:[%s10854_s5 + $0x280] ss:$40 sps:$4 sm:$0xff]  }
 0x310   : > { %v2576_v21 = vpack.c.bf16 %v2528_v53, %v2525_v61  ;;  %v7541_v12 = vld [vmem:[%s10854_s5 + $0x2d4] ss:$40 sps:$4 sm:$0xff]   ;;  %v7539_v24 = vld [vmem:[%s10854_s5 + $0x2d0] ss:$40 sps:$4 sm:$0xff]   ;;  %v7547_v7 = vld [vmem:[%s10854_s5 + $0x324] ss:$40 sps:$4 sm:$0xff]  }
 0x311   : > { %v2577_v5 = vpack.c.bf16 %v2529_v3, %v2526_v41  ;;  %v7461_v57 = vld [vmem:[%s10853_s4 + $0x100] ss:$8 sps:$4 sm:$0xff]   ;;  %v7466_v8 = vld [vmem:[%s10853_s4 + $0x114] ss:$8 sps:$4 sm:$0xff]   ;;  %v7464_v58 = vld [vmem:[%s10853_s4 + $0x110] ss:$8 sps:$4 sm:$0xff]  }
 0x312   : > { %3153 = vmatpush1.bf16.msra.mxu0 %v7443_v35  ;;  %v7545_v61 = vld [vmem:[%s10854_s5 + $0x320] ss:$40 sps:$4 sm:$0xff]   ;;  %v7469_v3 = vld [vmem:[%s10853_s4 + $0x124] ss:$8 sps:$4 sm:$0xff]   ;;  %v7472_v44 = vld [vmem:[%s10853_s4 + $0x134] ss:$8 sps:$4 sm:$0xff]  }
 0x313   : > { %2674 = vmatprep.subr.bf16.mxu1 %v2577_v5  ;;  %3154 = vmatprep.subr.bf16.mxu0 %v7448_v40  ;;  %v7470_v35 = vld [vmem:[%s10853_s4 + $0x130] ss:$8 sps:$4 sm:$0xff]  }
 0x314   : > { %2675 = vmatpush1.bf16.msra.mxu1 %v2576_v21 }
 0x315   : > { %2745 = vmatprep.subr.bf16.mxu1 %v11087_v36 }
 0x316   : > { %3155 = vmatpush1.bf16.msra.mxu0 %v7446_v20  ;;  %v7475_v20 = vld [vmem:[%s10853_s4 + $0x144] ss:$8 sps:$4 sm:$0xff]  }
 0x317   : > { %2685 = vmatmul.mubr.bf16.vlgmr.msra.gmra.mrb[196].mxu1 %v9516_v50  ;;  %3156 = vmatprep.subr.bf16.mxu0 %v7451_v30 }
 0x318   : > { %2746 = vmatpush1.bf16.msra.mxu1 %v9300_v26  ;;  %6639 = vmatprep.mubr.msk.bf16.mxu1 %vm2633_vm2, %v9521_v9  ;;  %v7449_v26 = vld [vmem:[%s10853_s4 + $0xc0] ss:$8 sps:$4 sm:$0xff]  }
 0x319   : > { %2747 = vmatprep.subr.bf16.mxu1 %v11087_v36 }
 0x31a   : > { %3157 = vmatpush1.bf16.msra.mxu0 %v7449_v26 }
 0x31b   : > { %3158 = vmatprep.subr.bf16.mxu0 %v7454_v11  ;;  %v7473_v11 = vld [vmem:[%s10853_s4 + $0x140] ss:$8 sps:$4 sm:$0xff]  }
 0x31c   : > { %2748 = vmatpush1.bf16.msra.mxu1 %v9296_v6  ;;  %v7452_v6 = vld [vmem:[%s10853_s4 + $0xd0] ss:$8 sps:$4 sm:$0xff]  }
 0x31d   : > { %2749 = vmatprep.subr.bf16.mxu1 %v11087_v36 }
 0x31e   : > { %3159 = vmatpush1.bf16.msra.mxu0 %v7452_v6  ;;  %v7478_v6 = vld [vmem:[%s10853_s4 + $0x154] ss:$8 sps:$4 sm:$0xff]  }
 0x31f   : > { %2695 = vmatmul.mubr.bf16.gmra.mrb[200].mxu1 %v7400_v38  ;;  %3160 = vmatprep.subr.bf16.mxu0 %v7457_v10  ;;  %v7476_v10 = vld [vmem:[%s10853_s4 + $0x150] ss:$8 sps:$4 sm:$0xff]  }
 0x320   : > { %2750 = vmatpush1.bf16.msra.mxu1 %v9320_v22  ;;  %6640 = vmatprep.mubr.msk.bf16.mxu1 %vm2633_vm2, %v7401_v52  ;;  %v7455_v22 = vld [vmem:[%s10853_s4 + $0xe0] ss:$8 sps:$4 sm:$0xff]  }
 0x321   : > { %2751 = vmatprep.subr.bf16.mxu1 %v11087_v36 }
 0x322   : > { %3161 = vmatpush1.bf16.msra.mxu0 %v7455_v22  ;;  %v7481_v22 = vld [vmem:[%s10853_s4 + $0x164] ss:$8 sps:$4 sm:$0xff]  }
 0x324   : > { %2752 = vmatpush1.bf16.msra.mxu1 %v9316_v16  ;;  %v7407_v16 = vld [vmem:[#allocation5 + $0x44] ss:$8 sps:$4 sm:$0xff]  }
 0x325   : > { %2753 = vmatprep.subr.bf16.mxu1 %v11087_v36 }
 0x327   : > { %2705 = vmatmul.mubr.bf16.gmra.mrb[204].mxu1 %v7403_v2 }
 0x328   : > { %2754 = vmatpush1.bf16.msra.mxu1 %v9340_v54  ;;  %6641 = vmatprep.mubr.msk.bf16.mxu1 %vm2633_vm2, %v7404_v55  ;;  %v7410_v54 = vld [vmem:[#allocation5 + $0x54] ss:$8 sps:$4 sm:$0xff]  }
 0x329   : > { %2755 = vmatprep.subr.bf16.mxu1 %v11087_v36 }
 0x32c   : > { %2756 = vmatpush1.bf16.msra.mxu1 %v9336_v19  ;;  %v7412_v19 = vld [vmem:[#allocation5 + $0x50] ss:$8 sps:$4 sm:$0xff]  }
 0x32d   : > { %2757 = vmatprep.subr.bf16.mxu1 %v11087_v36 }
 0x32f   : > { %2715 = vmatmul.mubr.bf16.gmra.mrb[208].mxu1 %v7406_v47 }
 0x330   : > { %2758 = vmatpush1.bf16.msra.mxu1 %v9360_v45  ;;  %6642 = vmatprep.mubr.msk.bf16.mxu1 %vm2633_vm2, %v7407_v16  ;;  %v11088_v45 = vld [vmem:[#allocation33_spill] sm:$0xff] }
 0x331   : > { %2759 = vmatprep.subr.bf16.mxu1 %v11087_v36 }
 0x334   : > { %2760 = vmatpush1.bf16.msra.mxu1 %v9356_v46  ;;  %v7460_v46 = vld [vmem:[%s10853_s4 + $0xf4] ss:$8 sps:$4 sm:$0xff]  }
 0x335   : > { %2761 = vmatprep.subr.bf16.mxu1 %v11087_v36  ;;  %3162 = vmatprep.subr.bf16.mxu0 %v7460_v46 }
 0x337   : > { %2725 = vmatmul.mubr.bf16.gmra.mrb[212].mxu1 %v7409_v27 }
 0x338   : > { %2762 = vmatpush1.bf16.msra.mxu1 %v9380_v14  ;;  %6643 = vmatprep.mubr.msk.bf16.mxu1 %vm2633_vm2, %v7410_v54  ;;  %v7463_v14 = vld [vmem:[%s10853_s4 + $0x104] ss:$8 sps:$4 sm:$0xff]  }
 0x339   : > { %2763 = vmatprep.subr.bf16.mxu1 %v11087_v36 }
 0x33c   : > { %2764 = vmatpush1.bf16.msra.mxu1 %v9376_v62  ;;  %v7458_v62 = vld [vmem:[%s10853_s4 + $0xf0] ss:$8 sps:$4 sm:$0xff]  }
 0x33d   : > { %2765 = vmatprep.subr.bf16.mxu1 %v11087_v36  ;;  %3163 = vmatpush1.bf16.msra.mxu0 %v7458_v62  ;;  %v7482_v62 = vld [vmem:[%s10853_s4 + $0x170] ss:$8 sps:$4 sm:$0xff]  }
 0x33e   : > { %3225 = vmatprep.subr.bf16.mxu0 %v7463_v14 }
 0x33f   : > { %2735 = vmatmul.mubr.bf16.gmra.mrb[216].mxu1 %v7412_v19 }
 0x340   : > { %2766 = vmatpush1.bf16.msra.mxu1 %v9399_v48  ;;  %6644 = vmatprep.mubr.msk.bf16.mxu1 %vm2633_vm2, %v11088_v45  ;;  %v7487_v48 = vld [vmem:[%s10854_s5 + $0x4] ss:$40 sps:$4 sm:$0xff]   ;;  %v7484_v45 = vld [vmem:[%s10853_s4 + $0x174] ss:$8 sps:$4 sm:$0xff]  }
 0x341   : > { %2767 = vmatprep.subr.bf16.mxu1 %v11087_v36 }
 0x344   : > { %2768 = vmatpush1.bf16.msra.mxu1 %v9396_v28  ;;  %v7485_v28 = vld [vmem:[%s10854_s5] ss:$40 sps:$4 sm:$0xff]  }
 0x345   : > { %4068 = vmatprep.subr.bf16.mxu1 %v7487_v48 }
 0x347   : > { %2778 = vmatmul.mubr.bf16.vlgmr.msra.gmra.mrb[220].mxu1 %v9516_v50  ;;  %v7467_v50 = vld [vmem:[%s10853_s4 + $0x120] ss:$8 sps:$4 sm:$0xff]  }
 0x348   : > { %6645 = vmatprep.mubr.msk.bf16.mxu1 %vm2633_vm2, %v9521_v9  ;;  %4069 = vmatpush1.bf16.msra.mxu1 %v7485_v28  ;;  %v7490_v28 = vld [vmem:[%s10854_s5 + $0x14] ss:$40 sps:$4 sm:$0xff]  }
 0x349   : > { %4070 = vmatprep.subr.bf16.mxu1 %v7493_v37 }
 0x34c   : > { %4071 = vmatpush1.bf16.msra.mxu1 %v7491_v60 }
 0x34d   : > { %4072 = vmatprep.subr.bf16.mxu1 %v7499_v32 }
 0x34f   : > { %2786 = vmatmul.mubr.bf16.gmra.mrb[224].mxu1 %v7400_v38 }
 0x350   : > { %6646 = vmatprep.mubr.msk.bf16.mxu1 %vm2633_vm2, %v7401_v52  ;;  %4073 = vmatpush1.bf16.msra.mxu1 %v7497_v18 }
 0x351   : > { %4074 = vmatprep.subr.bf16.mxu1 %v7505_v1 }
 0x354   : > { %4075 = vmatpush1.bf16.msra.mxu1 %v7503_v31 }
 0x355   : > { %4076 = vmatprep.subr.bf16.mxu1 %v7511_v51 }
 0x357   : > { %2794 = vmatmul.mubr.bf16.gmra.mrb[228].mxu1 %v7403_v2 }
 0x358   : > { %6647 = vmatprep.mubr.msk.bf16.mxu1 %vm2633_vm2, %v7404_v55  ;;  %4077 = vmatpush1.bf16.msra.mxu1 %v7509_v42 }
 0x359   : > { %4078 = vmatprep.subr.bf16.mxu1 %v7517_v0 }
 0x35c   : > { %4079 = vmatpush1.bf16.msra.mxu1 %v7515_v43 }
 0x35d   : > { %4080 = vmatprep.subr.bf16.mxu1 %v7523_v63 }
 0x35f   : > { %2802 = vmatmul.mubr.bf16.gmra.mrb[232].mxu1 %v7406_v47 }
 0x360   : > { %6648 = vmatprep.mubr.msk.bf16.mxu1 %vm2633_vm2, %v7407_v16  ;;  %4081 = vmatpush1.bf16.msra.mxu1 %v7521_v33 }
 0x361   : > { %4082 = vmatprep.subr.bf16.mxu1 %v7529_v17 }
 0x364   : > { %4083 = vmatpush1.bf16.msra.mxu1 %v7527_v34 }
 0x365   : > { %4084 = vmatprep.subr.bf16.mxu1 %v7535_v13  ;;  %v7488_v13 = vld [vmem:[%s10854_s5 + $0x10] ss:$40 sps:$4 sm:$0xff]  }
 0x367   : > { %2810 = vmatmul.mubr.bf16.gmra.mrb[236].mxu1 %v7409_v27 }
 0x368   : > { %6649 = vmatprep.mubr.msk.bf16.mxu1 %vm2633_vm2, %v7410_v54  ;;  %4085 = vmatpush1.bf16.msra.mxu1 %v7533_v25  ;;  %v7496_v25 = vld [vmem:[%s10854_s5 + $0x64] ss:$40 sps:$4 sm:$0xff]  }
 0x369   : > { %4086 = vmatprep.subr.bf16.mxu1 %v7541_v12 }
 0x36c   : > { %4087 = vmatpush1.bf16.msra.mxu1 %v7539_v24 }
 0x36d   : > { %4088 = vmatprep.subr.bf16.mxu1 %v7547_v7  ;;  %v7500_v7 = vld [vmem:[%s10854_s5 + $0xb0] ss:$40 sps:$4 sm:$0xff]  }
 0x36f   : > { %2818 = vmatmul.mubr.bf16.gmra.mrb[240].mxu1 %v7412_v19  ;;  %v7479_v19 = vld [vmem:[%s10853_s4 + $0x160] ss:$8 sps:$4 sm:$0xff]  }
 0x370   : > { %4089 = vmatpush1.bf16.msra.mxu1 %v7545_v61 }
 0x3ea   : > { %v2686_v23 = vpop.f32.mrb[196].mxu1 }
 0x3eb   : > { %v2688_v4 = vpop.f32.mrb[197].mxu1 }
 0x3ec   : > { %v2690_v39 = vpop.f32.mrb[198].mxu1 }
 0x3ed   : > { %v2826_v56 = vpack.c.bf16 %v2690_v39, %v2686_v23  ;;  %v2692_v49 = vpop.f32.mrb[199].mxu1  ;;  %v7494_v23 = vld [vmem:[%s10854_s5 + $0x60] ss:$40 sps:$4 sm:$0xff]   ;;  %v7502_v39 = vld [vmem:[%s10854_s5 + $0xb4] ss:$40 sps:$4 sm:$0xff]  }
 0x3ee   : > { %v2827_v59 = vpack.c.bf16 %v2692_v49, %v2688_v4 }
 0x3f0   : > { %3164 = vmatprep.mubr.bf16.mxu0 %v2827_v59  ;;  %v7508_v59 = vld [vmem:[%s10854_s5 + $0x104] ss:$40 sps:$4 sm:$0xff]  }
 0x3f1   : > { %3165 = vmatmul.mubr.bf16.vlgmr.msra.gmra.mrb[224].mxu0 %v2826_v56 }
 0x3f2   : > { %v2696_v53 = vpop.f32.mrb[200].mxu1  ;;  %3226 = vmatpush1.bf16.msra.mxu0 %v7461_v57 }
 0x3f3   : > { %v2698_v41 = vpop.f32.mrb[201].mxu1  ;;  %3227 = vmatprep.subr.bf16.mxu0 %v7466_v8  ;;  %v7506_v8 = vld [vmem:[%s10854_s5 + $0x100] ss:$40 sps:$4 sm:$0xff]  }
 0x3f4   : > { %v2700_v29 = vpop.f32.mrb[202].mxu1 }
 0x3f5   : > { %v2829_v21 = vpack.c.bf16 %v2700_v29, %v2696_v53  ;;  %v2702_v5 = vpop.f32.mrb[203].mxu1  ;;  %v7514_v53 = vld [vmem:[%s10854_s5 + $0x154] ss:$40 sps:$4 sm:$0xff]   ;;  %v7512_v29 = vld [vmem:[%s10854_s5 + $0x150] ss:$40 sps:$4 sm:$0xff]  }
 0x3f6   : > { %v2830_v15 = vpack.c.bf16 %v2702_v5, %v2698_v41  ;;  %3228 = vmatpush1.bf16.msra.mxu0 %v7464_v58 }
 0x3f7   : > { %3229 = vmatprep.subr.bf16.mxu0 %v7469_v3 }
 0x3f8   : > { %3174 = vmatprep.mubr.bf16.mxu0 %v2830_v15  ;;  %v7518_v15 = vld [vmem:[%s10854_s5 + $0x1a0] ss:$40 sps:$4 sm:$0xff]  }
 0x3f9   : > { %3175 = vmatmul.mubr.bf16.gmra.mrb[228].mxu0 %v2829_v21  ;;  %v7520_v21 = vld [vmem:[%s10854_s5 + $0x1a4] ss:$40 sps:$4 sm:$0xff]  }
 0x3fa   : > { %v2706_v9 = vpop.f32.mrb[204].mxu1  ;;  %3230 = vmatpush1.bf16.msra.mxu0 %v7467_v50 }
 0x3fb   : > { %v2708_v40 = vpop.f32.mrb[205].mxu1  ;;  %3231 = vmatprep.subr.bf16.mxu0 %v7472_v44  ;;  %v7526_v44 = vld [vmem:[%s10854_s5 + $0x1f4] ss:$40 sps:$4 sm:$0xff]  }
 0x3fc   : > { %v2710_v38 = vpop.f32.mrb[206].mxu1 }
 0x3fd   : > { %v2832_v30 = vpack.c.bf16 %v2710_v38, %v2706_v9  ;;  %v2712_v52 = vpop.f32.mrb[207].mxu1  ;;  %v7532_v38 = vld [vmem:[%s10854_s5 + $0x244] ss:$40 sps:$4 sm:$0xff]  }
 0x3fe   : > { %v2833_v26 = vpack.c.bf16 %v2712_v52, %v2708_v40  ;;  %3232 = vmatpush1.bf16.msra.mxu0 %v7470_v35  ;;  %v7530_v52 = vld [vmem:[%s10854_s5 + $0x240] ss:$40 sps:$4 sm:$0xff]  }
 0x3ff   : > { %3233 = vmatprep.subr.bf16.mxu0 %v7475_v20  ;;  %v7524_v20 = vld [vmem:[%s10854_s5 + $0x1f0] ss:$40 sps:$4 sm:$0xff]  }
 0x400   : > { %3184 = vmatprep.mubr.bf16.mxu0 %v2833_v26 }
 0x401   : > { %3185 = vmatmul.mubr.bf16.gmra.mrb[232].mxu0 %v2832_v30 }
 0x402   : > { %v2716_v2 = vpop.f32.mrb[208].mxu1  ;;  %3234 = vmatpush1.bf16.msra.mxu0 %v7473_v11  ;;  %v7538_v11 = vld [vmem:[%s10854_s5 + $0x294] ss:$40 sps:$4 sm:$0xff]  }
 0x403   : > { %v2718_v55 = vpop.f32.mrb[209].mxu1  ;;  %3235 = vmatprep.subr.bf16.mxu0 %v7478_v6 }
 0x404   : > { %v2720_v47 = vpop.f32.mrb[210].mxu1 }
 0x405   : > { %v2835_v16 = vpack.c.bf16 %v2720_v47, %v2716_v2  ;;  %v2722_v27 = vpop.f32.mrb[211].mxu1 }
 0x406   : > { %v2836_v54 = vpack.c.bf16 %v2722_v27, %v2718_v55  ;;  %3236 = vmatpush1.bf16.msra.mxu0 %v7476_v10  ;;  %v7536_v55 = vld [vmem:[%s10854_s5 + $0x290] ss:$40 sps:$4 sm:$0xff]  }
 0x407   : > { %3237 = vmatprep.subr.bf16.mxu0 %v7481_v22  ;;  %v7544_v22 = vld [vmem:[%s10854_s5 + $0x2e4] ss:$40 sps:$4 sm:$0xff]  }
 0x408   : > { %3194 = vmatprep.mubr.bf16.mxu0 %v2836_v54  ;;  %v7550_v54 = vld [vmem:[%s10854_s5 + $0x334] ss:$40 sps:$4 sm:$0xff]  }
 0x409   : > { %3195 = vmatmul.mubr.bf16.gmra.mrb[236].mxu0 %v2835_v16  ;;  %v7542_v16 = vld [vmem:[%s10854_s5 + $0x2e0] ss:$40 sps:$4 sm:$0xff]  }
 0x40a   : > { %v2726_v46 = vpop.f32.mrb[212].mxu1  ;;  %3238 = vmatpush1.bf16.msra.mxu0 %v7479_v19 }
 0x40b   : > { %v2728_v14 = vpop.f32.mrb[213].mxu1  ;;  %3239 = vmatprep.subr.bf16.mxu0 %v7484_v45 }
 0x40c   : > { %v2730_v48 = vpop.f32.mrb[214].mxu1 }
 0x40d   : > { %v2838_v37 = vpack.c.bf16 %v2730_v48, %v2726_v46  ;;  %v2732_v60 = vpop.f32.mrb[215].mxu1  ;;  %v7551_v48 = vld [vmem:[%s10854_s5 + $0x370] ss:$40 sps:$4 sm:$0xff]  }
 0x40e   : > { %v2839_v32 = vpack.c.bf16 %v2732_v60, %v2728_v14  ;;  %3240 = vmatpush1.bf16.msra.mxu0 %v7482_v62  ;;  %v7548_v62 = vld [vmem:[%s10854_s5 + $0x330] ss:$40 sps:$4 sm:$0xff]   ;;  %v7553_v14 = vld [vmem:[%s10854_s5 + $0x374] ss:$40 sps:$4 sm:$0xff]  }
 0x40f   : > { %4238 = vmatprep.subr.bf16.mxu0 %v7490_v28  ;;  %v7556_v28 = vld [vmem:[%s10854_s5 + $0x384] ss:$40 sps:$4 sm:$0xff]   ;;  %4090 = vmatprep.subr.bf16.mxu1 %v7553_v14 }
 0x410   : > { %3204 = vmatprep.mubr.bf16.mxu0 %v2839_v32  ;;  %4091 = vmatpush1.bf16.msra.mxu1 %v7551_v48  ;;  %v7559_v60 = vld [vmem:[%s10854_s5 + $0xc] ss:$40 sps:$4 sm:$0xff]  }
 0x411   : > { %3205 = vmatmul.mubr.bf16.gmra.mrb[240].mxu0 %v2838_v37  ;;  %v7554_v37 = vld [vmem:[%s10854_s5 + $0x380] ss:$40 sps:$4 sm:$0xff]   ;;  %v7562_v32 = vld [vmem:[%s10854_s5 + $0x24] ss:$40 sps:$4 sm:$0xff]   ;;  %4153 = vmatprep.subr.bf16.mxu1 %v7559_v60 }
 0x412   : > { %v2736_v18 = vpop.f32.mrb[216].mxu1  ;;  %v7610_v14 = vld [vmem:[%s10854_s5 + $0x2a4] ss:$40 sps:$4 sm:$0xff]  }
 0x413   : > { %v2738_v1 = vpop.f32.mrb[217].mxu1 }
 0x414   : > { %v2740_v31 = vpop.f32.mrb[218].mxu1 }
 0x415   : > { %v2841_v51 = vpack.c.bf16 %v2740_v31, %v2736_v18  ;;  %v2742_v42 = vpop.f32.mrb[219].mxu1 }
 0x416   : > { %v2842_v0 = vpack.c.bf16 %v2742_v42, %v2738_v1 }
 0x418   : > { %3214 = vmatprep.mubr.bf16.mxu0 %v2842_v0 }
 0x419   : > { %3215 = vmatmul.mubr.bf16.gmra.mrb[244].mxu0 %v2841_v51 }
 0x41a   : > { %v2779_v43 = vpop.f32.mrb[220].mxu1  ;;  %3257 = vmatprep.mubr.bf16.mxu0 %v11087_v36 }
 0x41b   : > { %v2781_v63 = vpop.f32.mrb[221].mxu1 }
 0x41c   : > { %v2782_v33 = vpop.f32.mrb[222].mxu1  ;;  %v7560_v63 = vld [vmem:[%s10854_s5 + $0x20] ss:$40 sps:$4 sm:$0xff]  }
 0x41d   : > { %v2828_v17 = vpack.c.bf16 %v2782_v33, %v2779_v43  ;;  %v2784_v34 = vpop.f32.mrb[223].mxu1  ;;  %v7557_v43 = vld [vmem:[%s10854_s5 + $0x8] ss:$40 sps:$4 sm:$0xff]   ;;  %v7565_v33 = vld [vmem:[%s10854_s5 + $0x5c] ss:$40 sps:$4 sm:$0xff]  }
 0x421   : > { %3258 = vmatmul.mubr.bf16.vlgmr.msra.gmra.mrb[224].mxu0 %v2828_v17  ;;  %v7568_v17 = vld [vmem:[%s10854_s5 + $0x74] ss:$40 sps:$4 sm:$0xff]  }
 0x422   : > { %v2787_v12 = vpop.f32.mrb[224].mxu1  ;;  %3267 = vmatprep.mubr.bf16.mxu0 %v11087_v36  ;;  %4239 = vmatpush1.bf16.msra.mxu0 %v7488_v13  ;;  %v7563_v13 = vld [vmem:[%s10854_s5 + $0x58] ss:$40 sps:$4 sm:$0xff]  }
 0x423   : > { %v2789_v4 = vpop.f32.mrb[225].mxu1  ;;  %4240 = vmatprep.subr.bf16.mxu0 %v7496_v25  ;;  %v7566_v25 = vld [vmem:[%s10854_s5 + $0x70] ss:$40 sps:$4 sm:$0xff]  }
 0x424   : > { %v2790_v24 = vpop.f32.mrb[226].mxu1  ;;  %v7574_v4 = vld [vmem:[%s10854_s5 + $0xc4] ss:$40 sps:$4 sm:$0xff]  }
 0x425   : > { %v2831_v56 = vpack.c.bf16 %v2790_v24, %v2787_v12  ;;  %v2792_v49 = vpop.f32.mrb[227].mxu1 }
 0x426   : > { %4241 = vmatpush1.bf16.msra.mxu0 %v7494_v23  ;;  %v7571_v23 = vld [vmem:[%s10854_s5 + $0xac] ss:$40 sps:$4 sm:$0xff]  }
 0x427   : > { %4242 = vmatprep.subr.bf16.mxu0 %v7502_v39 }
 0x429   : > { %3268 = vmatmul.mubr.bf16.gmra.mrb[228].mxu0 %v2831_v56 }
 0x42a   : > { %v2795_v57 = vpop.f32.mrb[228].mxu1  ;;  %3277 = vmatprep.mubr.bf16.mxu0 %v11087_v36  ;;  %4243 = vmatpush1.bf16.msra.mxu0 %v7500_v7  ;;  %v7569_v7 = vld [vmem:[%s10854_s5 + $0xa8] ss:$40 sps:$4 sm:$0xff]  }
 0x42b   : > { %v2797_v61 = vpop.f32.mrb[229].mxu1  ;;  %4244 = vmatprep.subr.bf16.mxu0 %v7508_v59  ;;  %v7572_v59 = vld [vmem:[%s10854_s5 + $0xc0] ss:$40 sps:$4 sm:$0xff]  }
 0x42c   : > { %v2798_v58 = vpop.f32.mrb[230].mxu1 }
 0x42d   : > { %v2834_v41 = vpack.c.bf16 %v2798_v58, %v2795_v57  ;;  %v2800_v3 = vpop.f32.mrb[231].mxu1  ;;  %v7577_v57 = vld [vmem:[%s10854_s5 + $0xfc] ss:$40 sps:$4 sm:$0xff]   ;;  %v7578_v58 = vld [vmem:[%s10854_s5 + $0x110] ss:$40 sps:$4 sm:$0xff]  }
 0x42e   : > { %4245 = vmatpush1.bf16.msra.mxu0 %v7506_v8  ;;  %v7580_v8 = vld [vmem:[%s10854_s5 + $0x114] ss:$40 sps:$4 sm:$0xff]  }
 0x42f   : > { %4246 = vmatprep.subr.bf16.mxu0 %v7514_v53  ;;  %v7575_v53 = vld [vmem:[%s10854_s5 + $0xf8] ss:$40 sps:$4 sm:$0xff]   ;;  %v7583_v3 = vld [vmem:[%s10854_s5 + $0x14c] ss:$40 sps:$4 sm:$0xff]  }
 0x431   : > { %3278 = vmatmul.mubr.bf16.gmra.mrb[232].mxu0 %v2834_v41 }
 0x432   : > { %v2803_v5 = vpop.f32.mrb[232].mxu1  ;;  %3287 = vmatprep.mubr.bf16.mxu0 %v11087_v36  ;;  %4247 = vmatpush1.bf16.msra.mxu0 %v7512_v29  ;;  %v7586_v29 = vld [vmem:[%s10854_s5 + $0x164] ss:$40 sps:$4 sm:$0xff]  }
 0x433   : > { %v2805_v50 = vpop.f32.mrb[233].mxu1  ;;  %4248 = vmatprep.subr.bf16.mxu0 %v7520_v21 }
 0x434   : > { %v2806_v9 = vpop.f32.mrb[234].mxu1 }
 0x435   : > { %v2837_v35 = vpack.c.bf16 %v2806_v9, %v2803_v5  ;;  %v2808_v40 = vpop.f32.mrb[235].mxu1  ;;  %v7584_v9 = vld [vmem:[%s10854_s5 + $0x160] ss:$40 sps:$4 sm:$0xff]  }
 0x436   : > { %4249 = vmatpush1.bf16.msra.mxu0 %v7518_v15  ;;  %v7592_v40 = vld [vmem:[%s10854_s5 + $0x1b4] ss:$40 sps:$4 sm:$0xff]  }
 0x437   : > { %4250 = vmatprep.subr.bf16.mxu0 %v7526_v44  ;;  %v7581_v44 = vld [vmem:[%s10854_s5 + $0x148] ss:$40 sps:$4 sm:$0xff]  }
 0x439   : > { %3288 = vmatmul.mubr.bf16.gmra.mrb[236].mxu0 %v2837_v35  ;;  %v7589_v35 = vld [vmem:[%s10854_s5 + $0x19c] ss:$40 sps:$4 sm:$0xff]  }
 0x43a   : > { %v2811_v30 = vpop.f32.mrb[236].mxu1  ;;  %3297 = vmatprep.mubr.bf16.mxu0 %v11087_v36  ;;  %4251 = vmatpush1.bf16.msra.mxu0 %v7524_v20 }
 0x43b   : > { %v2813_v26 = vpop.f32.mrb[237].mxu1  ;;  %4252 = vmatprep.subr.bf16.mxu0 %v7532_v38  ;;  %v7587_v38 = vld [vmem:[%s10854_s5 + $0x198] ss:$40 sps:$4 sm:$0xff]  }
 0x43c   : > { %v2814_v6 = vpop.f32.mrb[238].mxu1  ;;  %v7595_v26 = vld [vmem:[%s10854_s5 + $0x1ec] ss:$40 sps:$4 sm:$0xff]  }
 0x43d   : > { %v2840_v2 = vpack.c.bf16 %v2814_v6, %v2811_v30  ;;  %v2816_v10 = vpop.f32.mrb[239].mxu1  ;;  %v7590_v30 = vld [vmem:[%s10854_s5 + $0x1b0] ss:$40 sps:$4 sm:$0xff]  }
 0x43e   : > { %4253 = vmatpush1.bf16.msra.mxu0 %v7530_v52 }
 0x43f   : > { %4254 = vmatprep.subr.bf16.mxu0 %v7538_v11  ;;  %v7598_v11 = vld [vmem:[%s10854_s5 + $0x204] ss:$40 sps:$4 sm:$0xff]  }
 0x441   : > { %3298 = vmatmul.mubr.bf16.gmra.mrb[240].mxu0 %v2840_v2 }
 0x442   : > { %v2819_v47 = vpop.f32.mrb[240].mxu1  ;;  %3307 = vmatprep.mubr.bf16.mxu0 %v11087_v36  ;;  %4255 = vmatpush1.bf16.msra.mxu0 %v7536_v55 }
 0x443   : > { %v2821_v27 = vpop.f32.mrb[241].mxu1  ;;  %4256 = vmatprep.subr.bf16.mxu0 %v7544_v22  ;;  %v7593_v22 = vld [vmem:[%s10854_s5 + $0x1e8] ss:$40 sps:$4 sm:$0xff]  }
 0x444   : > { %v2822_v19 = vpop.f32.mrb[242].mxu1  ;;  %v7604_v27 = vld [vmem:[%s10854_s5 + $0x254] ss:$40 sps:$4 sm:$0xff]  }
 0x445   : > { %v2843_v45 = vpack.c.bf16 %v2822_v19, %v2819_v47  ;;  %v2824_v46 = vpop.f32.mrb[243].mxu1  ;;  %v7596_v47 = vld [vmem:[%s10854_s5 + $0x200] ss:$40 sps:$4 sm:$0xff]  }
 0x446   : > { %4257 = vmatpush1.bf16.msra.mxu0 %v7542_v16  ;;  %v7601_v16 = vld [vmem:[%s10854_s5 + $0x23c] ss:$40 sps:$4 sm:$0xff]   ;;  %v7599_v19 = vld [vmem:[%s10854_s5 + $0x238] ss:$40 sps:$4 sm:$0xff]  }
 0x447   : > { %4258 = vmatprep.subr.bf16.mxu0 %v7550_v54 }
 0x449   : > { %3308 = vmatmul.mubr.bf16.gmra.mrb[244].mxu0 %v2843_v45  ;;  %v7602_v45 = vld [vmem:[%s10854_s5 + $0x250] ss:$40 sps:$4 sm:$0xff]  }
 0x44a   : > { %4259 = vmatpush1.bf16.msra.mxu0 %v7548_v62  ;;  %v7607_v62 = vld [vmem:[%s10854_s5 + $0x28c] ss:$40 sps:$4 sm:$0xff]  }
 0x44b   : > { %4260 = vmatprep.subr.bf16.mxu0 %v7556_v28 }
 0x44e   : > { %4261 = vmatpush1.bf16.msra.mxu0 %v7554_v37 }
 0x44f   : > { %4408 = vmatprep.subr.bf16.mxu0 %v7562_v32  ;;  %v7605_v32 = vld [vmem:[%s10854_s5 + $0x288] ss:$40 sps:$4 sm:$0xff]  }
 0x4f4   : > { %v3259_v18 = vpop.f32.mrb[224].mxu0 }
 0x4f5   : > { %v3261_v1 = vpop.f32.mrb[225].mxu0 }
 0x4f6   : > { %v3263_v31 = vpop.f32.mrb[226].mxu0 }
 0x4f7   : > { %v9800_v51 = vpack.c.bf16 %v3263_v31, %v3259_v18  ;;  %v3265_v42 = vpop.f32.mrb[227].mxu0  ;;  %v7608_v18 = vld [vmem:[%s10854_s5 + $0x2a0] ss:$40 sps:$4 sm:$0xff]   ;;  %v7616_v31 = vld [vmem:[%s10854_s5 + $0x2f4] ss:$40 sps:$4 sm:$0xff]  }
 0x4f8   : > { %v9802_v0 = vpack.c.bf16 %v3265_v42, %v3261_v1  ;;  %v7613_v1 = vld [vmem:[%s10854_s5 + $0x2dc] ss:$40 sps:$4 sm:$0xff]  }
 0x4fa   : > { %6818 = vmatprep.mubr.msk.bf16.mxu1 %vm2633_vm2, %v9802_v0  ;;  %6830 = vmatprep.mubr.msk.bf16.mxu0 %vm2633_vm2, %v9802_v0 }
 0x4fb   : > { %4101 = vmatmul.mubr.bf16.vlgmr.msra.gmra.mrb[244].mxu1 %v9800_v51  ;;  %4271 = vmatmul.mubr.bf16.vlgmr.msra.gmra.mrb[248].mxu0 %v9800_v51 }
 0x4fc   : > { %v3269_v34 = vpop.f32.mrb[228].mxu0  ;;  %4154 = vmatpush1.bf16.msra.mxu1 %v7557_v43  ;;  %4409 = vmatpush1.bf16.msra.mxu0 %v7560_v63  ;;  %v7611_v43 = vld [vmem:[%s10854_s5 + $0x2d8] ss:$40 sps:$4 sm:$0xff]  }
 0x4fd   : > { %v3271_v12 = vpop.f32.mrb[229].mxu0  ;;  %4155 = vmatprep.subr.bf16.mxu1 %v7565_v33  ;;  %4410 = vmatprep.subr.bf16.mxu0 %v7568_v17  ;;  %v7614_v63 = vld [vmem:[%s10854_s5 + $0x2f0] ss:$40 sps:$4 sm:$0xff]   ;;  %v7619_v17 = vld [vmem:[%s10854_s5 + $0x32c] ss:$40 sps:$4 sm:$0xff]  }
 0x4fe   : > { %v3273_v39 = vpop.f32.mrb[230].mxu0 }
 0x4ff   : > { %v9834_v24 = vpack.c.bf16 %v3273_v39, %v3269_v34  ;;  %v3275_v56 = vpop.f32.mrb[231].mxu0  ;;  %v7622_v34 = vld [vmem:[%s10854_s5 + $0x344] ss:$40 sps:$4 sm:$0xff]   ;;  %v7620_v39 = vld [vmem:[%s10854_s5 + $0x340] ss:$40 sps:$4 sm:$0xff]  }
 0x500   : > { %v9836_v49 = vpack.c.bf16 %v3275_v56, %v3271_v12  ;;  %4156 = vmatpush1.bf16.msra.mxu1 %v7563_v13  ;;  %4411 = vmatpush1.bf16.msra.mxu0 %v7566_v25  ;;  %v7625_v56 = vld [vmem:[%s10854_s5 + $0x37c] ss:$40 sps:$4 sm:$0xff]  }
 0x501   : > { %4157 = vmatprep.subr.bf16.mxu1 %v7571_v23  ;;  %4412 = vmatprep.subr.bf16.mxu0 %v7574_v4  ;;  %v7617_v4 = vld [vmem:[%s10854_s5 + $0x328] ss:$40 sps:$4 sm:$0xff]  }
 0x502   : > { %6819 = vmatprep.mubr.msk.bf16.mxu1 %vm2633_vm2, %v9836_v49  ;;  %6831 = vmatprep.mubr.msk.bf16.mxu0 %vm2633_vm2, %v9836_v49 }
 0x503   : > { %4111 = vmatmul.mubr.bf16.gmra.mrb[248].mxu1 %v9834_v24  ;;  %4277 = vmatmul.mubr.bf16.gmra.mrb[252].mxu0 %v9834_v24 }
 0x504   : > { %v3279_v61 = vpop.f32.mrb[232].mxu0  ;;  %4158 = vmatpush1.bf16.msra.mxu1 %v7569_v7  ;;  %4413 = vmatpush1.bf16.msra.mxu0 %v7572_v59  ;;  %v7628_v7 = vld [vmem:[%s10854_s5 + $0x394] ss:$40 sps:$4 sm:$0xff]   ;;  %v7623_v59 = vld [vmem:[%s10854_s5 + $0x378] ss:$40 sps:$4 sm:$0xff]  }
 0x505   : > { %v3281_v41 = vpop.f32.mrb[233].mxu0  ;;  %4159 = vmatprep.subr.bf16.mxu1 %v7577_v57  ;;  %4414 = vmatprep.subr.bf16.mxu0 %v7580_v8  ;;  %v7626_v57 = vld [vmem:[%s10854_s5 + $0x390] ss:$40 sps:$4 sm:$0xff]   ;;  %v7631_v8 = vld [vmem:[%s10854_s5 + $0x1c] ss:$40 sps:$4 sm:$0xff]  }
 0x506   : > { %v3283_v21 = vpop.f32.mrb[234].mxu0 }
 0x507   : > { %v9868_v5 = vpack.c.bf16 %v3283_v21, %v3279_v61  ;;  %v3285_v15 = vpop.f32.mrb[235].mxu0  ;;  %v7629_v61 = vld [vmem:[%s10854_s5 + $0x18] ss:$40 sps:$4 sm:$0xff]   ;;  %v7638_v21 = vld [vmem:[%s10854_s5 + $0x108] ss:$40 sps:$4 sm:$0xff]  }
 0x508   : > { %v9870_v50 = vpack.c.bf16 %v3285_v15, %v3281_v41  ;;  %4160 = vmatpush1.bf16.msra.mxu1 %v7575_v53  ;;  %4415 = vmatpush1.bf16.msra.mxu0 %v7578_v58  ;;  %v7634_v53 = vld [vmem:[%s10854_s5 + $0x6c] ss:$40 sps:$4 sm:$0xff]   ;;  %v7632_v58 = vld [vmem:[%s10854_s5 + $0x68] ss:$40 sps:$4 sm:$0xff]   ;;  %v7637_v41 = vld [vmem:[%s10854_s5 + $0xbc] ss:$40 sps:$4 sm:$0xff]  }
 0x509   : > { %4161 = vmatprep.subr.bf16.mxu1 %v7583_v3  ;;  %4416 = vmatprep.subr.bf16.mxu0 %v7586_v29  ;;  %v7635_v3 = vld [vmem:[%s10854_s5 + $0xb8] ss:$40 sps:$4 sm:$0xff]   ;;  %v7640_v29 = vld [vmem:[%s10854_s5 + $0x10c] ss:$40 sps:$4 sm:$0xff]   ;;  %v7643_v15 = vld [vmem:[%s10854_s5 + $0x15c] ss:$40 sps:$4 sm:$0xff]  }
 0x50a   : > { %6820 = vmatprep.mubr.msk.bf16.mxu1 %vm2633_vm2, %v9870_v50  ;;  %6832 = vmatprep.mubr.msk.bf16.mxu0 %vm2633_vm2, %v9870_v50 }
 0x50b   : > { %4121 = vmatmul.mubr.bf16.gmra.mrb[252].mxu1 %v9868_v5  ;;  %4287 = vmatmul.mubr.bf16.gmra.mrb[0].mxu0 %v9868_v5 }
 0x50c   : > { %v3289_v20 = vpop.f32.mrb[236].mxu0  ;;  %4162 = vmatpush1.bf16.msra.mxu1 %v7581_v44  ;;  %4417 = vmatpush1.bf16.msra.mxu0 %v7584_v9  ;;  %v7641_v44 = vld [vmem:[%s10854_s5 + $0x158] ss:$40 sps:$4 sm:$0xff]   ;;  %v7646_v9 = vld [vmem:[%s10854_s5 + $0x1ac] ss:$40 sps:$4 sm:$0xff]  }
 0x50d   : > { %v3291_v52 = vpop.f32.mrb[237].mxu0  ;;  %4163 = vmatprep.subr.bf16.mxu1 %v7589_v35  ;;  %4418 = vmatprep.subr.bf16.mxu0 %v7592_v40  ;;  %v7644_v35 = vld [vmem:[%s10854_s5 + $0x1a8] ss:$40 sps:$4 sm:$0xff]   ;;  %v7649_v40 = vld [vmem:[%s10854_s5 + $0x1fc] ss:$40 sps:$4 sm:$0xff]  }
 0x50e   : > { %v3293_v6 = vpop.f32.mrb[238].mxu0 }
 0x50f   : > { %v9902_v2 = vpack.c.bf16 %v3293_v6, %v3289_v20  ;;  %v3295_v10 = vpop.f32.mrb[239].mxu0  ;;  %v7647_v20 = vld [vmem:[%s10854_s5 + $0x1f8] ss:$40 sps:$4 sm:$0xff]   ;;  %v7656_v6 = vld [vmem:[%s10854_s5 + $0x2e8] ss:$40 sps:$4 sm:$0xff]  }
 0x510   : > { %v9904_v55 = vpack.c.bf16 %v3295_v10, %v3291_v52  ;;  %4164 = vmatpush1.bf16.msra.mxu1 %v7587_v38  ;;  %4419 = vmatpush1.bf16.msra.mxu0 %v7590_v30  ;;  %v7652_v38 = vld [vmem:[%s10854_s5 + $0x24c] ss:$40 sps:$4 sm:$0xff]   ;;  %v7650_v30 = vld [vmem:[%s10854_s5 + $0x248] ss:$40 sps:$4 sm:$0xff]   ;;  %v7655_v52 = vld [vmem:[%s10854_s5 + $0x29c] ss:$40 sps:$4 sm:$0xff]  }
 0x511   : > { %4165 = vmatprep.subr.bf16.mxu1 %v7595_v26  ;;  %4420 = vmatprep.subr.bf16.mxu0 %v7598_v11  ;;  %v7653_v26 = vld [vmem:[%s10854_s5 + $0x298] ss:$40 sps:$4 sm:$0xff]   ;;  %v7658_v11 = vld [vmem:[%s10854_s5 + $0x2ec] ss:$40 sps:$4 sm:$0xff]   ;;  %v7661_v10 = vld [vmem:[%s10854_s5 + $0x33c] ss:$40 sps:$4 sm:$0xff]  }
 0x512   : > { %6821 = vmatprep.mubr.msk.bf16.mxu1 %vm2633_vm2, %v9904_v55  ;;  %6833 = vmatprep.mubr.msk.bf16.mxu0 %vm2633_vm2, %v9904_v55 }
 0x513   : > { %4131 = vmatmul.mubr.bf16.gmra.mrb[0].mxu1 %v9902_v2  ;;  %4297 = vmatmul.mubr.bf16.gmra.mrb[4].mxu0 %v9902_v2 }
 0x514   : > { %v3299_v54 = vpop.f32.mrb[240].mxu0  ;;  %4166 = vmatpush1.bf16.msra.mxu1 %v7593_v22  ;;  %4421 = vmatpush1.bf16.msra.mxu0 %v7596_v47  ;;  %v7659_v22 = vld [vmem:[%s10854_s5 + $0x338] ss:$40 sps:$4 sm:$0xff]   ;;  %v7664_v47 = vld [vmem:[%s10854_s5 + $0x38c] ss:$40 sps:$4 sm:$0xff]  }
 0x515   : > { %v3301_v46 = vpop.f32.mrb[241].mxu0  ;;  %4167 = vmatprep.subr.bf16.mxu1 %v7601_v16  ;;  %4422 = vmatprep.subr.bf16.mxu0 %v7604_v27  ;;  %v7662_v16 = vld [vmem:[%s10854_s5 + $0x388] ss:$40 sps:$4 sm:$0xff]  }
 0x516   : > { %v3303_v28 = vpop.f32.mrb[242].mxu0 }
 0x517   : > { %v9936_v48 = vpack.c.bf16 %v3303_v28, %v3299_v54  ;;  %v3305_v37 = vpop.f32.mrb[243].mxu0 }
 0x518   : > { %v9938_v60 = vpack.c.bf16 %v3305_v37, %v3301_v46  ;;  %4168 = vmatpush1.bf16.msra.mxu1 %v7599_v19  ;;  %4423 = vmatpush1.bf16.msra.mxu0 %v7602_v45 }
 0x519   : > { %4169 = vmatprep.subr.bf16.mxu1 %v7607_v62  ;;  %4424 = vmatprep.subr.bf16.mxu0 %v7610_v14 }
 0x51a   : > { %6822 = vmatprep.mubr.msk.bf16.mxu1 %vm2633_vm2, %v9938_v60  ;;  %6834 = vmatprep.mubr.msk.bf16.mxu0 %vm2633_vm2, %v9938_v60 }
 0x51b   : > { %4141 = vmatmul.mubr.bf16.gmra.mrb[4].mxu1 %v9936_v48  ;;  %4307 = vmatmul.mubr.bf16.gmra.mrb[8].mxu0 %v9936_v48 }
 0x51c   : > { %v3309_v42 = vpop.f32.mrb[244].mxu0  ;;  %4170 = vmatpush1.bf16.msra.mxu1 %v7605_v32  ;;  %4425 = vmatpush1.bf16.msra.mxu0 %v7608_v18 }
 0x51d   : > { %v3311_v33 = vpop.f32.mrb[245].mxu0  ;;  %4171 = vmatprep.subr.bf16.mxu1 %v7613_v1  ;;  %4426 = vmatprep.subr.bf16.mxu0 %v7616_v31 }
 0x51e   : > { %v3313_v13 = vpop.f32.mrb[246].mxu0 }
 0x51f   : > { %v9970_v25 = vpack.c.bf16 %v3313_v13, %v3309_v42  ;;  %v3315_v12 = vpop.f32.mrb[247].mxu0 }
 0x520   : > { %v9972_v23 = vpack.c.bf16 %v3315_v12, %v3311_v33  ;;  %4172 = vmatpush1.bf16.msra.mxu1 %v7611_v43  ;;  %4427 = vmatpush1.bf16.msra.mxu0 %v7614_v63 }
 0x521   : > { %4173 = vmatprep.subr.bf16.mxu1 %v7619_v17  ;;  %4428 = vmatprep.subr.bf16.mxu0 %v7622_v34 }
 0x522   : > { %6823 = vmatprep.mubr.msk.bf16.mxu1 %vm2633_vm2, %v9972_v23  ;;  %6835 = vmatprep.mubr.msk.bf16.mxu0 %vm2633_vm2, %v9972_v23 }
 0x523   : > { %4147 = vmatmul.mubr.bf16.gmra.mrb[8].mxu1 %v9970_v25  ;;  %4317 = vmatmul.mubr.bf16.gmra.mrb[12].mxu0 %v9970_v25 }
 0x524   : > { %4174 = vmatpush1.bf16.msra.mxu1 %v7617_v4  ;;  %6824 = vmatprep.mubr.msk.bf16.mxu1 %vm2633_vm2, %v9802_v0 }
 0x525   : > { %4429 = vmatpush1.bf16.msra.mxu0 %v7620_v39  ;;  %6842 = vmatprep.mubr.msk.bf16.mxu0 %vm2633_vm2, %v9802_v0 }
 0x526   : > { %4175 = vmatprep.subr.bf16.mxu1 %v7625_v56  ;;  %4430 = vmatprep.subr.bf16.mxu0 %v7628_v7  ;;  %v7667_v7 = vld [vmem:[%s10857_s8 + $0x40] sm:$0xff]  }
 0x528   : > { %4176 = vmatpush1.bf16.msra.mxu1 %v7623_v59  ;;  %v7668_v59 = vld [vmem:[%s10857_s8] sm:$0xff]  }
 0x529   : > { %4431 = vmatpush1.bf16.msra.mxu0 %v7626_v57  ;;  %4323 = vmatprep.subr.bf16.mxu1 %v7631_v8  ;;  %v7669_v57 = vld [vmem:[%s10857_s8 + $0x48] sm:$0xff]  }
 0x52a   : > { %7145 = vmatprep.subr.bf16.mxu0 %v7667_v7  ;;  %v7678_v7 = vld [vmem:[%s10857_s8 + $0x28] sm:$0xff]  }
 0x52b   : > { %4186 = vmatmul.mubr.bf16.vlgmr.msra.gmra.mrb[12].mxu1 %v9800_v51 }
 0x52c   : > { %4441 = vmatmul.mubr.bf16.vlgmr.msra.gmra.mrb[16].mxu0 %v9800_v51  ;;  %6825 = vmatprep.mubr.msk.bf16.mxu1 %vm2633_vm2, %v9836_v49 }
 0x52d   : > { %4324 = vmatpush1.bf16.msra.mxu1 %v7629_v61  ;;  %6843 = vmatprep.mubr.msk.bf16.mxu0 %vm2633_vm2, %v9836_v49 }
 0x52e   : > { %4325 = vmatprep.subr.bf16.mxu1 %v7634_v53  ;;  %7146 = vmatpush3.bf16.msra.mxu0 %v7668_v59 }
 0x52f   : > { %7147 = vmatprep.subr.bf16.mxu0 %v7669_v57  ;;  %v7679_v57 = vld [vmem:[%s10857_s8 + $0x70] sm:$0xff]  }
 0x531   : > { %4326 = vmatpush1.bf16.msra.mxu1 %v7632_v58 }
 0x532   : > { %4327 = vmatprep.subr.bf16.mxu1 %v7637_v41  ;;  %v7670_v41 = vld [vmem:[%s10857_s8 + $0x8] sm:$0xff]  }
 0x533   : > { %4194 = vmatmul.mubr.bf16.gmra.mrb[16].mxu1 %v9834_v24  ;;  %7148 = vmatpush3.bf16.msra.mxu0 %v7670_v41 }
 0x534   : > { %4447 = vmatmul.mubr.bf16.gmra.mrb[20].mxu0 %v9834_v24  ;;  %6826 = vmatprep.mubr.msk.bf16.mxu1 %vm2633_vm2, %v9870_v50 }
 0x535   : > { %4328 = vmatpush1.bf16.msra.mxu1 %v7635_v3  ;;  %6844 = vmatprep.mubr.msk.bf16.mxu0 %vm2633_vm2, %v9870_v50  ;;  %v7671_v3 = vld [vmem:[%s10857_s8 + $0x50] sm:$0xff]  }
 0x536   : > { %4329 = vmatprep.subr.bf16.mxu1 %v7640_v29  ;;  %7149 = vmatprep.subr.bf16.mxu0 %v7671_v3 }
 0x539   : > { %4330 = vmatpush1.bf16.msra.mxu1 %v7638_v21 }
 0x53a   : > { %4331 = vmatprep.subr.bf16.mxu1 %v7643_v15  ;;  %v7672_v15 = vld [vmem:[%s10857_s8 + $0x10] sm:$0xff]  }
 0x53b   : > { %4204 = vmatmul.mubr.bf16.gmra.mrb[20].mxu1 %v9868_v5  ;;  %7150 = vmatpush3.bf16.msra.mxu0 %v7672_v15 }
 0x53c   : > { %4453 = vmatmul.mubr.bf16.gmra.mrb[24].mxu0 %v9868_v5  ;;  %6827 = vmatprep.mubr.msk.bf16.mxu1 %vm2633_vm2, %v9904_v55 }
 0x53d   : > { %4332 = vmatpush1.bf16.msra.mxu1 %v7641_v44  ;;  %6845 = vmatprep.mubr.msk.bf16.mxu0 %vm2633_vm2, %v9904_v55 }
 0x53e   : > { %4333 = vmatprep.subr.bf16.mxu1 %v7646_v9 }
 0x541   : > { %4334 = vmatpush1.bf16.msra.mxu1 %v7644_v35  ;;  %v7673_v35 = vld [vmem:[%s10857_s8 + $0x58] sm:$0xff]  }
 0x542   : > { %4335 = vmatprep.subr.bf16.mxu1 %v7649_v40  ;;  %7151 = vmatprep.subr.bf16.mxu0 %v7673_v35 }
 0x543   : > { %4214 = vmatmul.mubr.bf16.gmra.mrb[24].mxu1 %v9902_v2 }
 0x544   : > { %4463 = vmatmul.mubr.bf16.gmra.mrb[28].mxu0 %v9902_v2  ;;  %6828 = vmatprep.mubr.msk.bf16.mxu1 %vm2633_vm2, %v9938_v60 }
 0x545   : > { %4336 = vmatpush1.bf16.msra.mxu1 %v7647_v20  ;;  %6846 = vmatprep.mubr.msk.bf16.mxu0 %vm2633_vm2, %v9938_v60 }
 0x546   : > { %4337 = vmatprep.subr.bf16.mxu1 %v7652_v38 }
 0x549   : > { %4338 = vmatpush1.bf16.msra.mxu1 %v7650_v30 }
 0x54a   : > { %4339 = vmatprep.subr.bf16.mxu1 %v7655_v52  ;;  %v7674_v52 = vld [vmem:[%s10857_s8 + $0x18] sm:$0xff]  }
 0x54b   : > { %4224 = vmatmul.mubr.bf16.gmra.mrb[28].mxu1 %v9936_v48  ;;  %7152 = vmatpush3.bf16.msra.mxu0 %v7674_v52 }
 0x54c   : > { %4473 = vmatmul.mubr.bf16.gmra.mrb[32].mxu0 %v9936_v48  ;;  %6829 = vmatprep.mubr.msk.bf16.mxu1 %vm2633_vm2, %v9972_v23 }
 0x54d   : > { %4340 = vmatpush1.bf16.msra.mxu1 %v7653_v26  ;;  %6847 = vmatprep.mubr.msk.bf16.mxu0 %vm2633_vm2, %v9972_v23  ;;  %v7675_v26 = vld [vmem:[%s10857_s8 + $0x60] sm:$0xff]  }
 0x54e   : > { %4341 = vmatprep.subr.bf16.mxu1 %v7658_v11  ;;  %7153 = vmatprep.subr.bf16.mxu0 %v7675_v26 }
 0x551   : > { %4342 = vmatpush1.bf16.msra.mxu1 %v7656_v6  ;;  %v7676_v6 = vld [vmem:[%s10857_s8 + $0x20] sm:$0xff]  }
 0x552   : > { %4343 = vmatprep.subr.bf16.mxu1 %v7661_v10  ;;  %7154 = vmatpush3.bf16.msra.mxu0 %v7676_v6 }
 0x553   : > { %4232 = vmatmul.mubr.bf16.gmra.mrb[32].mxu1 %v9970_v25 }
 0x554   : > { %4483 = vmatmul.mubr.bf16.gmra.mrb[36].mxu0 %v9970_v25  ;;  %6836 = vmatprep.mubr.msk.bf16.mxu1 %vm2633_vm2, %v9802_v0 }
 0x555   : > { %4344 = vmatpush1.bf16.msra.mxu1 %v7659_v22 }
 0x556   : > { %4345 = vmatprep.subr.bf16.mxu1 %v7664_v47  ;;  %v7677_v47 = vld [vmem:[%s10857_s8 + $0x68] sm:$0xff]  }
 0x557   : > { %7155 = vmatprep.subr.bf16.mxu0 %v7677_v47 }
 0x558   : > { %7156 = vmatpush3.bf16.msra.mxu0 %v7678_v7 }
 0x559   : > { %4346 = vmatpush1.bf16.msra.mxu1 %v7662_v16  ;;  %7157 = vmatprep.subr.bf16.mxu0 %v7679_v57 }
 0x55c   : > { %4356 = vmatmul.mubr.bf16.vlgmr.msra.gmra.mrb[36].mxu1 %v9800_v51 }
 0x55d   : > { %6837 = vmatprep.mubr.msk.bf16.mxu1 %vm2633_vm2, %v9836_v49 }
 0x564   : > { %4362 = vmatmul.mubr.bf16.gmra.mrb[40].mxu1 %v9834_v24 }
 0x565   : > { %6838 = vmatprep.mubr.msk.bf16.mxu1 %vm2633_vm2, %v9870_v50 }
 0x56c   : > { %4370 = vmatmul.mubr.bf16.gmra.mrb[44].mxu1 %v9868_v5 }
 0x56d   : > { %6839 = vmatprep.mubr.msk.bf16.mxu1 %vm2633_vm2, %v9904_v55 }
 0x574   : > { %4380 = vmatmul.mubr.bf16.gmra.mrb[48].mxu1 %v9902_v2 }
 0x575   : > { %6840 = vmatprep.mubr.msk.bf16.mxu1 %vm2633_vm2, %v9938_v60 }
 0x57c   : > { %4390 = vmatmul.mubr.bf16.gmra.mrb[52].mxu1 %v9936_v48 }
 0x57d   : > { %6841 = vmatprep.mubr.msk.bf16.mxu1 %vm2633_vm2, %v9972_v23 }
 0x584   : > { %4400 = vmatmul.mubr.bf16.gmra.mrb[56].mxu1 %v9970_v25 }
 0x585   : > { %4661 = vmatprep.mubr.bf16.mxu1 %v11087_v36 }
 0x5ce   : > { %v10125_v51 = vpop.f32.mrb[244].mxu1  ;;  %v4272_v0 = vpop.f32.mrb[248].mxu0 }
 0x5cf   : > { %v10127_v24 = vpop.f32.mrb[245].mxu1  ;;  %v4273_v49 = vpop.f32.mrb[249].mxu0 }
 0x5d0   : > { %v10129_v5 = vpop.f32.mrb[246].mxu1  ;;  %v4274_v50 = vpop.f32.mrb[250].mxu0 }
 0x5d1   : > { %v10131_v2 = vpop.f32.mrb[247].mxu1  ;;  %v4275_v55 = vpop.f32.mrb[251].mxu0 }
 0x5d6   : > { %v10133_v27 = vpop.f32.mrb[248].mxu1  ;;  %v10135_v54 = vpop.f32.mrb[252].mxu0 }
 0x5d7   : > { %v10137_v19 = vpop.f32.mrb[249].mxu1  ;;  %v10139_v45 = vpop.f32.mrb[253].mxu0 }
 0x5d8   : > { %v10141_v46 = vpop.f32.mrb[250].mxu1  ;;  %v10143_v62 = vpop.f32.mrb[254].mxu0 }
 0x5d9   : > { %v10145_v14 = vpop.f32.mrb[251].mxu1  ;;  %v10147_v28 = vpop.f32.mrb[255].mxu0 }
 0x5de   : > { %v10149_v48 = vpop.f32.mrb[252].mxu1  ;;  %v10151_v37 = vpop.f32.mrb[0].mxu0 }
 0x5df   : > { %v10153_v60 = vpop.f32.mrb[253].mxu1  ;;  %v10155_v32 = vpop.f32.mrb[1].mxu0 }
 0x5e0   : > { %v10157_v18 = vpop.f32.mrb[254].mxu1  ;;  %v10159_v1 = vpop.f32.mrb[2].mxu0 }
 0x5e1   : > { %v10161_v31 = vpop.f32.mrb[255].mxu1  ;;  %v10163_v42 = vpop.f32.mrb[3].mxu0 }
 0x5e6   : > { %v10165_v43 = vpop.f32.mrb[0].mxu1  ;;  %v10167_v63 = vpop.f32.mrb[4].mxu0 }
 0x5e7   : > { %v10169_v33 = vpop.f32.mrb[1].mxu1  ;;  %v10171_v17 = vpop.f32.mrb[5].mxu0 }
 0x5e8   : > { %v10173_v34 = vpop.f32.mrb[2].mxu1  ;;  %v10175_v13 = vpop.f32.mrb[6].mxu0 }
 0x5e9   : > { %v10177_v25 = vpop.f32.mrb[3].mxu1  ;;  %v10179_v12 = vpop.f32.mrb[7].mxu0 }
 0x5ee   : > { %v4142_v23 = vpop.f32.mrb[4].mxu1  ;;  %v10181_v4 = vpop.f32.mrb[8].mxu0 }
 0x5ef   : > { %v4143_v39 = vpop.f32.mrb[5].mxu1  ;;  %v10183_v56 = vpop.f32.mrb[9].mxu0 }
 0x5f0   : > { %v4144_v8 = vpop.f32.mrb[6].mxu1  ;;  %v10194_v61 = vpop.f32.mrb[10].mxu0 }
 0x5f1   : > { %v4145_v53 = vpop.f32.mrb[7].mxu1  ;;  %v10196_v58 = vpop.f32.mrb[11].mxu0 }
 0x5f6   : > { %v4148_v29 = vpop.f32.mrb[8].mxu1  ;;  %v4318_v21 = vpop.f32.mrb[12].mxu0 }
 0x5f7   : > { %v4149_v44 = vpop.f32.mrb[9].mxu1  ;;  %v4319_v9 = vpop.f32.mrb[13].mxu0 }
 0x5f8   : > { %v4150_v40 = vpop.f32.mrb[10].mxu1  ;;  %v4320_v20 = vpop.f32.mrb[14].mxu0 }
 0x5f9   : > { %v4151_v38 = vpop.f32.mrb[11].mxu1  ;;  %v4321_v30 = vpop.f32.mrb[15].mxu0 }
 0x5fe   : > { %v4187_v11 = vpop.f32.mrb[12].mxu1 }
 0x5ff   : > { %v4442_v10 = vpop.f32.mrb[16].mxu0  ;;  %v4188_v22 = vpop.f32.mrb[13].mxu1 }
 0x600   : > { %v4443_v16 = vpop.f32.mrb[17].mxu0  ;;  %v4189_v0 = vpop.f32.mrb[14].mxu1 }
 0x601   : > { %v4493_v49 = vadd.f32 %v4189_v0, %v10125_v51  ;;  %v4444_v50 = vpop.f32.mrb[18].mxu0  ;;  %v4191_v55 = vpop.f32.mrb[15].mxu1 }
 0x602   : > { %v4494_v23 = vadd.f32 %v4191_v55, %v10127_v24  ;;  %v4445_v39 = vpop.f32.mrb[19].mxu0 }
 0x603   : > { %v10228_v59 = vadd.f32 %v4493_v49, %v10135_v54 }
 0x604   : > { %v10234_v51 = vadd.f32 %v4494_v23, %v10139_v45 }
 0x606   : > { %v4195_v8 = vpop.f32.mrb[16].mxu1 }
 0x607   : > { %v4495_v24 = vadd.f32 %v4195_v8, %v10129_v5  ;;  %v4448_v53 = vpop.f32.mrb[20].mxu0  ;;  %v4197_v41 = vpop.f32.mrb[17].mxu1 }
 0x608   : > { %v4496_v3 = vadd.f32 %v4197_v41, %v10131_v2  ;;  %v4449_v29 = vpop.f32.mrb[21].mxu0  ;;  %v4199_v54 = vpop.f32.mrb[18].mxu1 }
 0x609   : > { %v4497_v21 = vadd.f32 %v4199_v54, %v10133_v27  ;;  %v4450_v15 = vpop.f32.mrb[22].mxu0  ;;  %v4201_v44 = vpop.f32.mrb[19].mxu1  ;;  %v10240_v9 = vadd.f32 %v4495_v24, %v10143_v62 }
 0x60a   : > { %v4498_v45 = vadd.f32 %v4201_v44, %v10137_v19  ;;  %v4451_v35 = vpop.f32.mrb[23].mxu0  ;;  %v10244_v40 = vadd.f32 %v4496_v3, %v10147_v28 }
 0x60b   : > { %v10247_v5 = vadd.f32 %v4497_v21, %v10151_v37 }
 0x60c   : > { %v10250_v2 = vadd.f32 %v4498_v45, %v10155_v32 }
 0x60e   : > { %v4205_v20 = vpop.f32.mrb[20].mxu1 }
 0x60f   : > { %v4499_v27 = vadd.f32 %v4205_v20, %v10141_v46  ;;  %v4454_v38 = vpop.f32.mrb[24].mxu0  ;;  %v4207_v30 = vpop.f32.mrb[21].mxu1 }
 0x610   : > { %v4500_v62 = vadd.f32 %v4207_v30, %v10145_v14  ;;  %v4456_v52 = vpop.f32.mrb[25].mxu0  ;;  %v4209_v26 = vpop.f32.mrb[22].mxu1 }
 0x611   : > { %v4501_v19 = vadd.f32 %v4209_v26, %v10149_v48  ;;  %v10255_v11 = vpop.f32.mrb[26].mxu0  ;;  %v4211_v28 = vpop.f32.mrb[23].mxu1  ;;  %v10258_v37 = vadd.f32 %v4499_v27, %v10159_v1  ;;  %v4557_v26 = vld [vmem:[%s10855_s6] sm:$0x3] }
 0x612   : > { %v4502_v32 = vadd.f32 %v4211_v28, %v10153_v60  ;;  %v10261_v6 = vpop.f32.mrb[27].mxu0  ;;  %v10264_v46 = vadd.f32 %v4500_v62, %v10163_v42 }
 0x613   : > { %v10267_v10 = vadd.f32 %v4501_v19, %v10167_v63 }
 0x614   : > { %v10270_v14 = vadd.f32 %v4502_v32, %v10171_v17 }
 0x616   : > { %v4215_v48 = vpop.f32.mrb[24].mxu1 }
 0x617   : > { %v4503_v22 = vadd.f32 %v4215_v48, %v10157_v18  ;;  %v4464_v47 = vpop.f32.mrb[28].mxu0  ;;  %v4217_v16 = vpop.f32.mrb[25].mxu1  ;;  %v11089_v48 = vld [vmem:[#allocation36_spill] sm:$0xff] }
 0x618   : > { %v4504_v1 = vadd.f32 %v4217_v16, %v10161_v31  ;;  %v4466_v0 = vpop.f32.mrb[29].mxu0  ;;  %v4219_v60 = vpop.f32.mrb[26].mxu1  ;;  %v11090_v16 = vld [vmem:[#allocation31_spill] sm:$0xff] }
 0x619   : > { %v4505_v49 = vadd.f32 %v4219_v60, %v10165_v43  ;;  %v10275_v50 = vpop.f32.mrb[30].mxu0  ;;  %v4221_v42 = vpop.f32.mrb[27].mxu1  ;;  %v10278_v63 = vadd.f32 %v4503_v22, %v10175_v13  ;;  %v10322_v22 = vrot.slane %v4557_v26, %v11089_v48 }
 0x61a   : > { %v4506_v17 = vadd.f32 %v4221_v42, %v10169_v33  ;;  %v10281_v55 = vpop.f32.mrb[31].mxu0  ;;  %v10284_v18 = vadd.f32 %v4504_v1, %v10179_v12  ;;  %v10325_v1 = vrot.slane %v4557_v26, %v11090_v16 }
 0x61b   : > { %v10287_v23 = vadd.f32 %v4505_v49, %v10181_v4 }
 0x61c   : > { %v10290_v31 = vadd.f32 %v4506_v17, %v10183_v56 }
 0x61e   : > { %v4225_v43 = vpop.f32.mrb[28].mxu1 }
 0x61f   : > { %v4507_v39 = vadd.f32 %v4225_v43, %v10173_v34  ;;  %v10293_v7 = vpop.f32.mrb[32].mxu0  ;;  %v4227_v13 = vpop.f32.mrb[29].mxu1 }
 0x620   : > { %v4508_v57 = vadd.f32 %v4227_v13, %v10177_v25  ;;  %v10296_v33 = vpop.f32.mrb[33].mxu0  ;;  %v4229_v8 = vpop.f32.mrb[30].mxu1 }
 0x621   : > { %v10298_v24 = vpop.f32.mrb[34].mxu0  ;;  %v4230_v12 = vpop.f32.mrb[31].mxu1  ;;  %v10301_v4 = vadd.f32 %v4507_v39, %v10194_v61 }
 0x622   : > { %v10303_v53 = vpop.f32.mrb[35].mxu0  ;;  %v10306_v56 = vadd.f32 %v4508_v57, %v10196_v58 }
 0x626   : > { %v4233_v34 = vpop.f32.mrb[32].mxu1 }
 0x627   : > { %v10308_v41 = vpop.f32.mrb[36].mxu0  ;;  %v4234_v3 = vpop.f32.mrb[33].mxu1 }
 0x628   : > { %v10310_v29 = vpop.f32.mrb[37].mxu0  ;;  %v4235_v25 = vpop.f32.mrb[34].mxu1 }
 0x629   : > { %v10312_v54 = vpop.f32.mrb[38].mxu0  ;;  %v4236_v21 = vpop.f32.mrb[35].mxu1 }
 0x62a   : > { %v10314_v15 = vpop.f32.mrb[39].mxu0 }
 0x62f   : > { %v4357_v44 = vpop.f32.mrb[36].mxu1 }
 0x630   : > { %v4358_v61 = vpop.f32.mrb[37].mxu1 }
 0x631   : > { %v4359_v45 = vpop.f32.mrb[38].mxu1 }
 0x632   : > { %v4360_v35 = vpop.f32.mrb[39].mxu1 }
 0x637   : > { %v4363_v20 = vpop.f32.mrb[40].mxu1 }
 0x638   : > { %v4364_v27 = vpop.f32.mrb[41].mxu1 }
 0x639   : > { %v4365_v58 = vpop.f32.mrb[42].mxu1 }
 0x63a   : > { %v4525_v30 = vadd.f32 %v10228_v59, %v4365_v58  ;;  %v4367_v62 = vpop.f32.mrb[43].mxu1 }
 0x63b   : > { %v4526_v19 = vadd.f32 %v10234_v51, %v4367_v62 }
 0x63c   : > { %v4541_v28 = vadd.f32 %v4525_v30, %v4454_v38 }
 0x63d   : > { %v4542_v32 = vadd.f32 %v4526_v19, %v4456_v52 }
 0x63e   : > { %v4569_v43 = vadd.f32 %v10322_v22, %v4541_v28 }
 0x63f   : > { %v4371_v60 = vpop.f32.mrb[44].mxu1  ;;  %v4570_v52 = vadd.f32 %v10325_v1, %v4542_v32 }
 0x640   : > { %v4527_v49 = vadd.f32 %v10240_v9, %v4371_v60  ;;  %v4373_v42 = vpop.f32.mrb[45].mxu1  ;;  %v4585_v34 = vmax.f32 %v4569_v43, 0.0 }
 0x641   : > { %v4528_v59 = vadd.f32 %v10244_v40, %v4373_v42  ;;  %v4375_v17 = vpop.f32.mrb[46].mxu1  ;;  %v4586_v25 = vmax.f32 %v4570_v52, 0.0 }
 0x642   : > { %v4543_v39 = vadd.f32 %v4527_v49, %v10255_v11  ;;  %v4529_v51 = vadd.f32 %v10247_v5, %v4375_v17  ;;  %v4377_v38 = vpop.f32.mrb[47].mxu1 }
 0x643   : > { %v4544_v13 = vadd.f32 %v4528_v59, %v10261_v6  ;;  %v4530_v57 = vadd.f32 %v10250_v2, %v4377_v38 }
 0x644   : > { %v4571_v8 = vadd.f32 %v10322_v22, %v4543_v39  ;;  %v4545_v9 = vadd.f32 %v4529_v51, %v4464_v47 }
 0x645   : > { %v4572_v12 = vadd.f32 %v10325_v1, %v4544_v13  ;;  %v4546_v40 = vadd.f32 %v4530_v57, %v4466_v0 }
 0x646   : > { %v4587_v3 = vmax.f32 %v4571_v8, 0.0  ;;  %v4573_v2 = vadd.f32 %v10322_v22, %v4545_v9 }
 0x647   : > { %v4588_v21 = vmax.f32 %v4572_v12, 0.0  ;;  %v4381_v11 = vpop.f32.mrb[48].mxu1  ;;  %v4574_v27 = vadd.f32 %v10325_v1, %v4546_v40 }
 0x648   : > { %v4605_v44 = vpack.c.bf16 %v4587_v3, %v4585_v34  ;;  %v4531_v5 = vadd.f32 %v10258_v37, %v4381_v11  ;;  %v4383_v61 = vpop.f32.mrb[49].mxu1 }
 0x649   : > { %v4532_v45 = vadd.f32 %v10264_v46, %v4383_v61  ;;  %v4385_v6 = vpop.f32.mrb[50].mxu1  ;;  %v4606_v35 = vpack.c.bf16 %v4588_v21, %v4586_v25 }
 0x64a   : > { %v4547_v47 = vadd.f32 %v4531_v5, %v10275_v50  ;;  %v4533_v20 = vadd.f32 %v10267_v10, %v4385_v6  ;;  %v4387_v0 = vpop.f32.mrb[51].mxu1  ;;  %v4589_v50 = vmax.f32 %v4573_v2, 0.0  ;;  %v4590_v10 = vmax.f32 %v4574_v27, 0.0  ;;  %v7682_v2 = vld [vmem:[%s10857_s8 + $0x38] sm:$0xff]   ;;  %v7691_v27 = vld [vmem:[%s10858_s9 + $0x124] ss:$16 sps:$4 sm:$0xff]  }
 0x64b   : > { %v4548_v58 = vadd.f32 %v4532_v45, %v10281_v55  ;;  %v4534_v30 = vadd.f32 %v10270_v14, %v4387_v0  ;;  %4629 = vmatprep.subr.bf16.mxu1 %v4606_v35  ;;  %v7688_v0 = vld [vmem:[%s10858_s9 + $0x10c] ss:$16 sps:$4 sm:$0xff]  }
 0x64c   : > { %v4575_v37 = vadd.f32 %v10322_v22, %v4547_v47  ;;  %v4549_v46 = vadd.f32 %v4533_v20, %v10293_v7  ;;  %4630 = vmatpush1.bf16.msra.mxu1 %v4605_v44  ;;  %v7683_v47 = vld [vmem:[%s10858_s9 + $0x100] ss:$16 sps:$4 sm:$0xff]   ;;  %v7685_v20 = vld [vmem:[%s10858_s9 + $0x104] ss:$16 sps:$4 sm:$0xff]  }
 0x64d   : > { %v4576_v62 = vadd.f32 %v10325_v1, %v4548_v58  ;;  %v4550_v26 = vadd.f32 %v4534_v30, %v10296_v33  ;;  %v7689_v58 = vld [vmem:[%s10858_s9 + $0x120] ss:$16 sps:$4 sm:$0xff]   ;;  %v7697_v30 = vld [vmem:[%s10858_s9 + $0x144] ss:$16 sps:$4 sm:$0xff]  }
 0x64e   : > { %v4591_v19 = vmax.f32 %v4575_v37, 0.0  ;;  %v4577_v7 = vadd.f32 %v10322_v22, %v4549_v46  ;;  %v7695_v37 = vld [vmem:[%s10858_s9 + $0x140] ss:$16 sps:$4 sm:$0xff]   ;;  %v7703_v46 = vld [vmem:[%s10858_s9 + $0x164] ss:$16 sps:$4 sm:$0xff]  }
 0x64f   : > { %v4592_v28 = vmax.f32 %v4576_v62, 0.0  ;;  %v4391_v32 = vpop.f32.mrb[52].mxu1  ;;  %v4578_v39 = vadd.f32 %v10325_v1, %v4550_v26  ;;  %v7701_v62 = vld [vmem:[%s10858_s9 + $0x160] ss:$16 sps:$4 sm:$0xff]   ;;  %v7709_v26 = vld [vmem:[%s10858_s9 + $0x184] ss:$16 sps:$4 sm:$0xff]  }
 0x650   : > { %v4607_v60 = vpack.c.bf16 %v4591_v19, %v4589_v50  ;;  %v4535_v55 = vadd.f32 %v10278_v63, %v4391_v32  ;;  %v4393_v49 = vpop.f32.mrb[53].mxu1  ;;  %v7707_v50 = vld [vmem:[%s10858_s9 + $0x180] ss:$16 sps:$4 sm:$0xff]   ;;  %v7715_v19 = vld [vmem:[%s10858_s9 + $0x1a4] ss:$16 sps:$4 sm:$0xff]  }
 0x651   : > { %v4536_v14 = vadd.f32 %v10284_v18, %v4393_v49  ;;  %v4395_v42 = vpop.f32.mrb[54].mxu1  ;;  %v4608_v59 = vpack.c.bf16 %v4592_v28, %v4590_v10  ;;  %v7713_v10 = vld [vmem:[%s10858_s9 + $0x1a0] ss:$16 sps:$4 sm:$0xff]   ;;  %v7721_v28 = vld [vmem:[%s10858_s9 + $0x1c4] ss:$16 sps:$4 sm:$0xff]  }
 0x652   : > { %v4551_v17 = vadd.f32 %v4535_v55, %v10298_v24  ;;  %v4537_v43 = vadd.f32 %v10287_v23, %v4395_v42  ;;  %v4397_v33 = vpop.f32.mrb[55].mxu1  ;;  %v4593_v24 = vmax.f32 %v4577_v7, 0.0  ;;  %v4594_v23 = vmax.f32 %v4578_v39, 0.0  ;;  %v7719_v32 = vld [vmem:[%s10858_s9 + $0x1c0] ss:$16 sps:$4 sm:$0xff]  }
 0x653   : > { %v4552_v51 = vadd.f32 %v4536_v14, %v10303_v53  ;;  %v4538_v38 = vadd.f32 %v10290_v31, %v4397_v33  ;;  %4631 = vmatprep.subr.bf16.mxu1 %v4608_v59  ;;  %v7686_v7 = vld [vmem:[%s10858_s9 + $0x108] ss:$16 sps:$4 sm:$0xff]  }
 0x654   : > { %v4579_v63 = vadd.f32 %v10322_v22, %v4551_v17  ;;  %v4553_v18 = vadd.f32 %v4537_v43, %v10308_v41  ;;  %4632 = vmatpush1.bf16.msra.mxu1 %v4607_v60  ;;  %v7694_v17 = vld [vmem:[%s10858_s9 + $0x12c] ss:$16 sps:$4 sm:$0xff]   ;;  %v7692_v33 = vld [vmem:[%s10858_s9 + $0x128] ss:$16 sps:$4 sm:$0xff]  }
 0x655   : > { %v4580_v52 = vadd.f32 %v10325_v1, %v4552_v51  ;;  %v4554_v13 = vadd.f32 %v4538_v38, %v10310_v29  ;;  %v7700_v51 = vld [vmem:[%s10858_s9 + $0x14c] ss:$16 sps:$4 sm:$0xff]  }
 0x656   : > { %v4595_v57 = vmax.f32 %v4579_v63, 0.0  ;;  %v4581_v41 = vadd.f32 %v10322_v22, %v4553_v18 }
 0x657   : > { %v4596_v8 = vmax.f32 %v4580_v52, 0.0  ;;  %v4401_v9 = vpop.f32.mrb[56].mxu1  ;;  %v4582_v29 = vadd.f32 %v10325_v1, %v4554_v13  ;;  %v7698_v13 = vld [vmem:[%s10858_s9 + $0x148] ss:$16 sps:$4 sm:$0xff]  }
 0x658   : > { %v4609_v12 = vpack.c.bf16 %v4595_v57, %v4593_v24  ;;  %v4539_v53 = vadd.f32 %v10301_v4, %v4401_v9  ;;  %v4403_v40 = vpop.f32.mrb[57].mxu1  ;;  %v4597_v5 = vmax.f32 %v4581_v41, 0.0  ;;  %v7706_v24 = vld [vmem:[%s10858_s9 + $0x16c] ss:$16 sps:$4 sm:$0xff]   ;;  %v7704_v57 = vld [vmem:[%s10858_s9 + $0x168] ss:$16 sps:$4 sm:$0xff]  }
 0x659   : > { %v4540_v31 = vadd.f32 %v10306_v56, %v4403_v40  ;;  %v4405_v34 = vpop.f32.mrb[58].mxu1  ;;  %v4610_v3 = vpack.c.bf16 %v4596_v8, %v4594_v23  ;;  %v4598_v56 = vmax.f32 %v4582_v29, 0.0  ;;  %v7712_v23 = vld [vmem:[%s10858_s9 + $0x18c] ss:$16 sps:$4 sm:$0xff]   ;;  %v7710_v8 = vld [vmem:[%s10858_s9 + $0x188] ss:$16 sps:$4 sm:$0xff]  }
 0x65a   : > { %v4555_v25 = vadd.f32 %v4539_v53, %v10312_v54  ;;  %v4406_v21 = vpop.f32.mrb[59].mxu1  ;;  %v7665_v54 = vld [vmem:[%s10856_s7] sm:$0xff]   ;;  %v7718_v9 = vld [vmem:[%s10858_s9 + $0x1ac] ss:$16 sps:$4 sm:$0xff]   ;;  %v7722_v40 = vld [vmem:[%s10858_s9 + $0x1c8] ss:$16 sps:$4 sm:$0xff]  }
 0x65b   : > { %v4556_v11 = vadd.f32 %v4540_v31, %v10314_v15  ;;  %4633 = vmatprep.subr.bf16.mxu1 %v4610_v3  ;;  %v7666_v15 = vld [vmem:[%s10856_s7 + $0x8] sm:$0xff]   ;;  %v7727_v31 = vld [vmem:[%s10858_s9 + $0x1e4] ss:$16 sps:$4 sm:$0xff]   ;;  %v7725_v3 = vld [vmem:[%s10858_s9 + $0x1e0] ss:$16 sps:$4 sm:$0xff]  }
 0x65c   : > { %v4583_v44 = vadd.f32 %v10322_v22, %v4555_v25  ;;  %4634 = vmatpush1.bf16.msra.mxu1 %v4609_v12  ;;  %v7680_v22 = vld [vmem:[%s10857_s8 + $0x30] sm:$0xff]   ;;  %v7716_v12 = vld [vmem:[%s10858_s9 + $0x1a8] ss:$16 sps:$4 sm:$0xff]   ;;  %v7724_v53 = vld [vmem:[%s10858_s9 + $0x1cc] ss:$16 sps:$4 sm:$0xff]  }
 0x65d   : > { %v4584_v4 = vadd.f32 %v10325_v1, %v4556_v11  ;;  %7158 = vmatpush3.bf16.msra.mxu0 %v7680_v22  ;;  %v7681_v1 = vld [vmem:[%s10857_s8 + $0x78] sm:$0xff]   ;;  %v7733_v25 = vld [vmem:[%s10858_s9 + $0x4] ss:$16 sps:$4 sm:$0xff]   ;;  %v7737_v22 = vld [vmem:[%s10858_s9 + $0x20] ss:$16 sps:$4 sm:$0xff]  }
 0x65e   : > { %v4599_v61 = vmax.f32 %v4583_v44, 0.0  ;;  %7159 = vmatprep.subr.bf16.mxu0 %v7681_v1  ;;  %v7730_v34 = vld [vmem:[%s10858_s9 + $0x1ec] ss:$16 sps:$4 sm:$0xff]   ;;  %v7728_v41 = vld [vmem:[%s10858_s9 + $0x1e8] ss:$16 sps:$4 sm:$0xff]  }
 0x65f   : > { %v4600_v45 = vmax.f32 %v4584_v4, 0.0  ;;  %v7736_v21 = vld [vmem:[%s10858_s9 + $0xc] ss:$16 sps:$4 sm:$0xff]   ;;  %v7740_v1 = vld [vmem:[%s10858_s9 + $0x28] ss:$16 sps:$4 sm:$0xff]  }
 0x660   : > { %v4611_v6 = vpack.c.bf16 %v4599_v61, %v4597_v5 }
 0x661   : > { %v4612_v35 = vpack.c.bf16 %v4600_v45, %v4598_v56  ;;  %7160 = vmatpush3.bf16.msra.mxu0 %v7682_v2  ;;  %v7731_v56 = vld [vmem:[%s10858_s9] ss:$16 sps:$4 sm:$0xff]   ;;  %v7734_v45 = vld [vmem:[%s10858_s9 + $0x8] ss:$16 sps:$4 sm:$0xff]  }
 0x662   : > { %5131 = vmatprep.subr.bf16.mxu0 %v7688_v0 }
 0x663   : > { %4635 = vmatprep.subr.bf16.mxu1 %v4612_v35  ;;  %v7739_v35 = vld [vmem:[%s10858_s9 + $0x24] ss:$16 sps:$4 sm:$0xff]  }
 0x664   : > { %4636 = vmatpush1.bf16.msra.mxu1 %v4611_v6 }
 0x665   : > { %5090 = vmatprep.subr.bf16.mxu1 %v7685_v20  ;;  %v7748_v20 = vld [vmem:[%s10858_s9 + $0x4c] ss:$16 sps:$4 sm:$0xff]  }
 0x667   : > { %6850 = vmatmul.mubr.msk.bf16.vlgmr.msra.gmra.mrb[60].mxu1 %vm2633_vm2, %v7665_v54  ;;  %v7742_v54 = vld [vmem:[%s10858_s9 + $0x2c] ss:$16 sps:$4 sm:$0xff]  }
 0x668   : > { %4671 = vmatprep.mubr.bf16.mxu1 %v11087_v36  ;;  %5091 = vmatpush1.bf16.msra.mxu1 %v7683_v47  ;;  %v7745_v47 = vld [vmem:[%s10858_s9 + $0x44] ss:$16 sps:$4 sm:$0xff]  }
 0x669   : > { %5092 = vmatprep.subr.bf16.mxu1 %v7691_v27 }
 0x66c   : > { %5093 = vmatpush1.bf16.msra.mxu1 %v7689_v58 }
 0x66d   : > { %5094 = vmatprep.subr.bf16.mxu1 %v7697_v30 }
 0x66f   : > { %6851 = vmatmul.mubr.msk.bf16.gmra.mrb[64].mxu1 %vm2633_vm2, %v7666_v15 }
 0x670   : > { %5122 = vmatprep.mubr.bf16.mxu1 %v11087_v36  ;;  %5095 = vmatpush1.bf16.msra.mxu1 %v7695_v37  ;;  %v7743_v37 = vld [vmem:[%s10858_s9 + $0x40] ss:$16 sps:$4 sm:$0xff]  }
 0x671   : > { %5096 = vmatprep.subr.bf16.mxu1 %v7703_v46  ;;  %v7746_v46 = vld [vmem:[%s10858_s9 + $0x48] ss:$16 sps:$4 sm:$0xff]  }
 0x674   : > { %5097 = vmatpush1.bf16.msra.mxu1 %v7701_v62  ;;  %v7751_v62 = vld [vmem:[%s10858_s9 + $0x64] ss:$16 sps:$4 sm:$0xff]  }
 0x675   : > { %5098 = vmatprep.subr.bf16.mxu1 %v7709_v26  ;;  %v7754_v26 = vld [vmem:[%s10858_s9 + $0x6c] ss:$16 sps:$4 sm:$0xff]  }
 0x678   : > { %5099 = vmatpush1.bf16.msra.mxu1 %v7707_v50  ;;  %v7749_v50 = vld [vmem:[%s10858_s9 + $0x60] ss:$16 sps:$4 sm:$0xff]  }
 0x679   : > { %5100 = vmatprep.subr.bf16.mxu1 %v7715_v19  ;;  %v7752_v19 = vld [vmem:[%s10858_s9 + $0x68] ss:$16 sps:$4 sm:$0xff]  }
 0x67c   : > { %5101 = vmatpush1.bf16.msra.mxu1 %v7713_v10  ;;  %v7757_v10 = vld [vmem:[%s10858_s9 + $0x84] ss:$16 sps:$4 sm:$0xff]  }
 0x67d   : > { %5102 = vmatprep.subr.bf16.mxu1 %v7721_v28  ;;  %v7760_v28 = vld [vmem:[%s10858_s9 + $0x8c] ss:$16 sps:$4 sm:$0xff]  }
 0x680   : > { %5103 = vmatpush1.bf16.msra.mxu1 %v7719_v32  ;;  %v7755_v32 = vld [vmem:[%s10858_s9 + $0x80] ss:$16 sps:$4 sm:$0xff]  }
 0x681   : > { %5104 = vmatprep.subr.bf16.mxu1 %v7727_v31  ;;  %v7794_v31 = vld [vmem:[%s10858_s9 + $0x248] ss:$16 sps:$4 sm:$0xff]  }
 0x684   : > { %5105 = vmatpush1.bf16.msra.mxu1 %v7725_v3  ;;  %v7802_v3 = vld [vmem:[%s10858_s9 + $0x26c] ss:$16 sps:$4 sm:$0xff]  }
 0x685   : > { %5332 = vmatprep.subr.bf16.mxu1 %v7733_v25  ;;  %v7800_v25 = vld [vmem:[%s10858_s9 + $0x268] ss:$16 sps:$4 sm:$0xff]  }
 0x73a   : > { %v4663_v60 = vpop.f32.mrb[60].mxu1 }
 0x73b   : > { %v4665_v55 = vpop.f32.mrb[61].mxu1 }
 0x73c   : > { %v4667_v49 = vpop.f32.mrb[62].mxu1 }
 0x73d   : > { %v4682_v14 = vpack.c.bf16 %v4667_v49, %v4663_v60  ;;  %v4669_v42 = vpop.f32.mrb[63].mxu1  ;;  %v7758_v60 = vld [vmem:[%s10858_s9 + $0x88] ss:$16 sps:$4 sm:$0xff]   ;;  %v7766_v49 = vld [vmem:[%s10858_s9 + $0xac] ss:$16 sps:$4 sm:$0xff]  }
 0x73e   : > { %v4683_v59 = vpack.c.bf16 %v4669_v42, %v4665_v55  ;;  %v7763_v55 = vld [vmem:[%s10858_s9 + $0xa4] ss:$16 sps:$4 sm:$0xff]   ;;  %v7764_v42 = vld [vmem:[%s10858_s9 + $0xa8] ss:$16 sps:$4 sm:$0xff]  }
 0x740   : > { %4846 = vmatprep.mubr.bf16.mxu0 %v4683_v59  ;;  %v7769_v59 = vld [vmem:[%s10858_s9 + $0xc4] ss:$16 sps:$4 sm:$0xff]  }
 0x741   : > { %4847 = vmatmul.mubr.bf16.vlgmr.msra.gmra.mrb[40].mxu0 %v4682_v14  ;;  %v7761_v14 = vld [vmem:[%s10858_s9 + $0xa0] ss:$16 sps:$4 sm:$0xff]  }
 0x742   : > { %v4673_v43 = vpop.f32.mrb[64].mxu1  ;;  %5132 = vmatpush1.bf16.msra.mxu0 %v7686_v7  ;;  %v7772_v7 = vld [vmem:[%s10858_s9 + $0xcc] ss:$16 sps:$4 sm:$0xff]  }
 0x743   : > { %v4675_v39 = vpop.f32.mrb[65].mxu1  ;;  %5133 = vmatprep.subr.bf16.mxu0 %v7694_v17  ;;  %v7767_v17 = vld [vmem:[%s10858_s9 + $0xc0] ss:$16 sps:$4 sm:$0xff]  }
 0x744   : > { %v4677_v38 = vpop.f32.mrb[66].mxu1 }
 0x745   : > { %v4684_v63 = vpack.c.bf16 %v4677_v38, %v4673_v43  ;;  %v4679_v18 = vpop.f32.mrb[67].mxu1  ;;  %v7770_v43 = vld [vmem:[%s10858_s9 + $0xc8] ss:$16 sps:$4 sm:$0xff]  }
 0x746   : > { %v4685_v52 = vpack.c.bf16 %v4679_v18, %v4675_v39  ;;  %5134 = vmatpush1.bf16.msra.mxu0 %v7692_v33  ;;  %v7775_v33 = vld [vmem:[%s10858_s9 + $0xe4] ss:$16 sps:$4 sm:$0xff]   ;;  %v7778_v39 = vld [vmem:[%s10858_s9 + $0xec] ss:$16 sps:$4 sm:$0xff]   ;;  %v7776_v38 = vld [vmem:[%s10858_s9 + $0xe8] ss:$16 sps:$4 sm:$0xff]  }
 0x747   : > { %5135 = vmatprep.subr.bf16.mxu0 %v7700_v51  ;;  %v7773_v51 = vld [vmem:[%s10858_s9 + $0xe0] ss:$16 sps:$4 sm:$0xff]   ;;  %v7784_v18 = vld [vmem:[%s10858_s9 + $0x20c] ss:$16 sps:$4 sm:$0xff]  }
 0x748   : > { %4854 = vmatprep.mubr.bf16.mxu0 %v4685_v52  ;;  %v7779_v52 = vld [vmem:[%s10858_s9 + $0x200] ss:$16 sps:$4 sm:$0xff]  }
 0x749   : > { %4855 = vmatmul.mubr.bf16.gmra.mrb[44].mxu0 %v4684_v63  ;;  %v7781_v63 = vld [vmem:[%s10858_s9 + $0x204] ss:$16 sps:$4 sm:$0xff]  }
 0x74a   : > { %5136 = vmatpush1.bf16.msra.mxu0 %v7698_v13  ;;  %5163 = vmatprep.mubr.bf16.mxu0 %v11087_v36  ;;  %v7782_v13 = vld [vmem:[%s10858_s9 + $0x208] ss:$16 sps:$4 sm:$0xff]  }
 0x74b   : > { %5137 = vmatprep.subr.bf16.mxu0 %v7706_v24 }
 0x74e   : > { %5138 = vmatpush1.bf16.msra.mxu0 %v7704_v57  ;;  %v7787_v57 = vld [vmem:[%s10858_s9 + $0x224] ss:$16 sps:$4 sm:$0xff]  }
 0x74f   : > { %5139 = vmatprep.subr.bf16.mxu0 %v7712_v23  ;;  %v7790_v23 = vld [vmem:[%s10858_s9 + $0x22c] ss:$16 sps:$4 sm:$0xff]  }
 0x752   : > { %5140 = vmatpush1.bf16.msra.mxu0 %v7710_v8  ;;  %v7785_v8 = vld [vmem:[%s10858_s9 + $0x220] ss:$16 sps:$4 sm:$0xff]  }
 0x753   : > { %5141 = vmatprep.subr.bf16.mxu0 %v7718_v9  ;;  %v7788_v9 = vld [vmem:[%s10858_s9 + $0x228] ss:$16 sps:$4 sm:$0xff]  }
 0x756   : > { %5142 = vmatpush1.bf16.msra.mxu0 %v7716_v12  ;;  %v7793_v12 = vld [vmem:[%s10858_s9 + $0x244] ss:$16 sps:$4 sm:$0xff]  }
 0x757   : > { %5143 = vmatprep.subr.bf16.mxu0 %v7724_v53  ;;  %v7796_v53 = vld [vmem:[%s10858_s9 + $0x24c] ss:$16 sps:$4 sm:$0xff]  }
 0x75a   : > { %5144 = vmatpush1.bf16.msra.mxu0 %v7722_v40  ;;  %v7791_v40 = vld [vmem:[%s10858_s9 + $0x240] ss:$16 sps:$4 sm:$0xff]  }
 0x75b   : > { %5145 = vmatprep.subr.bf16.mxu0 %v7730_v34  ;;  %v7799_v34 = vld [vmem:[%s10858_s9 + $0x264] ss:$16 sps:$4 sm:$0xff]  }
 0x75e   : > { %5146 = vmatpush1.bf16.msra.mxu0 %v7728_v41  ;;  %v7797_v41 = vld [vmem:[%s10858_s9 + $0x260] ss:$16 sps:$4 sm:$0xff]  }
 0x75f   : > { %5373 = vmatprep.subr.bf16.mxu0 %v7736_v21  ;;  %v7805_v21 = vld [vmem:[%s10858_s9 + $0x284] ss:$16 sps:$4 sm:$0xff]  }
 0x814   : > { %v7161_v29 = vpop.f32.mrb[40].mxu0 }
 0x815   : > { %v7162_v11 = vpop.f32.mrb[41].mxu0 }
 0x816   : > { %v10491_v44 = vadd.f32 %v7162_v11, %v7161_v29  ;;  %v7164_v4 = vpop.f32.mrb[42].mxu0  ;;  %v7808_v29 = vld [vmem:[%s10858_s9 + $0x28c] ss:$16 sps:$4 sm:$0xff]   ;;  %v7803_v11 = vld [vmem:[%s10858_s9 + $0x280] ss:$16 sps:$4 sm:$0xff]  }
 0x817   : > { %v7165_v5 = vpop.f32.mrb[43].mxu0 }
 0x818   : > { %v7166_v61 = vadd.f32 %v7165_v5, %v7164_v4  ;;  %v4863_v24 = vpack.c.bf16 %v10491_v44, %v10491_v44  ;;  %v7806_v44 = vld [vmem:[%s10858_s9 + $0x288] ss:$16 sps:$4 sm:$0xff]   ;;  %v7811_v4 = vld [vmem:[%s10858_s9 + $0x2a4] ss:$16 sps:$4 sm:$0xff]   ;;  %v7814_v5 = vld [vmem:[%s10858_s9 + $0x2ac] ss:$16 sps:$4 sm:$0xff]  }
 0x81a   : > { %v4896_v6 = vpack.c.bf16 %v7166_v61, %v7166_v61  ;;  %v7809_v61 = vld [vmem:[%s10858_s9 + $0x2a0] ss:$16 sps:$4 sm:$0xff]  }
 0x81c   : > { %5123 = vmatmul.mubr.bf16.vlgmr.msra.gmra.mrb[68].mxu1 %v4896_v6  ;;  %5164 = vmatmul.mubr.bf16.vlgmr.msra.gmra.mrb[48].mxu0 %v4896_v6  ;;  %v7167_v15 = vpop.f32.mrb[44].mxu0  ;;  %v7820_v6 = vld [vmem:[%s10858_s9 + $0x2cc] ss:$16 sps:$4 sm:$0xff]  }
 0x81d   : > { %5333 = vmatpush1.bf16.msra.mxu1 %v7731_v56  ;;  %5374 = vmatpush1.bf16.msra.mxu0 %v7734_v45  ;;  %v7168_v2 = vpop.f32.mrb[45].mxu0  ;;  %v7812_v56 = vld [vmem:[%s10858_s9 + $0x2a8] ss:$16 sps:$4 sm:$0xff]   ;;  %v7817_v45 = vld [vmem:[%s10858_s9 + $0x2c4] ss:$16 sps:$4 sm:$0xff]  }
 0x81e   : > { %5334 = vmatprep.subr.bf16.mxu1 %v7739_v35  ;;  %5375 = vmatprep.subr.bf16.mxu0 %v7742_v54  ;;  %v10517_v0 = vadd.f32 %v7168_v2, %v7167_v15  ;;  %v7170_v27 = vpop.f32.mrb[46].mxu0  ;;  %v7815_v35 = vld [vmem:[%s10858_s9 + $0x2c0] ss:$16 sps:$4 sm:$0xff]   ;;  %v7818_v54 = vld [vmem:[%s10858_s9 + $0x2c8] ss:$16 sps:$4 sm:$0xff]  }
 0x81f   : > { %5364 = vmatprep.mubr.bf16.mxu1 %v11087_v36  ;;  %5405 = vmatprep.mubr.bf16.mxu0 %v11087_v36  ;;  %v7171_v58 = vpop.f32.mrb[47].mxu0  ;;  %v7823_v15 = vld [vmem:[%s10858_s9 + $0x2e4] ss:$16 sps:$4 sm:$0xff]   ;;  %v7824_v2 = vld [vmem:[%s10858_s9 + $0x2e8] ss:$16 sps:$4 sm:$0xff]  }
 0x820   : > { %v10521_v30 = vadd.f32 %v7171_v58, %v7170_v27  ;;  %v7827_v27 = vld [vmem:[%s10858_s9 + $0x300] ss:$16 sps:$4 sm:$0xff]   ;;  %v7830_v58 = vld [vmem:[%s10858_s9 + $0x308] ss:$16 sps:$4 sm:$0xff]  }
 0x821   : > { %5335 = vmatpush1.bf16.msra.mxu1 %v7737_v22  ;;  %5376 = vmatpush1.bf16.msra.mxu0 %v7740_v1  ;;  %v7826_v22 = vld [vmem:[%s10858_s9 + $0x2ec] ss:$16 sps:$4 sm:$0xff]   ;;  %v7821_v1 = vld [vmem:[%s10858_s9 + $0x2e0] ss:$16 sps:$4 sm:$0xff]  }
 0x822   : > { %5336 = vmatprep.subr.bf16.mxu1 %v7745_v47  ;;  %5377 = vmatprep.subr.bf16.mxu0 %v7748_v20  ;;  %v7829_v47 = vld [vmem:[%s10858_s9 + $0x304] ss:$16 sps:$4 sm:$0xff]   ;;  %v7832_v20 = vld [vmem:[%s10858_s9 + $0x30c] ss:$16 sps:$4 sm:$0xff]  }
 0x825   : > { %5337 = vmatpush1.bf16.msra.mxu1 %v7743_v37  ;;  %5378 = vmatpush1.bf16.msra.mxu0 %v7746_v46  ;;  %v5414_v37 = vpack.c.bf16 %v10517_v0, %v10517_v0  ;;  %v7835_v46 = vld [vmem:[%s10858_s9 + $0x324] ss:$16 sps:$4 sm:$0xff]   ;;  %v7836_v0 = vld [vmem:[%s10858_s9 + $0x328] ss:$16 sps:$4 sm:$0xff]  }
 0x826   : > { %5338 = vmatprep.subr.bf16.mxu1 %v7751_v62  ;;  %5379 = vmatprep.subr.bf16.mxu0 %v7754_v26  ;;  %v7838_v62 = vld [vmem:[%s10858_s9 + $0x32c] ss:$16 sps:$4 sm:$0xff]   ;;  %v7833_v26 = vld [vmem:[%s10858_s9 + $0x320] ss:$16 sps:$4 sm:$0xff]  }
 0x829   : > { %5339 = vmatpush1.bf16.msra.mxu1 %v7749_v50  ;;  %5380 = vmatpush1.bf16.msra.mxu0 %v7752_v19  ;;  %v7841_v50 = vld [vmem:[%s10858_s9 + $0x344] ss:$16 sps:$4 sm:$0xff]   ;;  %v7844_v19 = vld [vmem:[%s10858_s9 + $0x34c] ss:$16 sps:$4 sm:$0xff]  }
 0x82a   : > { %5340 = vmatprep.subr.bf16.mxu1 %v7757_v10  ;;  %5381 = vmatprep.subr.bf16.mxu0 %v7760_v28  ;;  %v7839_v10 = vld [vmem:[%s10858_s9 + $0x340] ss:$16 sps:$4 sm:$0xff]   ;;  %v7842_v28 = vld [vmem:[%s10858_s9 + $0x348] ss:$16 sps:$4 sm:$0xff]  }
 0x82d   : > { %5341 = vmatpush1.bf16.msra.mxu1 %v7755_v32  ;;  %5382 = vmatpush1.bf16.msra.mxu0 %v7758_v60  ;;  %v7847_v32 = vld [vmem:[%s10858_s9 + $0x364] ss:$16 sps:$4 sm:$0xff]   ;;  %v7845_v60 = vld [vmem:[%s10858_s9 + $0x360] ss:$16 sps:$4 sm:$0xff]  }
 0x82e   : > { %5342 = vmatprep.subr.bf16.mxu1 %v7763_v55  ;;  %5383 = vmatprep.subr.bf16.mxu0 %v7766_v49  ;;  %v7848_v55 = vld [vmem:[%s10858_s9 + $0x368] ss:$16 sps:$4 sm:$0xff]   ;;  %v7853_v49 = vld [vmem:[%s10858_s9 + $0x384] ss:$16 sps:$4 sm:$0xff]  }
 0x831   : > { %5343 = vmatpush1.bf16.msra.mxu1 %v7761_v14  ;;  %5384 = vmatpush1.bf16.msra.mxu0 %v7764_v42  ;;  %v7856_v14 = vld [vmem:[%s10858_s9 + $0x38c] ss:$16 sps:$4 sm:$0xff]   ;;  %v7851_v42 = vld [vmem:[%s10858_s9 + $0x380] ss:$16 sps:$4 sm:$0xff]  }
 0x832   : > { %5344 = vmatprep.subr.bf16.mxu1 %v7769_v59  ;;  %5385 = vmatprep.subr.bf16.mxu0 %v7772_v7  ;;  %v7854_v59 = vld [vmem:[%s10858_s9 + $0x388] ss:$16 sps:$4 sm:$0xff]   ;;  %v7859_v7 = vld [vmem:[%s10858_s9 + $0x3a4] ss:$16 sps:$4 sm:$0xff]  }
 0x835   : > { %5345 = vmatpush1.bf16.msra.mxu1 %v7767_v17  ;;  %5386 = vmatpush1.bf16.msra.mxu0 %v7770_v43  ;;  %v7862_v17 = vld [vmem:[%s10858_s9 + $0x3ac] ss:$16 sps:$4 sm:$0xff]   ;;  %v7857_v43 = vld [vmem:[%s10858_s9 + $0x3a0] ss:$16 sps:$4 sm:$0xff]  }
 0x836   : > { %5346 = vmatprep.subr.bf16.mxu1 %v7775_v33  ;;  %5387 = vmatprep.subr.bf16.mxu0 %v7778_v39  ;;  %v7860_v33 = vld [vmem:[%s10858_s9 + $0x3a8] ss:$16 sps:$4 sm:$0xff]   ;;  %v7865_v39 = vld [vmem:[%s10858_s9 + $0x3c4] ss:$16 sps:$4 sm:$0xff]  }
 0x839   : > { %5347 = vmatpush1.bf16.msra.mxu1 %v7773_v51  ;;  %5388 = vmatpush1.bf16.msra.mxu0 %v7776_v38  ;;  %v7868_v51 = vld [vmem:[%s10858_s9 + $0x3cc] ss:$16 sps:$4 sm:$0xff]   ;;  %v7863_v38 = vld [vmem:[%s10858_s9 + $0x3c0] ss:$16 sps:$4 sm:$0xff]  }
 0x83a   : > { %5608 = vmatprep.subr.bf16.mxu1 %v7781_v63  ;;  %5649 = vmatprep.subr.bf16.mxu0 %v7784_v18  ;;  %v7866_v63 = vld [vmem:[%s10858_s9 + $0x3c8] ss:$16 sps:$4 sm:$0xff]   ;;  %v7871_v18 = vld [vmem:[%s10858_s9 + $0x3e4] ss:$16 sps:$4 sm:$0xff]  }
 0x83c   : > { %5365 = vmatmul.mubr.bf16.vlgmr.msra.gmra.mrb[72].mxu1 %v4863_v24  ;;  %5406 = vmatmul.mubr.bf16.vlgmr.msra.gmra.mrb[52].mxu0 %v4863_v24  ;;  %v7872_v24 = vld [vmem:[%s10858_s9 + $0x3e8] ss:$16 sps:$4 sm:$0xff]  }
 0x83d   : > { %5609 = vmatpush1.bf16.msra.mxu1 %v7779_v52  ;;  %5650 = vmatpush1.bf16.msra.mxu0 %v7782_v13  ;;  %v7874_v52 = vld [vmem:[%s10858_s9 + $0x3ec] ss:$16 sps:$4 sm:$0xff]   ;;  %v7869_v13 = vld [vmem:[%s10858_s9 + $0x3e0] ss:$16 sps:$4 sm:$0xff]  }
 0x83e   : > { %5610 = vmatprep.subr.bf16.mxu1 %v7787_v57  ;;  %5651 = vmatprep.subr.bf16.mxu0 %v7790_v23  ;;  %v5694_v57 = vpack.c.bf16 %v10521_v30, %v10521_v30  ;;  %v7875_v23 = vld [vmem:[#allocation7 + $0x40] sm:$0xff]   ;;  %v7885_v30 = vld [vmem:[#allocation7 + $0x10] sm:$0xff]  }
 0x83f   : > { %5640 = vmatprep.mubr.bf16.mxu1 %v11087_v36  ;;  %5681 = vmatprep.mubr.bf16.mxu0 %v11087_v36 }
 0x841   : > { %5611 = vmatpush1.bf16.msra.mxu1 %v7785_v8  ;;  %5652 = vmatpush1.bf16.msra.mxu0 %v7788_v9  ;;  %v7876_v8 = vld [vmem:[#allocation7 + $0xc0] sm:$0xff]  }
 0x842   : > { %5612 = vmatprep.subr.bf16.mxu1 %v7793_v12  ;;  %5653 = vmatprep.subr.bf16.mxu0 %v7796_v53  ;;  %v7877_v9 = vld [vmem:[#allocation7] sm:$0xff]   ;;  %v7879_v53 = vld [vmem:[#allocation7 + $0x48] sm:$0xff]  }
 0x843   : > { %v7878_v12 = vld [vmem:[#allocation7 + $0x80] sm:$0xff]  }
 0x845   : > { %5613 = vmatpush1.bf16.msra.mxu1 %v7791_v40  ;;  %5654 = vmatpush1.bf16.msra.mxu0 %v7794_v31  ;;  %v7880_v40 = vld [vmem:[#allocation7 + $0xc8] sm:$0xff]  }
 0x846   : > { %5614 = vmatprep.subr.bf16.mxu1 %v7799_v34  ;;  %5655 = vmatprep.subr.bf16.mxu0 %v7802_v3  ;;  %v7881_v31 = vld [vmem:[#allocation7 + $0x8] sm:$0xff]   ;;  %v7883_v3 = vld [vmem:[#allocation7 + $0x50] sm:$0xff]  }
 0x847   : > { %v7882_v34 = vld [vmem:[#allocation7 + $0x88] sm:$0xff]  }
 0x849   : > { %5615 = vmatpush1.bf16.msra.mxu1 %v7797_v41  ;;  %5656 = vmatpush1.bf16.msra.mxu0 %v7800_v25  ;;  %v7884_v41 = vld [vmem:[#allocation7 + $0xd0] sm:$0xff]  }
 0x84a   : > { %5616 = vmatprep.subr.bf16.mxu1 %v7805_v21  ;;  %5657 = vmatprep.subr.bf16.mxu0 %v7808_v29  ;;  %v7886_v25 = vld [vmem:[#allocation7 + $0x90] sm:$0xff]   ;;  %v7887_v21 = vld [vmem:[#allocation7 + $0x58] sm:$0xff]  }
 0x84b   : > { %v7888_v29 = vld [vmem:[#allocation7 + $0xd8] sm:$0xff]  }
 0x84d   : > { %5617 = vmatpush1.bf16.msra.mxu1 %v7803_v11  ;;  %5658 = vmatpush1.bf16.msra.mxu0 %v7806_v44  ;;  %v7889_v11 = vld [vmem:[#allocation7 + $0x18] sm:$0xff]  }
 0x84e   : > { %5618 = vmatprep.subr.bf16.mxu1 %v7811_v4  ;;  %5659 = vmatprep.subr.bf16.mxu0 %v7814_v5  ;;  %v7890_v44 = vld [vmem:[#allocation7 + $0x98] sm:$0xff]   ;;  %v7891_v4 = vld [vmem:[#allocation7 + $0x60] sm:$0xff]  }
 0x84f   : > { %v7892_v5 = vld [vmem:[#allocation7 + $0xe0] sm:$0xff]  }
 0x851   : > { %5619 = vmatpush1.bf16.msra.mxu1 %v7809_v61  ;;  %5660 = vmatpush1.bf16.msra.mxu0 %v7812_v56  ;;  %v7893_v61 = vld [vmem:[#allocation7 + $0x20] sm:$0xff]  }
 0x852   : > { %5620 = vmatprep.subr.bf16.mxu1 %v7817_v45  ;;  %5661 = vmatprep.subr.bf16.mxu0 %v7820_v6  ;;  %v7894_v56 = vld [vmem:[#allocation7 + $0xa0] sm:$0xff]   ;;  %v7895_v45 = vld [vmem:[#allocation7 + $0x68] sm:$0xff]  }
 0x853   : > { %v7896_v6 = vld [vmem:[#allocation7 + $0xe8] sm:$0xff]  }
 0x855   : > { %5621 = vmatpush1.bf16.msra.mxu1 %v7815_v35  ;;  %5662 = vmatpush1.bf16.msra.mxu0 %v7818_v54  ;;  %v7897_v35 = vld [vmem:[#allocation7 + $0x28] sm:$0xff]  }
 0x856   : > { %5622 = vmatprep.subr.bf16.mxu1 %v7823_v15  ;;  %5663 = vmatprep.subr.bf16.mxu0 %v7826_v22  ;;  %v7898_v54 = vld [vmem:[#allocation7 + $0xa8] sm:$0xff]   ;;  %v7899_v15 = vld [vmem:[#allocation7 + $0x70] sm:$0xff]  }
 0x857   : > { %v7900_v22 = vld [vmem:[#allocation7 + $0xf0] sm:$0xff]  }
 0x859   : > { %5623 = vmatpush1.bf16.msra.mxu1 %v7821_v1  ;;  %5664 = vmatpush1.bf16.msra.mxu0 %v7824_v2  ;;  %v7901_v1 = vld [vmem:[#allocation7 + $0x30] sm:$0xff]  }
 0x85a   : > { %5888 = vmatprep.subr.bf16.mxu1 %v7829_v47  ;;  %5929 = vmatprep.subr.bf16.mxu0 %v7832_v20  ;;  %v7902_v2 = vld [vmem:[#allocation7 + $0xb0] sm:$0xff]   ;;  %v7903_v47 = vld [vmem:[#allocation7 + $0x78] sm:$0xff]  }
 0x85b   : > { %v7904_v20 = vld [vmem:[#allocation7 + $0xf8] sm:$0xff]  }
 0x85c   : > { %5641 = vmatmul.mubr.bf16.vlgmr.msra.gmra.mrb[76].mxu1 %v5414_v37  ;;  %5682 = vmatmul.mubr.bf16.vlgmr.msra.gmra.mrb[56].mxu0 %v5414_v37 }
 0x85d   : > { %5889 = vmatpush1.bf16.msra.mxu1 %v7827_v27  ;;  %5930 = vmatpush1.bf16.msra.mxu0 %v7830_v58  ;;  %v7905_v27 = vld [vmem:[#allocation7 + $0x38] sm:$0xff]  }
 0x85e   : > { %5890 = vmatprep.subr.bf16.mxu1 %v7835_v46  ;;  %5931 = vmatprep.subr.bf16.mxu0 %v7838_v62  ;;  %v7906_v58 = vld [vmem:[#allocation7 + $0xb8] sm:$0xff]  }
 0x85f   : > { %5920 = vmatprep.mubr.bf16.mxu1 %v11087_v36  ;;  %5961 = vmatprep.mubr.bf16.mxu0 %v11087_v36  ;;  %v7850_v36 = vld [vmem:[%s10858_s9 + $0x36c] ss:$16 sps:$4 sm:$0xff]  }
 0x861   : > { %5891 = vmatpush1.bf16.msra.mxu1 %v7833_v26  ;;  %5932 = vmatpush1.bf16.msra.mxu0 %v7836_v0 }
 0x862   : > { %5892 = vmatprep.subr.bf16.mxu1 %v7841_v50  ;;  %5933 = vmatprep.subr.bf16.mxu0 %v7844_v19 }
 0x865   : > { %5893 = vmatpush1.bf16.msra.mxu1 %v7839_v10  ;;  %5934 = vmatpush1.bf16.msra.mxu0 %v7842_v28 }
 0x866   : > { %5894 = vmatprep.subr.bf16.mxu1 %v7847_v32  ;;  %5935 = vmatprep.subr.bf16.mxu0 %v7850_v36 }
 0x869   : > { %5895 = vmatpush1.bf16.msra.mxu1 %v7845_v60  ;;  %5936 = vmatpush1.bf16.msra.mxu0 %v7848_v55 }
 0x86a   : > { %5896 = vmatprep.subr.bf16.mxu1 %v7853_v49  ;;  %5937 = vmatprep.subr.bf16.mxu0 %v7856_v14 }
 0x86d   : > { %5897 = vmatpush1.bf16.msra.mxu1 %v7851_v42  ;;  %5938 = vmatpush1.bf16.msra.mxu0 %v7854_v59 }
 0x86e   : > { %5898 = vmatprep.subr.bf16.mxu1 %v7859_v7  ;;  %5939 = vmatprep.subr.bf16.mxu0 %v7862_v17 }
 0x871   : > { %5899 = vmatpush1.bf16.msra.mxu1 %v7857_v43  ;;  %5940 = vmatpush1.bf16.msra.mxu0 %v7860_v33 }
 0x872   : > { %5900 = vmatprep.subr.bf16.mxu1 %v7865_v39  ;;  %5941 = vmatprep.subr.bf16.mxu0 %v7868_v51 }
 0x875   : > { %5901 = vmatpush1.bf16.msra.mxu1 %v7863_v38  ;;  %5942 = vmatpush1.bf16.msra.mxu0 %v7866_v63 }
 0x876   : > { %5902 = vmatprep.subr.bf16.mxu1 %v7871_v18  ;;  %5943 = vmatprep.subr.bf16.mxu0 %v7874_v52 }
 0x879   : > { %5903 = vmatpush1.bf16.msra.mxu1 %v7869_v13  ;;  %5944 = vmatpush1.bf16.msra.mxu0 %v7872_v24 }
 0x87a   : > { %7173 = vmatprep.subr.bf16.mxu1 %v7875_v23  ;;  %7195 = vmatprep.subr.bf16.mxu0 %v7876_v8 }
 0x87c   : > { %5921 = vmatmul.mubr.bf16.vlgmr.msra.gmra.mrb[80].mxu1 %v5694_v57  ;;  %5962 = vmatmul.mubr.bf16.vlgmr.msra.gmra.mrb[60].mxu0 %v5694_v57 }
 0x87d   : > { %7174 = vmatpush3.bf16.msra.mxu1 %v7877_v9  ;;  %7196 = vmatpush3.bf16.msra.mxu0 %v7878_v12  ;;  %v5974_v9 = vld [vmem:[%s10859_s10] sm:$0xf]  ;;  %v11091_v12 = vld [vmem:[#allocation29_spill] sm:$0xff] }
 0x87e   : > { %7175 = vmatprep.subr.bf16.mxu1 %v7879_v53  ;;  %7197 = vmatprep.subr.bf16.mxu0 %v7880_v40  ;;  %v5990_v53 = vsub.s32 3, %v11091_v12  ;;  %v5979_v40 = vrot.slane %v5974_v9, %v11089_v48 }
 0x881   : > { %7176 = vmatpush3.bf16.msra.mxu1 %v7881_v31  ;;  %7198 = vmatpush3.bf16.msra.mxu0 %v7882_v34  ;;  %v11092_v31 = vsub.s32 2, %v11091_v12 }
 0x882   : > { %7177 = vmatprep.subr.bf16.mxu1 %v7883_v3  ;;  %7199 = vmatprep.subr.bf16.mxu0 %v7884_v41 }
 0x883   : > { %v5987_v34 = vrot.slane %v5974_v9, %v11092_v31 }
 0x885   : > { %7178 = vmatpush3.bf16.msra.mxu1 %v7885_v30  ;;  %7200 = vmatpush3.bf16.msra.mxu0 %v7886_v25  ;;  %v5983_v30 = vrot.slane %v5974_v9, %v11090_v16  ;;  %v5991_v25 = vrot.slane %v5974_v9, %v5990_v53 }
 0x886   : > { %7179 = vmatprep.subr.bf16.mxu1 %v7887_v21  ;;  %7201 = vmatprep.subr.bf16.mxu0 %v7888_v29 }
 0x889   : > { %7180 = vmatpush3.bf16.msra.mxu1 %v7889_v11  ;;  %7202 = vmatpush3.bf16.msra.mxu0 %v7890_v44 }
 0x88a   : > { %7181 = vmatprep.subr.bf16.mxu1 %v7891_v4  ;;  %7203 = vmatprep.subr.bf16.mxu0 %v7892_v5 }
 0x88d   : > { %7182 = vmatpush3.bf16.msra.mxu1 %v7893_v61  ;;  %7204 = vmatpush3.bf16.msra.mxu0 %v7894_v56 }
 0x88e   : > { %7183 = vmatprep.subr.bf16.mxu1 %v7895_v45  ;;  %7205 = vmatprep.subr.bf16.mxu0 %v7896_v6 }
 0x891   : > { %7184 = vmatpush3.bf16.msra.mxu1 %v7897_v35  ;;  %7206 = vmatpush3.bf16.msra.mxu0 %v7898_v54 }
 0x892   : > { %7185 = vmatprep.subr.bf16.mxu1 %v7899_v15  ;;  %7207 = vmatprep.subr.bf16.mxu0 %v7900_v22 }
 0x895   : > { %7186 = vmatpush3.bf16.msra.mxu1 %v7901_v1  ;;  %7208 = vmatpush3.bf16.msra.mxu0 %v7902_v2 }
 0x896   : > { %7187 = vmatprep.subr.bf16.mxu1 %v7903_v47  ;;  %7209 = vmatprep.subr.bf16.mxu0 %v7904_v20 }
 0x899   : > { %7188 = vmatpush3.bf16.msra.mxu1 %v7905_v27  ;;  %7210 = vmatpush3.bf16.msra.mxu0 %v7906_v58 }
 0x8ef   : > { %v5124_v37 = vpop.f32.mrb[68].mxu1  ;;  %v5165_v46 = vpop.f32.mrb[48].mxu0 }
 0x8f0   : > { %v5126_v62 = vpop.f32.mrb[69].mxu1  ;;  %v5167_v26 = vpop.f32.mrb[49].mxu0 }
 0x8f1   : > { %v5128_v0 = vpop.f32.mrb[70].mxu1  ;;  %v5169_v50 = vpop.f32.mrb[50].mxu0 }
 0x8f2   : > { %v5129_v19 = vpop.f32.mrb[71].mxu1  ;;  %v5170_v10 = vpop.f32.mrb[51].mxu0 }
 0x90f   : > { %v5366_v28 = vpop.f32.mrb[72].mxu1  ;;  %v5407_v32 = vpop.f32.mrb[52].mxu0 }
 0x910   : > { %v5367_v36 = vadd.f32 %v5366_v28, %v5124_v37  ;;  %v5408_v60 = vadd.f32 %v5407_v32, %v5165_v46  ;;  %v5368_v55 = vpop.f32.mrb[73].mxu1  ;;  %v5409_v49 = vpop.f32.mrb[53].mxu0 }
 0x911   : > { %v5369_v14 = vadd.f32 %v5368_v55, %v5126_v62  ;;  %v5410_v42 = vadd.f32 %v5409_v49, %v5167_v26  ;;  %v5370_v59 = vpop.f32.mrb[74].mxu1  ;;  %v5411_v7 = vpop.f32.mrb[54].mxu0  ;;  %v7092_v62 = vld [vmem:[%s10861_s12] ss:$0 sm:$0xff] }
 0x912   : > { %v5371_v17 = vpop.f32.mrb[75].mxu1  ;;  %v5412_v43 = vpop.f32.mrb[55].mxu0 }
 0x92f   : > { %v5642_v33 = vpop.f32.mrb[76].mxu1  ;;  %v5683_v39 = vpop.f32.mrb[56].mxu0 }
 0x930   : > { %v5690_v51 = vadd.f32 %v5642_v33, %v5367_v36  ;;  %v5692_v38 = vadd.f32 %v5683_v39, %v5408_v60  ;;  %v5644_v63 = vpop.f32.mrb[77].mxu1  ;;  %v5685_v18 = vpop.f32.mrb[57].mxu0 }
 0x931   : > { %v5691_v52 = vadd.f32 %v5644_v63, %v5369_v14  ;;  %v5693_v13 = vadd.f32 %v5685_v18, %v5410_v42  ;;  %v5646_v24 = vpop.f32.mrb[78].mxu1  ;;  %v5687_v57 = vpop.f32.mrb[58].mxu0 }
 0x932   : > { %v5647_v23 = vpop.f32.mrb[79].mxu1  ;;  %v5688_v8 = vpop.f32.mrb[59].mxu0 }
 0x94f   : > { %v5922_v3 = vpop.f32.mrb[80].mxu1  ;;  %v5963_v41 = vpop.f32.mrb[60].mxu0 }
 0x950   : > { %v5970_v21 = vadd.f32 %v5922_v3, %v5690_v51  ;;  %v5972_v29 = vadd.f32 %v5963_v41, %v5692_v38  ;;  %v5924_v11 = vpop.f32.mrb[81].mxu1  ;;  %v5965_v44 = vpop.f32.mrb[61].mxu0 }
 0x951   : > { %v5971_v4 = vadd.f32 %v5924_v11, %v5691_v52  ;;  %v5973_v5 = vadd.f32 %v5965_v44, %v5693_v13  ;;  %v5926_v61 = vpop.f32.mrb[82].mxu1  ;;  %v5967_v56 = vpop.f32.mrb[62].mxu0 }
 0x952   : > { %v5996_v45 = vadd.f32 %v5979_v40, %v5970_v21  ;;  %v5998_v6 = vadd.f32 %v5987_v34, %v5972_v29  ;;  %v5927_v35 = vpop.f32.mrb[83].mxu1  ;;  %v5968_v48 = vpop.f32.mrb[63].mxu0 }
 0x953   : > { %v5997_v54 = vadd.f32 %v5983_v30, %v5971_v4  ;;  %v5999_v15 = vadd.f32 %v5991_v25, %v5973_v5 }
 0x954   : > { %v6000_v22 = vmax.f32 %v5996_v45, 0.0  ;;  %v6002_v1 = vmax.f32 %v5998_v6, 0.0 }
 0x955   : > { %v6001_v2 = vmax.f32 %v5997_v54, 0.0  ;;  %v6003_v47 = vmax.f32 %v5999_v15, 0.0 }
 0x956   : > { %v6004_v27 = vpack.c.bf16 %v6000_v22, %v6000_v22  ;;  %v6006_v58 = vpack.c.bf16 %v6002_v1, %v6002_v1 }
 0x957   : > { %v6005_v16 = vpack.c.bf16 %v6001_v2, %v6001_v2  ;;  %v6007_v20 = vpack.c.bf16 %v6003_v47, %v6003_v47 }
 0x959   : > { %6303 = vmatprep.mubr.bf16.mxu1 %v6005_v16  ;;  %6343 = vmatprep.mubr.bf16.mxu0 %v6007_v20 }
 0x95a   : > { %6304 = vmatmul.mubr.bf16.vlgmr.msra.gmra.mrb[84].mxu1 %v6004_v27  ;;  %6344 = vmatmul.mubr.bf16.vlgmr.msra.gmra.mrb[64].mxu0 %v6006_v58 }
 0xa2d   : > { %v7189_v37 = vpop.f32.mrb[84].mxu1  ;;  %v7211_v46 = vpop.f32.mrb[64].mxu0 }
 0xa2e   : > { %v7190_v26 = vpop.f32.mrb[85].mxu1  ;;  %v7212_v0 = vpop.f32.mrb[65].mxu0 }
 0xa2f   : > { %v7191_v50 = vadd.f32 %v7190_v26, %v7189_v37  ;;  %v7213_v19 = vadd.f32 %v7212_v0, %v7211_v46  ;;  %v7192_v10 = vpop.f32.mrb[86].mxu1  ;;  %v7214_v28 = vpop.f32.mrb[66].mxu0 }
 0xa30   : > { %v7193_v32 = vpop.f32.mrb[87].mxu1  ;;  %v7215_v36 = vpop.f32.mrb[67].mxu0 }
 0xa31   : > { %v6306_v60 = vadd.f32 %v7191_v50, %v7092_v62 }
 0xa33   : > { %v6346_v55 = vadd.f32 %v7213_v19, %v6306_v60 }
 0xa35   : > { %6351 = vmax.xlane.f32.xlu0 %v6346_v55 }
 0xac2   : > { %v6352_v49 = vpop.xlane.xlu0 %6351 }
 0xac3   : > { %v6353_v14 = vsub.f32 %v6346_v55, %v6352_v49 }
 0xac5   : > { %v6354_v42 = vmul.f32 1.442695, %v6353_v14 }
 0xac7   : > { %7907 = vpow2.f32 %v6354_v42 }
 0xad1   : > { %v7908_v59 = vpop.eup %7907 }
 0xad2   : > { %6356 = vadd.xlane.f32.xlu0 %v7908_v59 }
 0xb5f   : > { %v6357_v7 = vpop.xlane.xlu0 %6356 }
 0xb60   : > { %7909 = vrcp.f32 %v6357_v7 }
 0xb6a   : > { %v7910_v17 = vpop.eup %7909 }
 0xb6b   : > { %v6359_v43 = vmul.f32 %v7910_v17, %v7908_v59 }
 0xb6d   : > { %6360 = vst [vmem:[%s478_s3] sm:$0xff] %v6359_v43 }
 0xb6e   : > { %8008 = shalt.err (!%p8005_p11)
}
 0xb6f   : > { %s8009_s24 = scalar_lea.hbm %s10807_s27, 128  ;;  %s8013_s13 = scalar_lea.hbm %s11094_s18, 256 }
 0xb70   : > { %p8010_p13 = scmp.ne.s32.totalorder %s10807_s27, %s8009_s24  ;;  %p8014_p6 = scmp.lt.u32.totalorder %s10807_s27, %s11094_s18 }
 0xb71   : > { %p8015_p9 = scmp.lt.u32.totalorder %s8013_s13, %s8009_s24  ;;  %p8017_p10 = scmp.lt.u32.totalorder %s8009_s24, %s10807_s27 }
 0xb72   : > { %p8011_p5 = pnand %p8010_p13, %p11095_p1 }
 0xb73   : > { %p8016_p12 = por %p8015_p9, %p8014_p6 }
 0xb74   : > { %p8012_p0 = pneg %p8011_p5 }
 0xb75   : > { %p8018_p2 = por %p8017_p10, %p8016_p12 }
 0xb77   : > { %p8019_p3 = pnand %p8018_p2, %p8012_p0 }
 0xb79   : > { %8022 = shalt.err (!%p8019_p3)
}
 0xb7a   : > { %7286 = dma.vmem_to_hbm [thread:$0]  (%p11095_p1), %s10809_s23, 128, %s10807_s27, %s6362_s14  }
 0xb7b PF: > { %s11096_s3 = sld [smem:[#allocation14_spill]]  ;;  %s11097_s20 = sld [smem:[#allocation12_spill]] }
 0xb7c   : > { %s11098_s21 = sld [smem:[#allocation18_spill]] }
 0xb81   : > { %p7308_p4 = scmp.ge.s32.totalorder %s11096_s3, 2  ;;  %s6387_s19 = sand.u32 1, %s11097_s20  }
 0xb82   : > { %p11099_p7 = scmp.ne.s32.totalorder %s11098_s21, 0  ;;  %s6388_s29 = scalar_lea.sflag [#allocation4], %s6387_s19 }
 0xb84   : > { %p7299_p8 = pnand %p7308_p4, %p11099_p7 }
 0xb86   : > { %8048 = dma.done.wait (!%p7299_p8), %s6388_s29, 128  }
 0xb87   : > { %8050 = vsyncadd (!%p7299_p8), %s6388_s29, 4294967168  ;;  %s11100_s28 = sld [smem:[#allocation15_spill]]  ;;  %s11101_s17 = sld [smem:[#allocation13_spill]] }
 0xb88   : > { %s11102_s27 = sld [smem:[#allocation16_spill]]  ;;  %s11103_s25 = smov %s8057_s26 }
 0xb8d   : > { %p25_p11 = scmp.ge.s32.totalorder %s11100_s28, 4   ;;  %s11104_s26 = smov %s11101_s17 }
 0xb8f   :  { %27 = sbr.rel (!%p25_p11) target bundleno = 8 (0x8), region = 123 }
 0xb96   :  { %6393 = vsyncpa [#allocation3], 1 }
 0xb97   :  { %6395 = vsyncpa [#allocation3 + $0x1], 1 }
 0xb98   :  { %6396 = vsyncpa [#allocation6], 1 }
 0xb99   :  { %6397 = vsyncpa [#allocation4], 1 }
 0xb9a   :  { %6399 = vsyncpa [#allocation4 + $0x1], 1 }

</bundles_post_ra>
